<compile_context>
chip_gen: v7x
topology: tpu7x:2x2x1
jax: 0.10.0
libtpu: 0.0.40
codegen_flags: <defaults>
</compile_context>

<pallas_src>
import jax
import jax.numpy as jnp
from jax.experimental import pallas as pl
from jax.experimental.pallas import tpu as pltpu


def _round_up(x, m):
    return ((x + m - 1) // m) * m


def _pick_tile(m, candidates=(512, 256, 128, 64, 32, 16)):
    """Largest tile that still yields >= 2 grid steps (when m allows it)."""
    for t in candidates:
        if m > t:
            return t
    return candidates[-1]


# ----------------------------------------------------------------------------
# Kernel 1: fused conv (im2col matmul) + bias + ReLU + 2x2 max-pool epilogue.
# ----------------------------------------------------------------------------
def _conv_relu_pool_kernel(p_ref, w_ref, b_ref, o_ref):
    """p_ref: (TILE_M, KPP)    bf16  stride-2 6x6xC patch rows (1 per pooled px)
       w_ref: (KPP, 4*OCP)     bf16  4 pool-offset weights, concatenated on N
       b_ref: (1, OCP)         f32   conv bias (padded to 128 lanes)
       o_ref: (TILE_M, OCP)    bf16  pooled activation

    pooled = relu(max_g(P @ W_g) + b) == maxpool2x2(relu(conv(x) + b)),
    valid because the bias is shared by the 4 pool taps and ReLU is monotone."""
    ocp = o_ref.shape[-1]
    z = jnp.dot(p_ref[...], w_ref[...], preferred_element_type=jnp.float32)
    m = jnp.maximum(jnp.maximum(z[:, 0 * ocp:1 * ocp], z[:, 1 * ocp:2 * ocp]),
                    jnp.maximum(z[:, 2 * ocp:3 * ocp], z[:, 3 * ocp:4 * ocp]))
    o_ref[...] = jnp.maximum(m + b_ref[...], 0.0).astype(o_ref.dtype)


# ----------------------------------------------------------------------------
# Kernel 2: fused fc1 + ReLU + fc2 + ReLU + fc3 (weights resident in VMEM,
# batch rows pipelined over the grid).
# ----------------------------------------------------------------------------
def _fc_stack_kernel(x_ref, w1_ref, b1_ref, w2_ref, b2_ref, w3_ref, b3_ref, o_ref):
    h = jnp.dot(x_ref[...], w1_ref[...], preferred_element_type=jnp.float32) + b1_ref[...]
    h = jnp.maximum(h, 0.0).astype(jnp.bfloat16)
    h = jnp.dot(h, w2_ref[...], preferred_element_type=jnp.float32) + b2_ref[...]
    h = jnp.maximum(h, 0.0).astype(jnp.bfloat16)
    o_ref[...] = jnp.dot(h, w3_ref[...], preferred_element_type=jnp.float32) + b3_ref[...]


# ----------------------------------------------------------------------------
# Wrapper-side glue (pure XLA, constant-sized):
#   * stride-2 6x6 patch extraction on the pooled output grid (bf16)
#   * expansion of the 5x5 conv weight into the wide 4-offset matmul weight
# ----------------------------------------------------------------------------
def _fused_pool_patches(x_nhwc, kh=5, kw=5):
    """For every pooled output pixel (ph, pw), gather the (kh+1)x(kw+1)xC input
    window at (2*ph, 2*pw).  Returns (N*POH*POW, 36*C), POH, POW."""
    # TODO(synk): do this gather in-kernel via pl.ANY + manual make_async_copy.
    N, H, W, C = x_nhwc.shape
    OH, OW = H - kh + 1, W - kw + 1
    POH, POW = OH // 2, OW // 2
    cols = []
    for i in range(kh + 1):
        for j in range(kw + 1):
            cols.append(x_nhwc[:, i::2, j::2, :][:, :POH, :POW, :])
    patches = jnp.stack(cols, axis=3)                      # (N, POH, POW, 36, C)
    return patches.reshape(N * POH * POW, (kh + 1) * (kw + 1) * C), POH, POW


def _conv_pool_weight_wide(w_oihw, kpp, ocp):
    """PyTorch conv weight (OC, C, 5, 5) -> (kpp, 4*ocp): one (6*6*C, OC) matmul
    weight per 2x2 pool offset (dh, dw), each OC zero-padded to `ocp` lanes,
    concatenated along N, K rows zero-padded to `kpp`."""
    OC, C, KH, KW = w_oihw.shape
    kp = (KH + 1) * (KW + 1) * C
    wt = jnp.transpose(w_oihw, (2, 3, 1, 0))               # (KH, KW, C, OC)
    mats = []
    for dh in range(2):
        for dw in range(2):
            m = jnp.zeros((KH + 1, KW + 1, C, OC), w_oihw.dtype)
            m = m.at[dh:dh + KH, dw:dw + KW].set(wt)
            m = m.reshape(kp, OC)
            mats.append(jnp.pad(m, ((0, 0), (0, ocp - OC))))
    w = jnp.concatenate(mats, axis=1)                       # (kp, 4*ocp)
    return jnp.pad(w, ((0, kpp - kp), (0, 0)))


def conv_relu_pool(x_nhwc_bf16, w_oihw, b, *, ocp=128):
    """conv(5x5, valid) + bias + ReLU + maxpool2x2.
    NHWC bf16 in / NHWC bf16 (pooled, channel-padded to `ocp`) out."""
    N = x_nhwc_bf16.shape[0]
    OC = w_oihw.shape[0]

    patches, POH, POW = _fused_pool_patches(x_nhwc_bf16)
    M, KP = patches.shape
    KPP = _round_up(KP, 128)
    tile_m = _pick_tile(M)
    mpad = _round_up(M, tile_m)
    patches = jnp.pad(patches, ((0, mpad - M), (0, KPP - KP)))

    w4 = _conv_pool_weight_wide(w_oihw, KPP, ocp).astype(jnp.bfloat16)  # (KPP, 4*ocp)
    b2 = jnp.pad(b, (0, ocp - OC)).reshape(1, ocp).astype(jnp.float32)

    out = pl.pallas_call(
        _conv_relu_pool_kernel,
        out_shape=jax.ShapeDtypeStruct((mpad, ocp), jnp.bfloat16),
        grid=(mpad // tile_m,),
        in_specs=[
            pl.BlockSpec((tile_m, KPP), lambda i: (i, 0)),       # patches: pipelined
            pl.BlockSpec((KPP, 4 * ocp), lambda i: (0, 0)),      # weights: resident
            pl.BlockSpec((1, ocp), lambda i: (0, 0)),            # bias: resident
        ],
        out_specs=pl.BlockSpec((tile_m, ocp), lambda i: (i, 0)),
        compiler_params=pltpu.CompilerParams(
            dimension_semantics=("parallel",),                   # 2 TCs on v7x
            vmem_limit_bytes=32 * 1024 * 1024,
        ),
    )(patches, w4, b2)
    return out[:M].reshape(N, POH, POW, ocp)


def fc_stack(x_bf16, w1, b1, w2, b2, w3, b3, *, conv_oc, ocp, poh, pow_):
    """fc1+ReLU -> fc2+ReLU -> fc3 in a single Pallas kernel.
    x_bf16: (N, poh*pow_*ocp) NHWC-flattened conv2 output (channels padded to
    `ocp`); fc1's weight is permuted/expanded here to match that layout."""
    N, K = x_bf16.shape
    H1, H2 = w1.shape[0], w2.shape[0]
    NC = w3.shape[0]
    H1P = _round_up(H1, 128)          # 480 -> 512
    H2P = _round_up(H2, 128)          # 336 -> 384
    NCP = 128                         # lane-dense final store

    # fc1 weight: PyTorch order is input index c*HW + hw; reindex to the NHWC
    # channel-padded flatten order hw*ocp + c (zero rows for padded channels).
    w1t = w1.T.reshape(conv_oc, poh * pow_, H1)              # [c, hw, o]
    w1t = jnp.transpose(w1t, (1, 0, 2))                      # [hw, c, o]
    w1t = jnp.pad(w1t, ((0, 0), (0, ocp - conv_oc), (0, H1P - H1)))
    w1t = w1t.reshape(poh * pow_ * ocp, H1P).astype(jnp.bfloat16)

    w2t = jnp.pad(w2.T, ((0, H1P - H1), (0, H2P - H2))).astype(jnp.bfloat16)
    w3t = jnp.pad(w3.T, ((0, H2P - H2), (0, NCP - NC))).astype(jnp.bfloat16)
    b1r = jnp.pad(b1, (0, H1P - H1)).reshape(1, H1P).astype(jnp.float32)
    b2r = jnp.pad(b2, (0, H2P - H2)).reshape(1, H2P).astype(jnp.float32)
    b3r = jnp.pad(b3, (0, NCP - NC)).reshape(1, NCP).astype(jnp.float32)

    tile_b = _pick_tile(N, (256, 128, 64, 32, 16))
    mpad = _round_up(N, tile_b)
    xp = jnp.pad(x_bf16, ((0, mpad - N), (0, 0)))

    out = pl.pallas_call(
        _fc_stack_kernel,
        out_shape=jax.ShapeDtypeStruct((mpad, NCP), jnp.float32),
        grid=(mpad // tile_b,),
        in_specs=[
            pl.BlockSpec((tile_b, K), lambda i: (i, 0)),         # x rows: pipelined
            pl.BlockSpec(w1t.shape, lambda i: (0, 0)),           # weights: resident
            pl.BlockSpec(b1r.shape, lambda i: (0, 0)),
            pl.BlockSpec(w2t.shape, lambda i: (0, 0)),
            pl.BlockSpec(b2r.shape, lambda i: (0, 0)),
            pl.BlockSpec(w3t.shape, lambda i: (0, 0)),
            pl.BlockSpec(b3r.shape, lambda i: (0, 0)),
        ],
        out_specs=pl.BlockSpec((tile_b, NCP), lambda i: (i, 0)),
        compiler_params=pltpu.CompilerParams(
            dimension_semantics=("parallel",),
            vmem_limit_bytes=32 * 1024 * 1024,
        ),
    )(xp, w1t, b1r, w2t, b2r, w3t, b3r)
    return out[:N, :NC]


# ----------------------------------------------------------------------------
# Forward pass
# ----------------------------------------------------------------------------
def combined_lenet_forward(x_nchw, params):
    N = x_nchw.shape[0]
    oc1 = params["conv1_w"].shape[0]
    oc2 = params["conv2_w"].shape[0]

    x = jnp.transpose(x_nchw, (0, 2, 3, 1)).astype(jnp.bfloat16)   # NCHW -> NHWC bf16

    a1 = conv_relu_pool(x, params["conv1_w"], params["conv1_b"])    # (N, 14, 14, 128)
    a1 = a1[..., :oc1]                                              # (N, 14, 14, 24)
    a2 = conv_relu_pool(a1, params["conv2_w"], params["conv2_b"])   # (N, 5, 5, 128)

    # No activation transpose: plain NHWC flatten (channels padded to 128);
    # fc1's weight is permuted inside fc_stack to match this order.
    flat = a2.reshape(N, -1)                                        # (N, 3200) bf16

    return fc_stack(flat, params["fc1_w"], params["fc1_b"],
                    params["fc2_w"], params["fc2_b"],
                    params["fc3_w"], params["fc3_b"],
                    conv_oc=oc2, ocp=a2.shape[3],
                    poh=a2.shape[1], pow_=a2.shape[2])


# ----------------------------------------------------------------------------
# Deterministic parameter init (PyTorch-style uniform(-1/sqrt(fan_in), +...))
# ----------------------------------------------------------------------------
def init_params(key, num_classes=10):
    ks = jax.random.split(key, 10)

    def u(k, shape, fan_in):
        bound = 1.0 / jnp.sqrt(float(fan_in))
        return jax.random.uniform(k, shape, jnp.float32, -bound, bound)

    return {
        "conv1_w": u(ks[0], (24, 3, 5, 5), 3 * 5 * 5),
        "conv1_b": u(ks[1], (24,), 3 * 5 * 5),
        "conv2_w": u(ks[2], (64, 24, 5, 5), 24 * 5 * 5),
        "conv2_b": u(ks[3], (64,), 24 * 5 * 5),
        "fc1_w": u(ks[4], (480, 1600), 1600),
        "fc1_b": u(ks[5], (480,), 1600),
        "fc2_w": u(ks[6], (336, 480), 480),
        "fc2_b": u(ks[7], (336,), 480),
        "fc3_w": u(ks[8], (num_classes, 336), 336),
        "fc3_b": u(ks[9], (num_classes,), 336),
    }


if __name__ == "__main__":
    key = jax.random.PRNGKey(0)
    k_params, k_x = jax.random.split(key)
    params = init_params(k_params)

    # LeNet geometry requires 32x32 spatial input (fc1 expects 16*4*5*5 = 1600).
    x = jax.random.normal(k_x, (2, 3, 32, 32), dtype=jnp.float32)

    out = jax.jit(combined_lenet_forward)(x, params)
    out = jax.block_until_ready(out)
    assert out.shape == (2, 10), out.shape
    print("KERNEL_OK")
</pallas_src>

<mosaic_0001>
module attributes {stable_mosaic.version = 11 : i64} {
  func.func @_conv_relu_pool_kernel(%arg0: i32, %arg1: memref<256x128xbf16, #tpu.memory_space<vmem>>, %arg2: memref<128x512xbf16, #tpu.memory_space<vmem>>, %arg3: memref<1x128xf32, #tpu.memory_space<vmem>>, %arg4: memref<256x128xbf16, #tpu.memory_space<vmem>>) attributes {dimension_semantics = [#tpu.dimension_semantics<parallel>], iteration_bounds = array<i64: 2>, scalar_prefetch = 0 : i64, scratch_operands = 0 : i64, tpu.core_type = #tpu.core_type<tc>, window_params = [{transform_indices = @transform_0, window_bounds = array<i64: 256, 128>}, {pipeline_mode = #tpu.pipeline_mode<synchronous>, transform_indices = @transform_1, window_bounds = array<i64: 128, 512>}, {pipeline_mode = #tpu.pipeline_mode<synchronous>, transform_indices = @transform_2, window_bounds = array<i64: 1, 128>}, {transform_indices = @transform_3, window_bounds = array<i64: 256, 128>}]} {
    %c0 = arith.constant 0 : index
    %c0_0 = arith.constant 0 : index
    %0 = vector.load %arg1[%c0, %c0_0] : memref<256x128xbf16, #tpu.memory_space<vmem>>, vector<256x128xbf16>
    %c0_1 = arith.constant 0 : index
    %c0_2 = arith.constant 0 : index
    %1 = vector.load %arg2[%c0_1, %c0_2] : memref<128x512xbf16, #tpu.memory_space<vmem>>, vector<128x512xbf16>
    %cst = arith.constant dense<0.000000e+00> : vector<256x512xf32>
    %2 = tpu.matmul %0, %1, %cst {dimension_numbers = #tpu.dot_dimension_numbers<[1], [0], [0], [1], [0, 0, 1, 1], [], []>} : vector<256x128xbf16>, vector<128x512xbf16>, vector<256x512xf32> -> vector<256x512xf32>
    %3 = vector.extract_strided_slice %2 {offsets = [0, 0], sizes = [256, 128], strides = [1, 1]} : vector<256x512xf32> to vector<256x128xf32>
    %4 = vector.extract_strided_slice %2 {offsets = [0, 128], sizes = [256, 128], strides = [1, 1]} : vector<256x512xf32> to vector<256x128xf32>
    %5 = arith.maximumf %3, %4 : vector<256x128xf32>
    %6 = vector.extract_strided_slice %2 {offsets = [0, 256], sizes = [256, 128], strides = [1, 1]} : vector<256x512xf32> to vector<256x128xf32>
    %7 = vector.extract_strided_slice %2 {offsets = [0, 384], sizes = [256, 128], strides = [1, 1]} : vector<256x512xf32> to vector<256x128xf32>
    %8 = arith.maximumf %6, %7 : vector<256x128xf32>
    %9 = arith.maximumf %5, %8 : vector<256x128xf32>
    %c0_3 = arith.constant 0 : index
    %c0_4 = arith.constant 0 : index
    %10 = vector.load %arg3[%c0_3, %c0_4] : memref<1x128xf32, #tpu.memory_space<vmem>>, vector<1x128xf32>
    %11 = vector.broadcast %10 : vector<1x128xf32> to vector<256x128xf32>
    %12 = arith.addf %9, %11 : vector<256x128xf32>
    %cst_5 = arith.constant 0.000000e+00 : f32
    %13 = vector.broadcast %cst_5 : f32 to vector<256x128xf32>
    %14 = arith.maximumf %12, %13 : vector<256x128xf32>
    %15 = arith.truncf %14 : vector<256x128xf32> to vector<256x128xbf16>
    %c0_6 = arith.constant 0 : index
    %c0_7 = arith.constant 0 : index
    %16 = vector.load %arg4[%c0_6, %c0_7] : memref<256x128xbf16, #tpu.memory_space<vmem>>, vector<256x128xbf16>
    tpu.vector_store %arg4[%c0_6, %c0_7], %15 {strides = array<i32>} : memref<256x128xbf16, #tpu.memory_space<vmem>>, vector<256x128xbf16>,
    return
  }
  func.func @transform_0(%arg0: i32) -> (i32, i32) {
    %c0_i32 = arith.constant 0 : i32
    %c0_i32_0 = arith.constant 0 : i32
    return %arg0, %c0_i32 : i32, i32
  }
  func.func @transform_1(%arg0: i32) -> (i32, i32) {
    %c0_i32 = arith.constant 0 : i32
    %c0_i32_0 = arith.constant 0 : i32
    %c0_i32_1 = arith.constant 0 : i32
    return %c0_i32, %c0_i32_0 : i32, i32
  }
  func.func @transform_2(%arg0: i32) -> (i32, i32) {
    %c0_i32 = arith.constant 0 : i32
    %c0_i32_0 = arith.constant 0 : i32
    %c0_i32_1 = arith.constant 0 : i32
    return %c0_i32, %c0_i32_0 : i32, i32
  }
  func.func @transform_3(%arg0: i32) -> (i32, i32) {
    %c0_i32 = arith.constant 0 : i32
    %c0_i32_0 = arith.constant 0 : i32
    return %arg0, %c0_i32 : i32, i32
  }
}

module attributes {stable_mosaic.version = 11 : i64} {
  func.func @_conv_relu_pool_kernel(%arg0: i32, %arg1: memref<32x896xbf16, #tpu.memory_space<vmem>>, %arg2: memref<896x512xbf16, #tpu.memory_space<vmem>>, %arg3: memref<1x128xf32, #tpu.memory_space<vmem>>, %arg4: memref<32x128xbf16, #tpu.memory_space<vmem>>) attributes {dimension_semantics = [#tpu.dimension_semantics<parallel>], iteration_bounds = array<i64: 2>, scalar_prefetch = 0 : i64, scratch_operands = 0 : i64, tpu.core_type = #tpu.core_type<tc>, window_params = [{transform_indices = @transform_0, window_bounds = array<i64: 32, 896>}, {pipeline_mode = #tpu.pipeline_mode<synchronous>, transform_indices = @transform_1, window_bounds = array<i64: 896, 512>}, {pipeline_mode = #tpu.pipeline_mode<synchronous>, transform_indices = @transform_2, window_bounds = array<i64: 1, 128>}, {transform_indices = @transform_3, window_bounds = array<i64: 32, 128>}]} {
    %c0 = arith.constant 0 : index
    %c0_0 = arith.constant 0 : index
    %0 = vector.load %arg1[%c0, %c0_0] : memref<32x896xbf16, #tpu.memory_space<vmem>>, vector<32x896xbf16>
    %c0_1 = arith.constant 0 : index
    %c0_2 = arith.constant 0 : index
    %1 = vector.load %arg2[%c0_1, %c0_2] : memref<896x512xbf16, #tpu.memory_space<vmem>>, vector<896x512xbf16>
    %cst = arith.constant dense<0.000000e+00> : vector<32x512xf32>
    %2 = tpu.matmul %0, %1, %cst {dimension_numbers = #tpu.dot_dimension_numbers<[1], [0], [0], [1], [0, 0, 1, 1], [], []>} : vector<32x896xbf16>, vector<896x512xbf16>, vector<32x512xf32> -> vector<32x512xf32>
    %3 = vector.extract_strided_slice %2 {offsets = [0, 0], sizes = [32, 128], strides = [1, 1]} : vector<32x512xf32> to vector<32x128xf32>
    %4 = vector.extract_strided_slice %2 {offsets = [0, 128], sizes = [32, 128], strides = [1, 1]} : vector<32x512xf32> to vector<32x128xf32>
    %5 = arith.maximumf %3, %4 : vector<32x128xf32>
    %6 = vector.extract_strided_slice %2 {offsets = [0, 256], sizes = [32, 128], strides = [1, 1]} : vector<32x512xf32> to vector<32x128xf32>
    %7 = vector.extract_strided_slice %2 {offsets = [0, 384], sizes = [32, 128], strides = [1, 1]} : vector<32x512xf32> to vector<32x128xf32>
    %8 = arith.maximumf %6, %7 : vector<32x128xf32>
    %9 = arith.maximumf %5, %8 : vector<32x128xf32>
    %c0_3 = arith.constant 0 : index
    %c0_4 = arith.constant 0 : index
    %10 = vector.load %arg3[%c0_3, %c0_4] : memref<1x128xf32, #tpu.memory_space<vmem>>, vector<1x128xf32>
    %11 = vector.broadcast %10 : vector<1x128xf32> to vector<32x128xf32>
    %12 = arith.addf %9, %11 : vector<32x128xf32>
    %cst_5 = arith.constant 0.000000e+00 : f32
    %13 = vector.broadcast %cst_5 : f32 to vector<32x128xf32>
    %14 = arith.maximumf %12, %13 : vector<32x128xf32>
    %15 = arith.truncf %14 : vector<32x128xf32> to vector<32x128xbf16>
    %c0_6 = arith.constant 0 : index
    %c0_7 = arith.constant 0 : index
    %16 = vector.load %arg4[%c0_6, %c0_7] : memref<32x128xbf16, #tpu.memory_space<vmem>>, vector<32x128xbf16>
    tpu.vector_store %arg4[%c0_6, %c0_7], %15 {strides = array<i32>} : memref<32x128xbf16, #tpu.memory_space<vmem>>, vector<32x128xbf16>,
    return
  }
  func.func @transform_0(%arg0: i32) -> (i32, i32) {
    %c0_i32 = arith.constant 0 : i32
    %c0_i32_0 = arith.constant 0 : i32
    return %arg0, %c0_i32 : i32, i32
  }
  func.func @transform_1(%arg0: i32) -> (i32, i32) {
    %c0_i32 = arith.constant 0 : i32
    %c0_i32_0 = arith.constant 0 : i32
    %c0_i32_1 = arith.constant 0 : i32
    return %c0_i32, %c0_i32_0 : i32, i32
  }
  func.func @transform_2(%arg0: i32) -> (i32, i32) {
    %c0_i32 = arith.constant 0 : i32
    %c0_i32_0 = arith.constant 0 : i32
    %c0_i32_1 = arith.constant 0 : i32
    return %c0_i32, %c0_i32_0 : i32, i32
  }
  func.func @transform_3(%arg0: i32) -> (i32, i32) {
    %c0_i32 = arith.constant 0 : i32
    %c0_i32_0 = arith.constant 0 : i32
    return %arg0, %c0_i32 : i32, i32
  }
}

module attributes {stable_mosaic.version = 11 : i64} {
  func.func @_fc_stack_kernel(%arg0: i32, %arg1: memref<16x3200xbf16, #tpu.memory_space<vmem>>, %arg2: memref<3200x512xbf16, #tpu.memory_space<vmem>>, %arg3: memref<1x512xf32, #tpu.memory_space<vmem>>, %arg4: memref<512x384xbf16, #tpu.memory_space<vmem>>, %arg5: memref<1x384xf32, #tpu.memory_space<vmem>>, %arg6: memref<384x128xbf16, #tpu.memory_space<vmem>>, %arg7: memref<1x128xf32, #tpu.memory_space<vmem>>, %arg8: memref<16x128xf32, #tpu.memory_space<vmem>>) attributes {dimension_semantics = [#tpu.dimension_semantics<parallel>], iteration_bounds = array<i64: 1>, scalar_prefetch = 0 : i64, scratch_operands = 0 : i64, tpu.core_type = #tpu.core_type<tc>, window_params = [{transform_indices = @transform_0, window_bounds = array<i64: 16, 3200>}, {pipeline_mode = #tpu.pipeline_mode<synchronous>, transform_indices = @transform_1, window_bounds = array<i64: 3200, 512>}, {pipeline_mode = #tpu.pipeline_mode<synchronous>, transform_indices = @transform_2, window_bounds = array<i64: 1, 512>}, {pipeline_mode = #tpu.pipeline_mode<synchronous>, transform_indices = @transform_3, window_bounds = array<i64: 512, 384>}, {pipeline_mode = #tpu.pipeline_mode<synchronous>, transform_indices = @transform_4, window_bounds = array<i64: 1, 384>}, {pipeline_mode = #tpu.pipeline_mode<synchronous>, transform_indices = @transform_5, window_bounds = array<i64: 384, 128>}, {pipeline_mode = #tpu.pipeline_mode<synchronous>, transform_indices = @transform_6, window_bounds = array<i64: 1, 128>}, {transform_indices = @transform_7, window_bounds = array<i64: 16, 128>}]} {
    %c0 = arith.constant 0 : index
    %c0_0 = arith.constant 0 : index
    %0 = vector.load %arg1[%c0, %c0_0] : memref<16x3200xbf16, #tpu.memory_space<vmem>>, vector<16x3200xbf16>
    %c0_1 = arith.constant 0 : index
    %c0_2 = arith.constant 0 : index
    %1 = vector.load %arg2[%c0_1, %c0_2] : memref<3200x512xbf16, #tpu.memory_space<vmem>>, vector<3200x512xbf16>
    %cst = arith.constant dense<0.000000e+00> : vector<16x512xf32>
    %2 = tpu.matmul %0, %1, %cst {dimension_numbers = #tpu.dot_dimension_numbers<[1], [0], [0], [1], [0, 0, 1, 1], [], []>} : vector<16x3200xbf16>, vector<3200x512xbf16>, vector<16x512xf32> -> vector<16x512xf32>
    %c0_3 = arith.constant 0 : index
    %c0_4 = arith.constant 0 : index
    %3 = vector.load %arg3[%c0_3, %c0_4] : memref<1x512xf32, #tpu.memory_space<vmem>>, vector<1x512xf32>
    %4 = vector.broadcast %3 : vector<1x512xf32> to vector<16x512xf32>
    %5 = arith.addf %2, %4 : vector<16x512xf32>
    %cst_5 = arith.constant 0.000000e+00 : f32
    %6 = vector.broadcast %cst_5 : f32 to vector<16x512xf32>
    %7 = arith.maximumf %5, %6 : vector<16x512xf32>
    %8 = arith.truncf %7 : vector<16x512xf32> to vector<16x512xbf16>
    %c0_6 = arith.constant 0 : index
    %c0_7 = arith.constant 0 : index
    %9 = vector.load %arg4[%c0_6, %c0_7] : memref<512x384xbf16, #tpu.memory_space<vmem>>, vector<512x384xbf16>
    %cst_8 = arith.constant dense<0.000000e+00> : vector<16x384xf32>
    %10 = tpu.matmul %8, %9, %cst_8 {dimension_numbers = #tpu.dot_dimension_numbers<[1], [0], [0], [1], [0, 0, 1, 1], [], []>} : vector<16x512xbf16>, vector<512x384xbf16>, vector<16x384xf32> -> vector<16x384xf32>
    %c0_9 = arith.constant 0 : index
    %c0_10 = arith.constant 0 : index
    %11 = vector.load %arg5[%c0_9, %c0_10] : memref<1x384xf32, #tpu.memory_space<vmem>>, vector<1x384xf32>
    %12 = vector.broadcast %11 : vector<1x384xf32> to vector<16x384xf32>
    %13 = arith.addf %10, %12 : vector<16x384xf32>
    %cst_11 = arith.constant 0.000000e+00 : f32
    %14 = vector.broadcast %cst_11 : f32 to vector<16x384xf32>
    %15 = arith.maximumf %13, %14 : vector<16x384xf32>
    %16 = arith.truncf %15 : vector<16x384xf32> to vector<16x384xbf16>
    %c0_12 = arith.constant 0 : index
    %c0_13 = arith.constant 0 : index
    %17 = vector.load %arg6[%c0_12, %c0_13] : memref<384x128xbf16, #tpu.memory_space<vmem>>, vector<384x128xbf16>
    %cst_14 = arith.constant dense<0.000000e+00> : vector<16x128xf32>
    %18 = tpu.matmul %16, %17, %cst_14 {dimension_numbers = #tpu.dot_dimension_numbers<[1], [0], [0], [1], [0, 0, 1, 1], [], []>} : vector<16x384xbf16>, vector<384x128xbf16>, vector<16x128xf32> -> vector<16x128xf32>
    %c0_15 = arith.constant 0 : index
    %c0_16 = arith.constant 0 : index
    %19 = vector.load %arg7[%c0_15, %c0_16] : memref<1x128xf32, #tpu.memory_space<vmem>>, vector<1x128xf32>
    %20 = vector.broadcast %19 : vector<1x128xf32> to vector<16x128xf32>
    %21 = arith.addf %18, %20 : vector<16x128xf32>
    %c0_17 = arith.constant 0 : index
    %c0_18 = arith.constant 0 : index
    %22 = vector.load %arg8[%c0_17, %c0_18] : memref<16x128xf32, #tpu.memory_space<vmem>>, vector<16x128xf32>
    tpu.vector_store %arg8[%c0_17, %c0_18], %21 {strides = array<i32>} : memref<16x128xf32, #tpu.memory_space<vmem>>, vector<16x128xf32>,
    return
  }
  func.func @transform_0(%arg0: i32) -> (i32, i32) {
    %c0_i32 = arith.constant 0 : i32
    %c0_i32_0 = arith.constant 0 : i32
    return %arg0, %c0_i32 : i32, i32
  }
  func.func @transform_1(%arg0: i32) -> (i32, i32) {
    %c0_i32 = arith.constant 0 : i32
    %c0_i32_0 = arith.constant 0 : i32
    %c0_i32_1 = arith.constant 0 : i32
    return %c0_i32, %c0_i32_0 : i32, i32
  }
  func.func @transform_2(%arg0: i32) -> (i32, i32) {
    %c0_i32 = arith.constant 0 : i32
    %c0_i32_0 = arith.constant 0 : i32
    %c0_i32_1 = arith.constant 0 : i32
    return %c0_i32, %c0_i32_0 : i32, i32
  }
  func.func @transform_3(%arg0: i32) -> (i32, i32) {
    %c0_i32 = arith.constant 0 : i32
    %c0_i32_0 = arith.constant 0 : i32
    %c0_i32_1 = arith.constant 0 : i32
    return %c0_i32, %c0_i32_0 : i32, i32
  }
  func.func @transform_4(%arg0: i32) -> (i32, i32) {
    %c0_i32 = arith.constant 0 : i32
    %c0_i32_0 = arith.constant 0 : i32
    %c0_i32_1 = arith.constant 0 : i32
    return %c0_i32, %c0_i32_0 : i32, i32
  }
  func.func @transform_5(%arg0: i32) -> (i32, i32) {
    %c0_i32 = arith.constant 0 : i32
    %c0_i32_0 = arith.constant 0 : i32
    %c0_i32_1 = arith.constant 0 : i32
    return %c0_i32, %c0_i32_0 : i32, i32
  }
  func.func @transform_6(%arg0: i32) -> (i32, i32) {
    %c0_i32 = arith.constant 0 : i32
    %c0_i32_0 = arith.constant 0 : i32
    %c0_i32_1 = arith.constant 0 : i32
    return %c0_i32, %c0_i32_0 : i32, i32
  }
  func.func @transform_7(%arg0: i32) -> (i32, i32) {
    %c0_i32 = arith.constant 0 : i32
    %c0_i32_0 = arith.constant 0 : i32
    return %arg0, %c0_i32 : i32, i32
  }
}

</mosaic_0001>

<bundles_post_ra>
// kernel: combined_lenet_forward.3
= control target key start
LH: loop header
LB: loop body
LE: loop exit
PB: predicated region body
PF: predicated region fallthrough
CT: control target
= control target key end

     0   :  { %s1585_s12 = smov 0   ;;  %s1810_s0 = inlined_call_operand.vmem [shape: bf16[512,128], index: 0, kind: input, shape index: {}]   ;;  %s1811_s1 = inlined_call_operand.vmem [shape: bf16[128,512], index: 1, kind: input, shape index: {}]   ;;  %s1812_s2 = inlined_call_operand.vmem [shape: f32[1,128], index: 2, kind: input, shape index: {}]   ;;  %s1813_s3 = inlined_call_operand.vmem [shape: bf16[512,128], index: 3, kind: output, shape index: {}]  }
   0x1 LB: > { %s1264_s13 = sadd.s32 4294967295, %s1562_s12   ;;  %p1268_p0 = scmp.ge.s32.totalorder %s1562_s12, 1  ;;  %s1562_s12 = sphi %s1585_s12, %s13_s12  }
   0x2   : > { %p138_p1 = scmp.lt.s32.totalorder %s1562_s12, 3 }
   0x4   : > { %p139_p2 = pnand %p1268_p0, %p138_p1 }
   0x5   : > { %v1492_v0 = vld [vmem:[%s1811_s1 + $0x4] ss:$16 sps:$4 sm:$0xff] (!%p139_p2)   ;;  %v1494_v1 = vld [vmem:[%s1811_s1 + $0xc] ss:$16 sps:$4 sm:$0xff] (!%p139_p2)   ;;  %v1564_v2 = vmov (!%p139_p2), 0   ;;  %s1269_s5 = sshll.u32 (!%p139_p2), %s1264_s13, 5 }
   0x6   : > { %142 = sbr.rel (%p139_p2) target bundleno = 385 (0x181), region = 32  ;;  %527 = vmatprep.mubr.bf16.mxu0 (!%p139_p2), %v1564_v2  ;;  %720 = vmatprep.mubr.bf16.mxu1 (!%p139_p2), %v1564_v2  ;;  %v1496_v3 = vld [vmem:[%s1811_s1] ss:$16 sps:$4 sm:$0xff] (!%p139_p2)   ;;  %v1497_v4 = vld [vmem:[%s1811_s1 + $0x8] ss:$16 sps:$4 sm:$0xff] (!%p139_p2)   ;;  %p163_p3 = scmp.lt.s32.totalorder (!%p139_p2), %s1269_s5, 63 }
   0x7   : > { %495 = vmatprep.subr.bf16.mxu0 (!%p139_p2), %v1492_v0  ;;  %688 = vmatprep.subr.bf16.mxu1 (!%p139_p2), %v1494_v1  ;;  %v1498_v5 = vld [vmem:[%s1811_s1 + $0x24] ss:$16 sps:$4 sm:$0xff] (!%p139_p2)   ;;  %v1500_v6 = vld [vmem:[%s1811_s1 + $0x2c] ss:$16 sps:$4 sm:$0xff] (!%p139_p2)   ;;  %v1502_v7 = vld [vmem:[%s1811_s1 + $0x20] ss:$16 sps:$4 sm:$0xff] (!%p139_p2)  }
   0x8   : > { %496 = vmatpush1.bf16.msra.mxu0 (!%p139_p2), %v1496_v3  ;;  %689 = vmatpush1.bf16.msra.mxu1 (!%p139_p2), %v1497_v4  ;;  %v1503_v8 = vld [vmem:[%s1811_s1 + $0x28] ss:$16 sps:$4 sm:$0xff] (!%p139_p2)   ;;  %v1504_v9 = vld [vmem:[%s1811_s1 + $0x44] ss:$16 sps:$4 sm:$0xff] (!%p139_p2)   ;;  %v1506_v10 = vld [vmem:[%s1811_s1 + $0x4c] ss:$16 sps:$4 sm:$0xff] (!%p139_p2)  }
   0x9   : > { %497 = vmatprep.subr.bf16.mxu0 (!%p139_p2), %v1498_v5  ;;  %690 = vmatprep.subr.bf16.mxu1 (!%p139_p2), %v1500_v6  ;;  %v1508_v11 = vld [vmem:[%s1811_s1 + $0x40] ss:$16 sps:$4 sm:$0xff] (!%p139_p2)   ;;  %v1509_v12 = vld [vmem:[%s1811_s1 + $0x48] ss:$16 sps:$4 sm:$0xff] (!%p139_p2)   ;;  %v1510_v13 = vld [vmem:[%s1811_s1 + $0x64] ss:$16 sps:$4 sm:$0xff] (!%p139_p2)  }
   0xa   : > { %v1512_v14 = vld [vmem:[%s1811_s1 + $0x6c] ss:$16 sps:$4 sm:$0xff] (!%p139_p2)   ;;  %v1514_v15 = vld [vmem:[%s1811_s1 + $0x60] ss:$16 sps:$4 sm:$0xff] (!%p139_p2)   ;;  %v1515_v16 = vld [vmem:[%s1811_s1 + $0x68] ss:$16 sps:$4 sm:$0xff] (!%p139_p2)  }
   0xb   : > { %v1516_v17 = vld [vmem:[%s1811_s1 + $0x84] ss:$16 sps:$4 sm:$0xff] (!%p139_p2)   ;;  %v1518_v18 = vld [vmem:[%s1811_s1 + $0x8c] ss:$16 sps:$4 sm:$0xff] (!%p139_p2)   ;;  %v1520_v19 = vld [vmem:[%s1811_s1 + $0x80] ss:$16 sps:$4 sm:$0xff] (!%p139_p2)  }
   0xc   : > { %498 = vmatpush1.bf16.msra.mxu0 (!%p139_p2), %v1502_v7  ;;  %691 = vmatpush1.bf16.msra.mxu1 (!%p139_p2), %v1503_v8  ;;  %v1521_v20 = vld [vmem:[%s1811_s1 + $0x88] ss:$16 sps:$4 sm:$0xff] (!%p139_p2)   ;;  %v1522_v21 = vld [vmem:[%s1811_s1 + $0xa4] ss:$16 sps:$4 sm:$0xff] (!%p139_p2)   ;;  %v1524_v22 = vld [vmem:[%s1811_s1 + $0xac] ss:$16 sps:$4 sm:$0xff] (!%p139_p2)  }
   0xd   : > { %499 = vmatprep.subr.bf16.mxu0 %v1504_v9  ;;  %692 = vmatprep.subr.bf16.mxu1 %v1506_v10  ;;  %s1815_s5 = smov (!%p163_p3, %s1269_s5), 63  ;;  %v1526_v23 = vld [vmem:[%s1811_s1 + $0xa0] ss:$16 sps:$4 sm:$0xff]   ;;  %v1527_v24 = vld [vmem:[%s1811_s1 + $0xa8] ss:$16 sps:$4 sm:$0xff]  }
   0xe   : > { %s1270_s7 = sshll.u32 %s1815_s5, 2  ;;  %v1528_v25 = vld [vmem:[%s1811_s1 + $0xc4] ss:$16 sps:$4 sm:$0xff]   ;;  %v1530_v26 = vld [vmem:[%s1811_s1 + $0xcc] ss:$16 sps:$4 sm:$0xff]  }
   0xf   : > { %s1678_s17 = scalar_lea.vmem %s1810_s0, %s1270_s7  ;;  %v1532_v27 = vld [vmem:[%s1811_s1 + $0xc0] ss:$16 sps:$4 sm:$0xff]   ;;  %v1533_v28 = vld [vmem:[%s1811_s1 + $0xc8] ss:$16 sps:$4 sm:$0xff]   ;;  %v1534_v29 = vld [vmem:[%s1811_s1 + $0xe4] ss:$16 sps:$4 sm:$0xff]   ;;  %s1759_s11 = scalar_lea.vmem %s1813_s3, %s1270_s7 }
  0x10   : > { %500 = vmatpush1.bf16.msra.mxu0 %v1508_v11  ;;  %693 = vmatpush1.bf16.msra.mxu1 %v1509_v12  ;;  %v1536_v30 = vld [vmem:[%s1811_s1 + $0xec] ss:$16 sps:$4 sm:$0xff]   ;;  %v1538_v31 = vld [vmem:[%s1811_s1 + $0xe0] ss:$16 sps:$4 sm:$0xff]   ;;  %v1539_v32 = vld [vmem:[%s1811_s1 + $0xe8] ss:$16 sps:$4 sm:$0xff]  }
  0x11   : > { %501 = vmatprep.subr.bf16.mxu0 %v1510_v13  ;;  %694 = vmatprep.subr.bf16.mxu1 %v1512_v14  ;;  %v1540_v33 = vld [vmem:[%s1678_s17] sm:$0xff]   ;;  %v1541_v34 = vld [vmem:[%s1678_s17 + $0x8] sm:$0xff]   ;;  %v1542_v35 = vld [vmem:[%s1678_s17 + $0x10] sm:$0xff]  }
  0x12   : > { %v1543_v36 = vld [vmem:[%s1678_s17 + $0x18] sm:$0xff]   ;;  %v1544_v37 = vld [vmem:[%s1678_s17 + $0x20] sm:$0xff]   ;;  %v1545_v38 = vld [vmem:[%s1678_s17 + $0x28] sm:$0xff]  }
  0x13   : > { %v1546_v39 = vld [vmem:[%s1678_s17 + $0x30] sm:$0xff]   ;;  %v1547_v40 = vld [vmem:[%s1678_s17 + $0x38] sm:$0xff]   ;;  %v1548_v41 = vld [vmem:[%s1678_s17 + $0x40] sm:$0xff]  }
  0x14   : > { %502 = vmatpush1.bf16.msra.mxu0 %v1514_v15  ;;  %695 = vmatpush1.bf16.msra.mxu1 %v1515_v16  ;;  %v1549_v42 = vld [vmem:[%s1678_s17 + $0x48] sm:$0xff]   ;;  %v1550_v43 = vld [vmem:[%s1678_s17 + $0x50] sm:$0xff]   ;;  %v1551_v44 = vld [vmem:[%s1678_s17 + $0x58] sm:$0xff]  }
  0x15   : > { %503 = vmatprep.subr.bf16.mxu0 %v1516_v17  ;;  %696 = vmatprep.subr.bf16.mxu1 %v1518_v18  ;;  %v1552_v45 = vld [vmem:[%s1678_s17 + $0x60] sm:$0xff]   ;;  %v1553_v46 = vld [vmem:[%s1678_s17 + $0x68] sm:$0xff]   ;;  %v1554_v47 = vld [vmem:[%s1678_s17 + $0x70] sm:$0xff]  }
  0x16   : > { %v1555_v48 = vld [vmem:[%s1678_s17 + $0x78] sm:$0xff]   ;;  %v1750_v57 = vld [vmem:[%s1812_s2] ss:$0 sm:$0xff] }
  0x18   : > { %504 = vmatpush1.bf16.msra.mxu0 %v1520_v19  ;;  %697 = vmatpush1.bf16.msra.mxu1 %v1521_v20 }
  0x19   : > { %505 = vmatprep.subr.bf16.mxu0 %v1522_v21  ;;  %698 = vmatprep.subr.bf16.mxu1 %v1524_v22 }
  0x1c   : > { %506 = vmatpush1.bf16.msra.mxu0 %v1526_v23  ;;  %699 = vmatpush1.bf16.msra.mxu1 %v1527_v24 }
  0x1d   : > { %507 = vmatprep.subr.bf16.mxu0 %v1528_v25  ;;  %700 = vmatprep.subr.bf16.mxu1 %v1530_v26 }
  0x20   : > { %508 = vmatpush1.bf16.msra.mxu0 %v1532_v27  ;;  %701 = vmatpush1.bf16.msra.mxu1 %v1533_v28 }
  0x21   : > { %509 = vmatprep.subr.bf16.mxu0 %v1534_v29  ;;  %702 = vmatprep.subr.bf16.mxu1 %v1536_v30 }
  0x24   : > { %510 = vmatpush1.bf16.msra.mxu0 %v1538_v31  ;;  %703 = vmatpush1.bf16.msra.mxu1 %v1539_v32 }
  0x27   : > { %528 = vmatmul.mubr.bf16.vlgmr.msra.gmra.mrb[0].mxu0 %v1540_v33  ;;  %721 = vmatmul.mubr.bf16.vlgmr.msra.gmra.mrb[0].mxu1 %v1540_v33 }
  0x28   : > { %537 = vmatprep.mubr.bf16.mxu0 %v1564_v2  ;;  %730 = vmatprep.mubr.bf16.mxu1 %v1564_v2 }
  0x2f   : > { %538 = vmatmul.mubr.bf16.gmra.mrb[4].mxu0 %v1541_v34  ;;  %731 = vmatmul.mubr.bf16.gmra.mrb[4].mxu1 %v1541_v34 }
  0x30   : > { %547 = vmatprep.mubr.bf16.mxu0 %v1564_v2  ;;  %740 = vmatprep.mubr.bf16.mxu1 %v1564_v2 }
  0x37   : > { %548 = vmatmul.mubr.bf16.gmra.mrb[8].mxu0 %v1542_v35  ;;  %741 = vmatmul.mubr.bf16.gmra.mrb[8].mxu1 %v1542_v35 }
  0x38   : > { %557 = vmatprep.mubr.bf16.mxu0 %v1564_v2  ;;  %750 = vmatprep.mubr.bf16.mxu1 %v1564_v2 }
  0x3f   : > { %558 = vmatmul.mubr.bf16.gmra.mrb[12].mxu0 %v1543_v36  ;;  %751 = vmatmul.mubr.bf16.gmra.mrb[12].mxu1 %v1543_v36 }
  0x40   : > { %567 = vmatprep.mubr.bf16.mxu0 %v1564_v2  ;;  %760 = vmatprep.mubr.bf16.mxu1 %v1564_v2 }
  0x47   : > { %568 = vmatmul.mubr.bf16.gmra.mrb[16].mxu0 %v1544_v37  ;;  %761 = vmatmul.mubr.bf16.gmra.mrb[16].mxu1 %v1544_v37 }
  0x48   : > { %577 = vmatprep.mubr.bf16.mxu0 %v1564_v2  ;;  %770 = vmatprep.mubr.bf16.mxu1 %v1564_v2 }
  0x4f   : > { %578 = vmatmul.mubr.bf16.gmra.mrb[20].mxu0 %v1545_v38  ;;  %771 = vmatmul.mubr.bf16.gmra.mrb[20].mxu1 %v1545_v38 }
  0x50   : > { %587 = vmatprep.mubr.bf16.mxu0 %v1564_v2  ;;  %780 = vmatprep.mubr.bf16.mxu1 %v1564_v2 }
  0x57   : > { %588 = vmatmul.mubr.bf16.gmra.mrb[24].mxu0 %v1546_v39  ;;  %781 = vmatmul.mubr.bf16.gmra.mrb[24].mxu1 %v1546_v39 }
  0x58   : > { %597 = vmatprep.mubr.bf16.mxu0 %v1564_v2  ;;  %790 = vmatprep.mubr.bf16.mxu1 %v1564_v2 }
  0x5f   : > { %598 = vmatmul.mubr.bf16.gmra.mrb[28].mxu0 %v1547_v40  ;;  %791 = vmatmul.mubr.bf16.gmra.mrb[28].mxu1 %v1547_v40 }
  0x60   : > { %607 = vmatprep.mubr.bf16.mxu0 %v1564_v2  ;;  %800 = vmatprep.mubr.bf16.mxu1 %v1564_v2 }
  0x67   : > { %608 = vmatmul.mubr.bf16.gmra.mrb[32].mxu0 %v1548_v41  ;;  %801 = vmatmul.mubr.bf16.gmra.mrb[32].mxu1 %v1548_v41 }
  0x68   : > { %617 = vmatprep.mubr.bf16.mxu0 %v1564_v2  ;;  %810 = vmatprep.mubr.bf16.mxu1 %v1564_v2 }
  0x6f   : > { %618 = vmatmul.mubr.bf16.gmra.mrb[36].mxu0 %v1549_v42  ;;  %811 = vmatmul.mubr.bf16.gmra.mrb[36].mxu1 %v1549_v42 }
  0x70   : > { %627 = vmatprep.mubr.bf16.mxu0 %v1564_v2  ;;  %820 = vmatprep.mubr.bf16.mxu1 %v1564_v2 }
  0x77   : > { %628 = vmatmul.mubr.bf16.gmra.mrb[40].mxu0 %v1550_v43  ;;  %821 = vmatmul.mubr.bf16.gmra.mrb[40].mxu1 %v1550_v43 }
  0x78   : > { %637 = vmatprep.mubr.bf16.mxu0 %v1564_v2  ;;  %830 = vmatprep.mubr.bf16.mxu1 %v1564_v2 }
  0x7f   : > { %638 = vmatmul.mubr.bf16.gmra.mrb[44].mxu0 %v1551_v44  ;;  %831 = vmatmul.mubr.bf16.gmra.mrb[44].mxu1 %v1551_v44 }
  0x80   : > { %647 = vmatprep.mubr.bf16.mxu0 %v1564_v2  ;;  %840 = vmatprep.mubr.bf16.mxu1 %v1564_v2 }
  0x87   : > { %648 = vmatmul.mubr.bf16.gmra.mrb[48].mxu0 %v1552_v45  ;;  %841 = vmatmul.mubr.bf16.gmra.mrb[48].mxu1 %v1552_v45 }
  0x88   : > { %657 = vmatprep.mubr.bf16.mxu0 %v1564_v2  ;;  %850 = vmatprep.mubr.bf16.mxu1 %v1564_v2 }
  0x8f   : > { %658 = vmatmul.mubr.bf16.gmra.mrb[52].mxu0 %v1553_v46  ;;  %851 = vmatmul.mubr.bf16.gmra.mrb[52].mxu1 %v1553_v46 }
  0x90   : > { %667 = vmatprep.mubr.bf16.mxu0 %v1564_v2  ;;  %860 = vmatprep.mubr.bf16.mxu1 %v1564_v2 }
  0x97   : > { %668 = vmatmul.mubr.bf16.gmra.mrb[56].mxu0 %v1554_v47  ;;  %861 = vmatmul.mubr.bf16.gmra.mrb[56].mxu1 %v1554_v47 }
  0x98   : > { %677 = vmatprep.mubr.bf16.mxu0 %v1564_v2  ;;  %870 = vmatprep.mubr.bf16.mxu1 %v1564_v2 }
  0x9f   : > { %678 = vmatmul.mubr.bf16.gmra.mrb[60].mxu0 %v1555_v48  ;;  %871 = vmatmul.mubr.bf16.gmra.mrb[60].mxu1 %v1555_v48 }
  0xfa   : > { %v529_v49 = vpop.f32.mrb[0].mxu0  ;;  %v722_v50 = vpop.f32.mrb[0].mxu1 }
  0xfb   : > { %v531_v51 = vpop.f32.mrb[1].mxu0  ;;  %v724_v52 = vpop.f32.mrb[1].mxu1 }
  0xfc   : > { %v881_v53 = vmax.f32 %v529_v49, %v531_v51  ;;  %v913_v54 = vmax.f32 %v722_v50, %v724_v52  ;;  %v533_v55 = vpop.f32.mrb[2].mxu0  ;;  %v726_v56 = vpop.f32.mrb[2].mxu1 }
  0xfd   : > { %v535_v58 = vpop.f32.mrb[3].mxu0  ;;  %v728_v59 = vpop.f32.mrb[3].mxu1 }
  0xfe   : > { %v945_v60 = vmax.f32 %v881_v53, %v913_v54  ;;  %v882_v61 = vmax.f32 %v533_v55, %v535_v58  ;;  %v914_v62 = vmax.f32 %v726_v56, %v728_v59 }
 0x100   : > { %v984_v63 = vadd.f32 %v1750_v57, %v945_v60  ;;  %v946_v0 = vmax.f32 %v882_v61, %v914_v62 }
 0x102   : > { %v985_v1 = vadd.f32 %v1750_v57, %v946_v0  ;;  %v539_v2 = vpop.f32.mrb[4].mxu0  ;;  %v732_v3 = vpop.f32.mrb[4].mxu1  ;;  %v1016_v6 = vmax.f32 %v984_v63, 0.0 }
 0x103   : > { %v541_v4 = vpop.f32.mrb[5].mxu0  ;;  %v734_v5 = vpop.f32.mrb[5].mxu1 }
 0x104   : > { %v1017_v7 = vmax.f32 %v985_v1, 0.0  ;;  %v883_v8 = vmax.f32 %v539_v2, %v541_v4  ;;  %v915_v9 = vmax.f32 %v732_v3, %v734_v5  ;;  %v543_v10 = vpop.f32.mrb[6].mxu0  ;;  %v736_v11 = vpop.f32.mrb[6].mxu1 }
 0x105   : > { %v545_v12 = vpop.f32.mrb[7].mxu0  ;;  %v738_v13 = vpop.f32.mrb[7].mxu1 }
 0x106   : > { %v1391_v14 = vpack.c.bf16 %v1017_v7, %v1016_v6  ;;  %v947_v15 = vmax.f32 %v883_v8, %v915_v9  ;;  %v884_v16 = vmax.f32 %v543_v10, %v545_v12  ;;  %v916_v17 = vmax.f32 %v736_v11, %v738_v13 }
 0x108   : > { %1392 = vst [vmem:[%s1759_s11] sm:$0xff] %v1391_v14   ;;  %v986_v18 = vadd.f32 %v1750_v57, %v947_v15  ;;  %v948_v19 = vmax.f32 %v884_v16, %v916_v17 }
 0x10a   : > { %v987_v20 = vadd.f32 %v1750_v57, %v948_v19  ;;  %v549_v21 = vpop.f32.mrb[8].mxu0  ;;  %v742_v22 = vpop.f32.mrb[8].mxu1  ;;  %v1018_v25 = vmax.f32 %v986_v18, 0.0 }
 0x10b   : > { %v551_v23 = vpop.f32.mrb[9].mxu0  ;;  %v744_v24 = vpop.f32.mrb[9].mxu1 }
 0x10c   : > { %v1019_v26 = vmax.f32 %v987_v20, 0.0  ;;  %v885_v27 = vmax.f32 %v549_v21, %v551_v23  ;;  %v917_v28 = vmax.f32 %v742_v22, %v744_v24  ;;  %v553_v29 = vpop.f32.mrb[10].mxu0  ;;  %v746_v30 = vpop.f32.mrb[10].mxu1 }
 0x10d   : > { %v555_v31 = vpop.f32.mrb[11].mxu0  ;;  %v748_v32 = vpop.f32.mrb[11].mxu1 }
 0x10e   : > { %v1396_v33 = vpack.c.bf16 %v1019_v26, %v1018_v25  ;;  %v949_v34 = vmax.f32 %v885_v27, %v917_v28  ;;  %v886_v35 = vmax.f32 %v553_v29, %v555_v31  ;;  %v918_v36 = vmax.f32 %v746_v30, %v748_v32 }
 0x110   : > { %1468 = vst [vmem:[%s1759_s11 + $0x8] sm:$0xff] %v1396_v33   ;;  %v988_v37 = vadd.f32 %v1750_v57, %v949_v34  ;;  %v950_v38 = vmax.f32 %v886_v35, %v918_v36 }
 0x112   : > { %v989_v39 = vadd.f32 %v1750_v57, %v950_v38  ;;  %v559_v40 = vpop.f32.mrb[12].mxu0  ;;  %v752_v41 = vpop.f32.mrb[12].mxu1  ;;  %v1020_v44 = vmax.f32 %v988_v37, 0.0 }
 0x113   : > { %v561_v42 = vpop.f32.mrb[13].mxu0  ;;  %v754_v43 = vpop.f32.mrb[13].mxu1 }
 0x114   : > { %v1021_v45 = vmax.f32 %v989_v39, 0.0  ;;  %v887_v46 = vmax.f32 %v559_v40, %v561_v42  ;;  %v919_v47 = vmax.f32 %v752_v41, %v754_v43  ;;  %v563_v48 = vpop.f32.mrb[14].mxu0  ;;  %v756_v49 = vpop.f32.mrb[14].mxu1 }
 0x115   : > { %v565_v50 = vpop.f32.mrb[15].mxu0  ;;  %v758_v51 = vpop.f32.mrb[15].mxu1 }
 0x116   : > { %v1401_v52 = vpack.c.bf16 %v1021_v45, %v1020_v44  ;;  %v951_v53 = vmax.f32 %v887_v46, %v919_v47  ;;  %v888_v54 = vmax.f32 %v563_v48, %v565_v50  ;;  %v920_v55 = vmax.f32 %v756_v49, %v758_v51 }
 0x118   : > { %1469 = vst [vmem:[%s1759_s11 + $0x10] sm:$0xff] %v1401_v52   ;;  %v990_v56 = vadd.f32 %v1750_v57, %v951_v53  ;;  %v952_v58 = vmax.f32 %v888_v54, %v920_v55 }
 0x11a   : > { %v991_v59 = vadd.f32 %v1750_v57, %v952_v58  ;;  %v569_v60 = vpop.f32.mrb[16].mxu0  ;;  %v762_v61 = vpop.f32.mrb[16].mxu1  ;;  %v1022_v0 = vmax.f32 %v990_v56, 0.0 }
 0x11b   : > { %v571_v62 = vpop.f32.mrb[17].mxu0  ;;  %v764_v63 = vpop.f32.mrb[17].mxu1 }
 0x11c   : > { %v1023_v1 = vmax.f32 %v991_v59, 0.0  ;;  %v889_v2 = vmax.f32 %v569_v60, %v571_v62  ;;  %v921_v3 = vmax.f32 %v762_v61, %v764_v63  ;;  %v573_v4 = vpop.f32.mrb[18].mxu0  ;;  %v766_v5 = vpop.f32.mrb[18].mxu1 }
 0x11d   : > { %v575_v6 = vpop.f32.mrb[19].mxu0  ;;  %v768_v7 = vpop.f32.mrb[19].mxu1 }
 0x11e   : > { %v1406_v8 = vpack.c.bf16 %v1023_v1, %v1022_v0  ;;  %v953_v9 = vmax.f32 %v889_v2, %v921_v3  ;;  %v890_v10 = vmax.f32 %v573_v4, %v575_v6  ;;  %v922_v11 = vmax.f32 %v766_v5, %v768_v7 }
 0x120   : > { %1470 = vst [vmem:[%s1759_s11 + $0x18] sm:$0xff] %v1406_v8   ;;  %v992_v12 = vadd.f32 %v1750_v57, %v953_v9  ;;  %v954_v13 = vmax.f32 %v890_v10, %v922_v11 }
 0x122   : > { %v993_v14 = vadd.f32 %v1750_v57, %v954_v13  ;;  %v579_v15 = vpop.f32.mrb[20].mxu0  ;;  %v772_v16 = vpop.f32.mrb[20].mxu1  ;;  %v1024_v19 = vmax.f32 %v992_v12, 0.0 }
 0x123   : > { %v581_v17 = vpop.f32.mrb[21].mxu0  ;;  %v774_v18 = vpop.f32.mrb[21].mxu1 }
 0x124   : > { %v1025_v20 = vmax.f32 %v993_v14, 0.0  ;;  %v891_v21 = vmax.f32 %v579_v15, %v581_v17  ;;  %v923_v22 = vmax.f32 %v772_v16, %v774_v18  ;;  %v583_v23 = vpop.f32.mrb[22].mxu0  ;;  %v776_v24 = vpop.f32.mrb[22].mxu1 }
 0x125   : > { %v585_v25 = vpop.f32.mrb[23].mxu0  ;;  %v778_v26 = vpop.f32.mrb[23].mxu1 }
 0x126   : > { %v1411_v27 = vpack.c.bf16 %v1025_v20, %v1024_v19  ;;  %v955_v28 = vmax.f32 %v891_v21, %v923_v22  ;;  %v892_v29 = vmax.f32 %v583_v23, %v585_v25  ;;  %v924_v30 = vmax.f32 %v776_v24, %v778_v26 }
 0x128   : > { %1471 = vst [vmem:[%s1759_s11 + $0x20] sm:$0xff] %v1411_v27   ;;  %v994_v31 = vadd.f32 %v1750_v57, %v955_v28  ;;  %v956_v32 = vmax.f32 %v892_v29, %v924_v30 }
 0x12a   : > { %v995_v33 = vadd.f32 %v1750_v57, %v956_v32  ;;  %v589_v34 = vpop.f32.mrb[24].mxu0  ;;  %v782_v35 = vpop.f32.mrb[24].mxu1  ;;  %v1026_v38 = vmax.f32 %v994_v31, 0.0 }
 0x12b   : > { %v591_v36 = vpop.f32.mrb[25].mxu0  ;;  %v784_v37 = vpop.f32.mrb[25].mxu1 }
 0x12c   : > { %v1027_v39 = vmax.f32 %v995_v33, 0.0  ;;  %v893_v40 = vmax.f32 %v589_v34, %v591_v36  ;;  %v925_v41 = vmax.f32 %v782_v35, %v784_v37  ;;  %v593_v42 = vpop.f32.mrb[26].mxu0  ;;  %v786_v43 = vpop.f32.mrb[26].mxu1 }
 0x12d   : > { %v595_v44 = vpop.f32.mrb[27].mxu0  ;;  %v788_v45 = vpop.f32.mrb[27].mxu1 }
 0x12e   : > { %v1416_v46 = vpack.c.bf16 %v1027_v39, %v1026_v38  ;;  %v957_v47 = vmax.f32 %v893_v40, %v925_v41  ;;  %v894_v48 = vmax.f32 %v593_v42, %v595_v44  ;;  %v926_v49 = vmax.f32 %v786_v43, %v788_v45 }
 0x130   : > { %1472 = vst [vmem:[%s1759_s11 + $0x28] sm:$0xff] %v1416_v46   ;;  %v996_v50 = vadd.f32 %v1750_v57, %v957_v47  ;;  %v958_v51 = vmax.f32 %v894_v48, %v926_v49 }
 0x132   : > { %v997_v52 = vadd.f32 %v1750_v57, %v958_v51  ;;  %v599_v53 = vpop.f32.mrb[28].mxu0  ;;  %v792_v54 = vpop.f32.mrb[28].mxu1  ;;  %v1028_v58 = vmax.f32 %v996_v50, 0.0 }
 0x133   : > { %v601_v55 = vpop.f32.mrb[29].mxu0  ;;  %v794_v56 = vpop.f32.mrb[29].mxu1 }
 0x134   : > { %v1029_v59 = vmax.f32 %v997_v52, 0.0  ;;  %v895_v60 = vmax.f32 %v599_v53, %v601_v55  ;;  %v927_v61 = vmax.f32 %v792_v54, %v794_v56  ;;  %v603_v62 = vpop.f32.mrb[30].mxu0  ;;  %v796_v63 = vpop.f32.mrb[30].mxu1 }
 0x135   : > { %v605_v0 = vpop.f32.mrb[31].mxu0  ;;  %v798_v1 = vpop.f32.mrb[31].mxu1 }
 0x136   : > { %v1421_v2 = vpack.c.bf16 %v1029_v59, %v1028_v58  ;;  %v959_v3 = vmax.f32 %v895_v60, %v927_v61  ;;  %v896_v4 = vmax.f32 %v603_v62, %v605_v0  ;;  %v928_v5 = vmax.f32 %v796_v63, %v798_v1 }
 0x138   : > { %1473 = vst [vmem:[%s1759_s11 + $0x30] sm:$0xff] %v1421_v2   ;;  %v998_v6 = vadd.f32 %v1750_v57, %v959_v3  ;;  %v960_v7 = vmax.f32 %v896_v4, %v928_v5 }
 0x13a   : > { %v999_v8 = vadd.f32 %v1750_v57, %v960_v7  ;;  %v609_v9 = vpop.f32.mrb[32].mxu0  ;;  %v802_v10 = vpop.f32.mrb[32].mxu1  ;;  %v1030_v13 = vmax.f32 %v998_v6, 0.0 }
 0x13b   : > { %v611_v11 = vpop.f32.mrb[33].mxu0  ;;  %v804_v12 = vpop.f32.mrb[33].mxu1 }
 0x13c   : > { %v1031_v14 = vmax.f32 %v999_v8, 0.0  ;;  %v897_v15 = vmax.f32 %v609_v9, %v611_v11  ;;  %v929_v16 = vmax.f32 %v802_v10, %v804_v12  ;;  %v613_v17 = vpop.f32.mrb[34].mxu0  ;;  %v806_v18 = vpop.f32.mrb[34].mxu1 }
 0x13d   : > { %v615_v19 = vpop.f32.mrb[35].mxu0  ;;  %v808_v20 = vpop.f32.mrb[35].mxu1 }
 0x13e   : > { %v1426_v21 = vpack.c.bf16 %v1031_v14, %v1030_v13  ;;  %v961_v22 = vmax.f32 %v897_v15, %v929_v16  ;;  %v898_v23 = vmax.f32 %v613_v17, %v615_v19  ;;  %v930_v24 = vmax.f32 %v806_v18, %v808_v20 }
 0x140   : > { %1474 = vst [vmem:[%s1759_s11 + $0x38] sm:$0xff] %v1426_v21   ;;  %v1000_v25 = vadd.f32 %v1750_v57, %v961_v22  ;;  %v962_v26 = vmax.f32 %v898_v23, %v930_v24 }
 0x142   : > { %v1001_v27 = vadd.f32 %v1750_v57, %v962_v26  ;;  %v619_v28 = vpop.f32.mrb[36].mxu0  ;;  %v812_v29 = vpop.f32.mrb[36].mxu1  ;;  %v1032_v32 = vmax.f32 %v1000_v25, 0.0 }
 0x143   : > { %v621_v30 = vpop.f32.mrb[37].mxu0  ;;  %v814_v31 = vpop.f32.mrb[37].mxu1 }
 0x144   : > { %v1033_v33 = vmax.f32 %v1001_v27, 0.0  ;;  %v899_v34 = vmax.f32 %v619_v28, %v621_v30  ;;  %v931_v35 = vmax.f32 %v812_v29, %v814_v31  ;;  %v623_v36 = vpop.f32.mrb[38].mxu0  ;;  %v816_v37 = vpop.f32.mrb[38].mxu1 }
 0x145   : > { %v625_v38 = vpop.f32.mrb[39].mxu0  ;;  %v818_v39 = vpop.f32.mrb[39].mxu1 }
 0x146   : > { %v1431_v40 = vpack.c.bf16 %v1033_v33, %v1032_v32  ;;  %v963_v41 = vmax.f32 %v899_v34, %v931_v35  ;;  %v900_v42 = vmax.f32 %v623_v36, %v625_v38  ;;  %v932_v43 = vmax.f32 %v816_v37, %v818_v39 }
 0x148   : > { %1475 = vst [vmem:[%s1759_s11 + $0x40] sm:$0xff] %v1431_v40   ;;  %v1002_v44 = vadd.f32 %v1750_v57, %v963_v41  ;;  %v964_v45 = vmax.f32 %v900_v42, %v932_v43 }
 0x14a   : > { %v1003_v46 = vadd.f32 %v1750_v57, %v964_v45  ;;  %v629_v47 = vpop.f32.mrb[40].mxu0  ;;  %v822_v48 = vpop.f32.mrb[40].mxu1  ;;  %v1034_v51 = vmax.f32 %v1002_v44, 0.0 }
 0x14b   : > { %v631_v49 = vpop.f32.mrb[41].mxu0  ;;  %v824_v50 = vpop.f32.mrb[41].mxu1 }
 0x14c   : > { %v1035_v52 = vmax.f32 %v1003_v46, 0.0  ;;  %v901_v53 = vmax.f32 %v629_v47, %v631_v49  ;;  %v933_v54 = vmax.f32 %v822_v48, %v824_v50  ;;  %v633_v55 = vpop.f32.mrb[42].mxu0  ;;  %v826_v56 = vpop.f32.mrb[42].mxu1 }
 0x14d   : > { %v635_v58 = vpop.f32.mrb[43].mxu0  ;;  %v828_v59 = vpop.f32.mrb[43].mxu1 }
 0x14e   : > { %v1436_v60 = vpack.c.bf16 %v1035_v52, %v1034_v51  ;;  %v965_v61 = vmax.f32 %v901_v53, %v933_v54  ;;  %v902_v62 = vmax.f32 %v633_v55, %v635_v58  ;;  %v934_v63 = vmax.f32 %v826_v56, %v828_v59 }
 0x150   : > { %1476 = vst [vmem:[%s1759_s11 + $0x48] sm:$0xff] %v1436_v60   ;;  %v1004_v0 = vadd.f32 %v1750_v57, %v965_v61  ;;  %v966_v1 = vmax.f32 %v902_v62, %v934_v63 }
 0x152   : > { %v1005_v2 = vadd.f32 %v1750_v57, %v966_v1  ;;  %v639_v3 = vpop.f32.mrb[44].mxu0  ;;  %v832_v4 = vpop.f32.mrb[44].mxu1  ;;  %v1036_v7 = vmax.f32 %v1004_v0, 0.0 }
 0x153   : > { %v641_v5 = vpop.f32.mrb[45].mxu0  ;;  %v834_v6 = vpop.f32.mrb[45].mxu1 }
 0x154   : > { %v1037_v8 = vmax.f32 %v1005_v2, 0.0  ;;  %v903_v9 = vmax.f32 %v639_v3, %v641_v5  ;;  %v935_v10 = vmax.f32 %v832_v4, %v834_v6  ;;  %v643_v11 = vpop.f32.mrb[46].mxu0  ;;  %v836_v12 = vpop.f32.mrb[46].mxu1 }
 0x155   : > { %v645_v13 = vpop.f32.mrb[47].mxu0  ;;  %v838_v14 = vpop.f32.mrb[47].mxu1 }
 0x156   : > { %v1441_v15 = vpack.c.bf16 %v1037_v8, %v1036_v7  ;;  %v967_v16 = vmax.f32 %v903_v9, %v935_v10  ;;  %v904_v17 = vmax.f32 %v643_v11, %v645_v13  ;;  %v936_v18 = vmax.f32 %v836_v12, %v838_v14 }
 0x158   : > { %1477 = vst [vmem:[%s1759_s11 + $0x50] sm:$0xff] %v1441_v15   ;;  %v1006_v19 = vadd.f32 %v1750_v57, %v967_v16  ;;  %v968_v20 = vmax.f32 %v904_v17, %v936_v18 }
 0x15a   : > { %v1007_v21 = vadd.f32 %v1750_v57, %v968_v20  ;;  %v649_v22 = vpop.f32.mrb[48].mxu0  ;;  %v842_v23 = vpop.f32.mrb[48].mxu1  ;;  %v1038_v26 = vmax.f32 %v1006_v19, 0.0 }
 0x15b   : > { %v651_v24 = vpop.f32.mrb[49].mxu0  ;;  %v844_v25 = vpop.f32.mrb[49].mxu1 }
 0x15c   : > { %v1039_v27 = vmax.f32 %v1007_v21, 0.0  ;;  %v905_v28 = vmax.f32 %v649_v22, %v651_v24  ;;  %v937_v29 = vmax.f32 %v842_v23, %v844_v25  ;;  %v653_v30 = vpop.f32.mrb[50].mxu0  ;;  %v846_v31 = vpop.f32.mrb[50].mxu1 }
 0x15d   : > { %v655_v32 = vpop.f32.mrb[51].mxu0  ;;  %v848_v33 = vpop.f32.mrb[51].mxu1 }
 0x15e   : > { %v1446_v34 = vpack.c.bf16 %v1039_v27, %v1038_v26  ;;  %v969_v35 = vmax.f32 %v905_v28, %v937_v29  ;;  %v906_v36 = vmax.f32 %v653_v30, %v655_v32  ;;  %v938_v37 = vmax.f32 %v846_v31, %v848_v33 }
 0x160   : > { %1478 = vst [vmem:[%s1759_s11 + $0x58] sm:$0xff] %v1446_v34   ;;  %v1008_v38 = vadd.f32 %v1750_v57, %v969_v35  ;;  %v970_v39 = vmax.f32 %v906_v36, %v938_v37 }
 0x162   : > { %v1009_v40 = vadd.f32 %v1750_v57, %v970_v39  ;;  %v659_v41 = vpop.f32.mrb[52].mxu0  ;;  %v852_v42 = vpop.f32.mrb[52].mxu1  ;;  %v1040_v45 = vmax.f32 %v1008_v38, 0.0 }
 0x163   : > { %v661_v43 = vpop.f32.mrb[53].mxu0  ;;  %v854_v44 = vpop.f32.mrb[53].mxu1 }
 0x164   : > { %v1041_v46 = vmax.f32 %v1009_v40, 0.0  ;;  %v907_v47 = vmax.f32 %v659_v41, %v661_v43  ;;  %v939_v48 = vmax.f32 %v852_v42, %v854_v44  ;;  %v663_v49 = vpop.f32.mrb[54].mxu0  ;;  %v856_v50 = vpop.f32.mrb[54].mxu1 }
 0x165   : > { %v665_v51 = vpop.f32.mrb[55].mxu0  ;;  %v858_v52 = vpop.f32.mrb[55].mxu1 }
 0x166   : > { %v1451_v53 = vpack.c.bf16 %v1041_v46, %v1040_v45  ;;  %v971_v54 = vmax.f32 %v907_v47, %v939_v48  ;;  %v908_v55 = vmax.f32 %v663_v49, %v665_v51  ;;  %v940_v56 = vmax.f32 %v856_v50, %v858_v52 }
 0x168   : > { %1479 = vst [vmem:[%s1759_s11 + $0x60] sm:$0xff] %v1451_v53   ;;  %v1010_v58 = vadd.f32 %v1750_v57, %v971_v54  ;;  %v972_v59 = vmax.f32 %v908_v55, %v940_v56 }
 0x16a   : > { %v1011_v60 = vadd.f32 %v1750_v57, %v972_v59  ;;  %v669_v61 = vpop.f32.mrb[56].mxu0  ;;  %v862_v62 = vpop.f32.mrb[56].mxu1  ;;  %v1042_v1 = vmax.f32 %v1010_v58, 0.0 }
 0x16b   : > { %v671_v63 = vpop.f32.mrb[57].mxu0  ;;  %v864_v0 = vpop.f32.mrb[57].mxu1 }
 0x16c   : > { %v1043_v2 = vmax.f32 %v1011_v60, 0.0  ;;  %v909_v3 = vmax.f32 %v669_v61, %v671_v63  ;;  %v941_v4 = vmax.f32 %v862_v62, %v864_v0  ;;  %v673_v5 = vpop.f32.mrb[58].mxu0  ;;  %v866_v6 = vpop.f32.mrb[58].mxu1 }
 0x16d   : > { %v675_v7 = vpop.f32.mrb[59].mxu0  ;;  %v868_v8 = vpop.f32.mrb[59].mxu1 }
 0x16e   : > { %v1456_v9 = vpack.c.bf16 %v1043_v2, %v1042_v1  ;;  %v973_v10 = vmax.f32 %v909_v3, %v941_v4  ;;  %v910_v11 = vmax.f32 %v673_v5, %v675_v7  ;;  %v942_v12 = vmax.f32 %v866_v6, %v868_v8 }
 0x170   : > { %1480 = vst [vmem:[%s1759_s11 + $0x68] sm:$0xff] %v1456_v9   ;;  %v1012_v13 = vadd.f32 %v1750_v57, %v973_v10  ;;  %v974_v14 = vmax.f32 %v910_v11, %v942_v12 }
 0x172   : > { %v1013_v15 = vadd.f32 %v1750_v57, %v974_v14  ;;  %v679_v16 = vpop.f32.mrb[60].mxu0  ;;  %v872_v17 = vpop.f32.mrb[60].mxu1  ;;  %v1044_v20 = vmax.f32 %v1012_v13, 0.0 }
 0x173   : > { %v681_v18 = vpop.f32.mrb[61].mxu0  ;;  %v874_v19 = vpop.f32.mrb[61].mxu1 }
 0x174   : > { %v1045_v21 = vmax.f32 %v1013_v15, 0.0  ;;  %v911_v22 = vmax.f32 %v679_v16, %v681_v18  ;;  %v943_v23 = vmax.f32 %v872_v17, %v874_v19  ;;  %v683_v24 = vpop.f32.mrb[62].mxu0  ;;  %v876_v25 = vpop.f32.mrb[62].mxu1 }
 0x175   : > { %v685_v26 = vpop.f32.mrb[63].mxu0  ;;  %v878_v27 = vpop.f32.mrb[63].mxu1 }
 0x176   : > { %v1461_v28 = vpack.c.bf16 %v1045_v21, %v1044_v20  ;;  %v975_v29 = vmax.f32 %v911_v22, %v943_v23  ;;  %v912_v30 = vmax.f32 %v683_v24, %v685_v26  ;;  %v944_v31 = vmax.f32 %v876_v25, %v878_v27 }
 0x178   : > { %1481 = vst [vmem:[%s1759_s11 + $0x70] sm:$0xff] %v1461_v28   ;;  %v1014_v32 = vadd.f32 %v1750_v57, %v975_v29  ;;  %v976_v33 = vmax.f32 %v912_v30, %v944_v31 }
 0x17a   : > { %v1015_v34 = vadd.f32 %v1750_v57, %v976_v33  ;;  %v1046_v35 = vmax.f32 %v1014_v32, 0.0 }
 0x17c   : > { %v1047_v36 = vmax.f32 %v1015_v34, 0.0 }
 0x17e   : > { %v1466_v37 = vpack.c.bf16 %v1047_v36, %v1046_v35 }
 0x180   : > { %1482 = vst [vmem:[%s1759_s11 + $0x78] sm:$0xff] %v1466_v37  }
 0x181 PF: > { %s13_s12 = sadd.s32 1, %s1562_s12  }
 0x182   : > { %p10_p4 = scmp.ge.s32.totalorder %s13_s12, 4  }
 0x184   :  { %12 = sbr.rel (!%p10_p4) target bundleno = 1 (0x1), region = 62 }

// kernel: combined_lenet_forward.4
= control target key start
LH: loop header
LB: loop body
LE: loop exit
PB: predicated region body
PF: predicated region fallthrough
CT: control target
= control target key end

     0   :  { %s2849_s12 = smov 0   ;;  %s3563_s0 = inlined_call_operand.vmem [shape: bf16[64,896], index: 0, kind: input, shape index: {}]   ;;  %s3564_s1 = inlined_call_operand.vmem [shape: bf16[896,512], index: 1, kind: input, shape index: {}]   ;;  %s3565_s2 = inlined_call_operand.vmem [shape: f32[1,128], index: 2, kind: input, shape index: {}]   ;;  %s3566_s3 = inlined_call_operand.vmem [shape: bf16[64,128], index: 3, kind: output, shape index: {}]  }
   0x1 LB: > { %s2137_s13 = sadd.s32 4294967295, %s2826_s12   ;;  %p2141_p0 = scmp.ge.s32.totalorder %s2826_s12, 1  ;;  %s2826_s12 = sphi %s2849_s12, %s13_s12  }
   0x2   : > { %p139_p1 = scmp.lt.s32.totalorder %s2826_s12, 3 }
   0x4   : > { %p140_p2 = pnand %p2141_p0, %p139_p1 }
   0x5   : > { %v2464_v0 = vld [vmem:[%s3564_s1 + $0x4] ss:$16 sps:$4 sm:$0xff] (!%p140_p2)   ;;  %v2466_v1 = vld [vmem:[%s3564_s1 + $0xc] ss:$16 sps:$4 sm:$0xff] (!%p140_p2)   ;;  %v2468_v2 = vld [vmem:[%s3564_s1] ss:$16 sps:$4 sm:$0xff] (!%p140_p2)  }
   0x6   : > { %143 = sbr.rel (%p140_p2) target bundleno = 464 (0x1d0), region = 32  ;;  %1610 = vmatprep.subr.bf16.mxu0 (!%p140_p2), %v2464_v0  ;;  %v2469_v3 = vld [vmem:[%s3564_s1 + $0x8] ss:$16 sps:$4 sm:$0xff] (!%p140_p2)   ;;  %1822 = vmatprep.subr.bf16.mxu1 (!%p140_p2), %v2466_v1  ;;  %v2470_v4 = vld [vmem:[%s3564_s1 + $0x24] ss:$16 sps:$4 sm:$0xff] (!%p140_p2)   ;;  %s2142_s24 = sshll.u32 (!%p140_p2), %s2137_s13, 2 }
   0x7   : > { %1611 = vmatpush1.bf16.msra.mxu0 (!%p140_p2), %v2468_v2  ;;  %1823 = vmatpush1.bf16.msra.mxu1 (!%p140_p2), %v2469_v3  ;;  %v2472_v5 = vld [vmem:[%s3564_s1 + $0x2c] ss:$16 sps:$4 sm:$0xff] (!%p140_p2)   ;;  %v2474_v6 = vld [vmem:[%s3564_s1 + $0x20] ss:$16 sps:$4 sm:$0xff] (!%p140_p2)   ;;  %v2475_v7 = vld [vmem:[%s3564_s1 + $0x28] ss:$16 sps:$4 sm:$0xff] (!%p140_p2)  }
   0x8   : > { %1612 = vmatprep.subr.bf16.mxu0 (!%p140_p2), %v2470_v4  ;;  %1824 = vmatprep.subr.bf16.mxu1 (!%p140_p2), %v2472_v5  ;;  %v2476_v8 = vld [vmem:[%s3564_s1 + $0x44] ss:$16 sps:$4 sm:$0xff] (!%p140_p2)   ;;  %v2478_v9 = vld [vmem:[%s3564_s1 + $0x4c] ss:$16 sps:$4 sm:$0xff] (!%p140_p2)   ;;  %v2480_v10 = vld [vmem:[%s3564_s1 + $0x40] ss:$16 sps:$4 sm:$0xff] (!%p140_p2)  }
   0x9   : > { %v2481_v11 = vld [vmem:[%s3564_s1 + $0x48] ss:$16 sps:$4 sm:$0xff] (!%p140_p2)   ;;  %v2482_v12 = vld [vmem:[%s3564_s1 + $0x64] ss:$16 sps:$4 sm:$0xff] (!%p140_p2)   ;;  %v2484_v13 = vld [vmem:[%s3564_s1 + $0x6c] ss:$16 sps:$4 sm:$0xff] (!%p140_p2)  }
   0xa   : > { %v2486_v14 = vld [vmem:[%s3564_s1 + $0x60] ss:$16 sps:$4 sm:$0xff] (!%p140_p2)   ;;  %v2487_v15 = vld [vmem:[%s3564_s1 + $0x68] ss:$16 sps:$4 sm:$0xff] (!%p140_p2)   ;;  %v2488_v16 = vld [vmem:[%s3564_s1 + $0x84] ss:$16 sps:$4 sm:$0xff] (!%p140_p2)  }
   0xb   : > { %1613 = vmatpush1.bf16.msra.mxu0 (!%p140_p2), %v2474_v6  ;;  %1825 = vmatpush1.bf16.msra.mxu1 (!%p140_p2), %v2475_v7  ;;  %v2490_v17 = vld [vmem:[%s3564_s1 + $0x8c] ss:$16 sps:$4 sm:$0xff] (!%p140_p2)   ;;  %v2492_v18 = vld [vmem:[%s3564_s1 + $0x80] ss:$16 sps:$4 sm:$0xff] (!%p140_p2)   ;;  %v2493_v19 = vld [vmem:[%s3564_s1 + $0x88] ss:$16 sps:$4 sm:$0xff] (!%p140_p2)  }
   0xc   : > { %1614 = vmatprep.subr.bf16.mxu0 (!%p140_p2), %v2476_v8  ;;  %1826 = vmatprep.subr.bf16.mxu1 (!%p140_p2), %v2478_v9  ;;  %v2494_v20 = vld [vmem:[%s3564_s1 + $0xa4] ss:$16 sps:$4 sm:$0xff] (!%p140_p2)   ;;  %v2496_v21 = vld [vmem:[%s3564_s1 + $0xac] ss:$16 sps:$4 sm:$0xff] (!%p140_p2)   ;;  %v2498_v22 = vld [vmem:[%s3564_s1 + $0xa0] ss:$16 sps:$4 sm:$0xff] (!%p140_p2)  }
   0xd   : > { %v2499_v23 = vld [vmem:[%s3564_s1 + $0xa8] ss:$16 sps:$4 sm:$0xff]   ;;  %v2500_v24 = vld [vmem:[%s3564_s1 + $0xc4] ss:$16 sps:$4 sm:$0xff]   ;;  %v2502_v25 = vld [vmem:[%s3564_s1 + $0xcc] ss:$16 sps:$4 sm:$0xff]  }
   0xe   : > { %v2504_v26 = vld [vmem:[%s3564_s1 + $0xc0] ss:$16 sps:$4 sm:$0xff]   ;;  %v2505_v27 = vld [vmem:[%s3564_s1 + $0xc8] ss:$16 sps:$4 sm:$0xff]   ;;  %v2506_v28 = vld [vmem:[%s3564_s1 + $0xe4] ss:$16 sps:$4 sm:$0xff]  }
   0xf   : > { %1615 = vmatpush1.bf16.msra.mxu0 %v2480_v10  ;;  %1827 = vmatpush1.bf16.msra.mxu1 %v2481_v11  ;;  %v2508_v29 = vld [vmem:[%s3564_s1 + $0xec] ss:$16 sps:$4 sm:$0xff]   ;;  %v2510_v30 = vld [vmem:[%s3564_s1 + $0xe0] ss:$16 sps:$4 sm:$0xff]   ;;  %v2511_v31 = vld [vmem:[%s3564_s1 + $0xe8] ss:$16 sps:$4 sm:$0xff]  }
  0x10   : > { %1616 = vmatprep.subr.bf16.mxu0 %v2482_v12  ;;  %1828 = vmatprep.subr.bf16.mxu1 %v2484_v13  ;;  %v2512_v32 = vld [vmem:[%s3564_s1 + $0x104] ss:$16 sps:$4 sm:$0xff]   ;;  %p165_p3 = scmp.lt.s32.totalorder %s2142_s24, 7  ;;  %v2514_v33 = vld [vmem:[%s3564_s1 + $0x10c] ss:$16 sps:$4 sm:$0xff]  }
  0x11   : > { %v2516_v34 = vld [vmem:[%s3564_s1 + $0x100] ss:$16 sps:$4 sm:$0xff]   ;;  %v2517_v35 = vld [vmem:[%s3564_s1 + $0x108] ss:$16 sps:$4 sm:$0xff]   ;;  %v2518_v36 = vld [vmem:[%s3564_s1 + $0x124] ss:$16 sps:$4 sm:$0xff]  }
  0x12   : > { %s3568_s24 = smov (!%p165_p3, %s2142_s24), 7  ;;  %v2520_v37 = vld [vmem:[%s3564_s1 + $0x12c] ss:$16 sps:$4 sm:$0xff]   ;;  %v2522_v38 = vld [vmem:[%s3564_s1 + $0x120] ss:$16 sps:$4 sm:$0xff]  }
  0x13   : > { %1617 = vmatpush1.bf16.msra.mxu0 %v2486_v14  ;;  %1829 = vmatpush1.bf16.msra.mxu1 %v2487_v15  ;;  %v2523_v39 = vld [vmem:[%s3564_s1 + $0x128] ss:$16 sps:$4 sm:$0xff]   ;;  %v2524_v40 = vld [vmem:[%s3564_s1 + $0x144] ss:$16 sps:$4 sm:$0xff]   ;;  %s2454_s21 = smul.u32 28, %s3568_s24 }
  0x14   : > { %1618 = vmatprep.subr.bf16.mxu0 %v2488_v16  ;;  %1830 = vmatprep.subr.bf16.mxu1 %v2490_v17  ;;  %v2526_v41 = vld [vmem:[%s3564_s1 + $0x14c] ss:$16 sps:$4 sm:$0xff]   ;;  %v2528_v42 = vld [vmem:[%s3564_s1 + $0x140] ss:$16 sps:$4 sm:$0xff]   ;;  %v2529_v43 = vld [vmem:[%s3564_s1 + $0x148] ss:$16 sps:$4 sm:$0xff]  }
  0x15   : > { %v2530_v44 = vld [vmem:[%s3564_s1 + $0x164] ss:$16 sps:$4 sm:$0xff]   ;;  %s3000_s13 = scalar_lea.vmem %s3563_s0, %s2454_s21  ;;  %v2532_v45 = vld [vmem:[%s3564_s1 + $0x16c] ss:$16 sps:$4 sm:$0xff]   ;;  %v2534_v46 = vld [vmem:[%s3564_s1 + $0x160] ss:$16 sps:$4 sm:$0xff]  }
  0x16   : > { %v2535_v47 = vld [vmem:[%s3564_s1 + $0x168] ss:$16 sps:$4 sm:$0xff]   ;;  %v2562_v48 = vld [vmem:[%s3000_s13 + $0x4] ss:$28 sps:$4 sm:$0xff]   ;;  %v2538_v50 = vld [vmem:[%s3564_s1 + $0x18c] ss:$16 sps:$4 sm:$0xff]  }
  0x17   : > { %1619 = vmatpush1.bf16.msra.mxu0 %v2492_v18  ;;  %1831 = vmatpush1.bf16.msra.mxu1 %v2493_v19  ;;  %v2536_v49 = vld [vmem:[%s3564_s1 + $0x184] ss:$16 sps:$4 sm:$0xff]   ;;  %v2540_v51 = vld [vmem:[%s3564_s1 + $0x180] ss:$16 sps:$4 sm:$0xff]   ;;  %v2541_v52 = vld [vmem:[%s3564_s1 + $0x188] ss:$16 sps:$4 sm:$0xff]  }
  0x18   : > { %1620 = vmatprep.subr.bf16.mxu0 %v2494_v20  ;;  %1832 = vmatprep.subr.bf16.mxu1 %v2496_v21  ;;  %v2542_v53 = vld [vmem:[%s3564_s1 + $0x1a4] ss:$16 sps:$4 sm:$0xff]   ;;  %v2544_v54 = vld [vmem:[%s3564_s1 + $0x1ac] ss:$16 sps:$4 sm:$0xff]   ;;  %v2546_v55 = vld [vmem:[%s3564_s1 + $0x1a0] ss:$16 sps:$4 sm:$0xff]  }
  0x19   : > { %1642 = vmatprep.mubr.bf16.mxu0 %v2562_v48  ;;  %1854 = vmatprep.mubr.bf16.mxu1 %v2562_v48  ;;  %v2547_v56 = vld [vmem:[%s3564_s1 + $0x1a8] ss:$16 sps:$4 sm:$0xff]   ;;  %v2548_v57 = vld [vmem:[%s3564_s1 + $0x1c4] ss:$16 sps:$4 sm:$0xff]   ;;  %v2550_v58 = vld [vmem:[%s3564_s1 + $0x1cc] ss:$16 sps:$4 sm:$0xff]  }
  0x1a   : > { %v2552_v59 = vld [vmem:[%s3564_s1 + $0x1c0] ss:$16 sps:$4 sm:$0xff]   ;;  %v2553_v60 = vld [vmem:[%s3564_s1 + $0x1c8] ss:$16 sps:$4 sm:$0xff]   ;;  %v2554_v61 = vld [vmem:[%s3564_s1 + $0x1e4] ss:$16 sps:$4 sm:$0xff]  }
  0x1b   : > { %1621 = vmatpush1.bf16.msra.mxu0 %v2498_v22  ;;  %1833 = vmatpush1.bf16.msra.mxu1 %v2499_v23  ;;  %v2556_v62 = vld [vmem:[%s3564_s1 + $0x1ec] ss:$16 sps:$4 sm:$0xff]   ;;  %v2558_v63 = vld [vmem:[%s3564_s1 + $0x1e0] ss:$16 sps:$4 sm:$0xff]   ;;  %v2559_v0 = vld [vmem:[%s3564_s1 + $0x1e8] ss:$16 sps:$4 sm:$0xff]  }
  0x1c   : > { %1622 = vmatprep.subr.bf16.mxu0 %v2500_v24  ;;  %1834 = vmatprep.subr.bf16.mxu1 %v2502_v25  ;;  %v2565_v1 = vld [vmem:[%s3564_s1 + $0x204] ss:$16 sps:$4 sm:$0xff]   ;;  %v2568_v2 = vld [vmem:[%s3564_s1 + $0x20c] ss:$16 sps:$4 sm:$0xff]   ;;  %v2563_v4 = vld [vmem:[%s3564_s1 + $0x200] ss:$16 sps:$4 sm:$0xff]  }
  0x1d   : > { %v2560_v3 = vld [vmem:[%s3000_s13] ss:$28 sps:$4 sm:$0xff]   ;;  %v2566_v5 = vld [vmem:[%s3564_s1 + $0x208] ss:$16 sps:$4 sm:$0xff]   ;;  %v2571_v6 = vld [vmem:[%s3564_s1 + $0x224] ss:$16 sps:$4 sm:$0xff]  }
  0x1e   : > { %v2574_v7 = vld [vmem:[%s3564_s1 + $0x22c] ss:$16 sps:$4 sm:$0xff]   ;;  %v2569_v8 = vld [vmem:[%s3564_s1 + $0x220] ss:$16 sps:$4 sm:$0xff]   ;;  %v2572_v9 = vld [vmem:[%s3564_s1 + $0x228] ss:$16 sps:$4 sm:$0xff]  }
  0x1f   : > { %1623 = vmatpush1.bf16.msra.mxu0 %v2504_v26  ;;  %1835 = vmatpush1.bf16.msra.mxu1 %v2505_v27  ;;  %v2577_v10 = vld [vmem:[%s3564_s1 + $0x244] ss:$16 sps:$4 sm:$0xff]   ;;  %v2580_v11 = vld [vmem:[%s3564_s1 + $0x24c] ss:$16 sps:$4 sm:$0xff]   ;;  %v2575_v12 = vld [vmem:[%s3564_s1 + $0x240] ss:$16 sps:$4 sm:$0xff]  }
  0x20   : > { %1624 = vmatprep.subr.bf16.mxu0 %v2506_v28  ;;  %1836 = vmatprep.subr.bf16.mxu1 %v2508_v29  ;;  %v2578_v13 = vld [vmem:[%s3564_s1 + $0x248] ss:$16 sps:$4 sm:$0xff]   ;;  %v2583_v14 = vld [vmem:[%s3564_s1 + $0x264] ss:$16 sps:$4 sm:$0xff]   ;;  %v2586_v15 = vld [vmem:[%s3564_s1 + $0x26c] ss:$16 sps:$4 sm:$0xff]  }
  0x21   : > { %v2581_v16 = vld [vmem:[%s3564_s1 + $0x260] ss:$16 sps:$4 sm:$0xff]   ;;  %v2584_v17 = vld [vmem:[%s3564_s1 + $0x268] ss:$16 sps:$4 sm:$0xff]   ;;  %v2589_v18 = vld [vmem:[%s3564_s1 + $0x284] ss:$16 sps:$4 sm:$0xff]  }
  0x22   : > { %v2592_v19 = vld [vmem:[%s3564_s1 + $0x28c] ss:$16 sps:$4 sm:$0xff]   ;;  %v2587_v20 = vld [vmem:[%s3564_s1 + $0x280] ss:$16 sps:$4 sm:$0xff]   ;;  %v2590_v21 = vld [vmem:[%s3564_s1 + $0x288] ss:$16 sps:$4 sm:$0xff]  }
  0x23   : > { %1625 = vmatpush1.bf16.msra.mxu0 %v2510_v30  ;;  %1837 = vmatpush1.bf16.msra.mxu1 %v2511_v31  ;;  %v2595_v22 = vld [vmem:[%s3564_s1 + $0x2a4] ss:$16 sps:$4 sm:$0xff]   ;;  %v2598_v23 = vld [vmem:[%s3564_s1 + $0x2ac] ss:$16 sps:$4 sm:$0xff]   ;;  %v2593_v25 = vld [vmem:[%s3564_s1 + $0x2a0] ss:$16 sps:$4 sm:$0xff]  }
  0x24   : > { %1626 = vmatprep.subr.bf16.mxu0 %v2512_v32  ;;  %1838 = vmatprep.subr.bf16.mxu1 %v2514_v33  ;;  %v2647_v24 = vld [vmem:[%s3000_s13 + $0x3c] ss:$28 sps:$4 sm:$0xff]   ;;  %v2601_v27 = vld [vmem:[%s3564_s1 + $0x2c4] ss:$16 sps:$4 sm:$0xff]   ;;  %v2599_v30 = vld [vmem:[%s3564_s1 + $0x2c0] ss:$16 sps:$4 sm:$0xff]  }
  0x25   : > { %v2596_v26 = vld [vmem:[%s3564_s1 + $0x2a8] ss:$16 sps:$4 sm:$0xff]   ;;  %v2604_v28 = vld [vmem:[%s3564_s1 + $0x2cc] ss:$16 sps:$4 sm:$0xff]   ;;  %v2607_v32 = vld [vmem:[%s3564_s1 + $0x2e4] ss:$16 sps:$4 sm:$0xff]  }
  0x26   : > { %v2655_v29 = vld [vmem:[%s3000_s13 + $0x38] ss:$28 sps:$4 sm:$0xff]   ;;  %v2610_v33 = vld [vmem:[%s3564_s1 + $0x2ec] ss:$16 sps:$4 sm:$0xff]  }
  0x27   : > { %1627 = vmatpush1.bf16.msra.mxu0 %v2516_v34  ;;  %1839 = vmatpush1.bf16.msra.mxu1 %v2517_v35  ;;  %v2602_v31 = vld [vmem:[%s3564_s1 + $0x2c8] ss:$16 sps:$4 sm:$0xff]   ;;  %v2605_v35 = vld [vmem:[%s3564_s1 + $0x2e0] ss:$16 sps:$4 sm:$0xff]  }
  0x28   : > { %1628 = vmatprep.subr.bf16.mxu0 %v2518_v36  ;;  %1840 = vmatprep.subr.bf16.mxu1 %v2520_v37  ;;  %v2664_v34 = vld [vmem:[%s3000_s13 + $0xc] ss:$28 sps:$4 sm:$0xff]   ;;  %v2613_v37 = vld [vmem:[%s3564_s1 + $0x304] ss:$16 sps:$4 sm:$0xff]  }
  0x29   : > { %v2608_v36 = vld [vmem:[%s3564_s1 + $0x2e8] ss:$16 sps:$4 sm:$0xff]  }
  0x2a   : > { %v2626_v48 = vld [vmem:[%s3564_s1 + $0x348] ss:$16 sps:$4 sm:$0xff]  }
  0x2b   : > { %1629 = vmatpush1.bf16.msra.mxu0 %v2522_v38  ;;  %1841 = vmatpush1.bf16.msra.mxu1 %v2523_v39  ;;  %v2616_v38 = vld [vmem:[%s3564_s1 + $0x30c] ss:$16 sps:$4 sm:$0xff]   ;;  %v2611_v39 = vld [vmem:[%s3564_s1 + $0x300] ss:$16 sps:$4 sm:$0xff]  }
  0x2c   : > { %1630 = vmatprep.subr.bf16.mxu0 %v2524_v40  ;;  %1842 = vmatprep.subr.bf16.mxu1 %v2526_v41  ;;  %v2614_v40 = vld [vmem:[%s3564_s1 + $0x308] ss:$16 sps:$4 sm:$0xff]   ;;  %v2619_v41 = vld [vmem:[%s3564_s1 + $0x324] ss:$16 sps:$4 sm:$0xff]  }
  0x2f   : > { %1631 = vmatpush1.bf16.msra.mxu0 %v2528_v42  ;;  %1843 = vmatpush1.bf16.msra.mxu1 %v2529_v43  ;;  %v2622_v42 = vld [vmem:[%s3564_s1 + $0x32c] ss:$16 sps:$4 sm:$0xff]   ;;  %v2617_v43 = vld [vmem:[%s3564_s1 + $0x320] ss:$16 sps:$4 sm:$0xff]  }
  0x30   : > { %1632 = vmatprep.subr.bf16.mxu0 %v2530_v44  ;;  %1844 = vmatprep.subr.bf16.mxu1 %v2532_v45  ;;  %v2620_v44 = vld [vmem:[%s3564_s1 + $0x328] ss:$16 sps:$4 sm:$0xff]   ;;  %v2625_v45 = vld [vmem:[%s3564_s1 + $0x344] ss:$16 sps:$4 sm:$0xff]  }
  0x33   : > { %1633 = vmatpush1.bf16.msra.mxu0 %v2534_v46  ;;  %1845 = vmatpush1.bf16.msra.mxu1 %v2535_v47  ;;  %v2628_v46 = vld [vmem:[%s3564_s1 + $0x34c] ss:$16 sps:$4 sm:$0xff]   ;;  %v2623_v47 = vld [vmem:[%s3564_s1 + $0x340] ss:$16 sps:$4 sm:$0xff]  }
  0x34   : > { %1634 = vmatprep.subr.bf16.mxu0 %v2536_v49  ;;  %1846 = vmatprep.subr.bf16.mxu1 %v2538_v50  ;;  %v2631_v49 = vld [vmem:[%s3564_s1 + $0x364] ss:$16 sps:$4 sm:$0xff]   ;;  %v2634_v50 = vld [vmem:[%s3564_s1 + $0x36c] ss:$16 sps:$4 sm:$0xff]  }
  0x37   : > { %1635 = vmatpush1.bf16.msra.mxu0 %v2540_v51  ;;  %1847 = vmatpush1.bf16.msra.mxu1 %v2541_v52  ;;  %v2629_v51 = vld [vmem:[%s3564_s1 + $0x360] ss:$16 sps:$4 sm:$0xff]   ;;  %v2632_v52 = vld [vmem:[%s3564_s1 + $0x368] ss:$16 sps:$4 sm:$0xff]  }
  0x38   : > { %1636 = vmatprep.subr.bf16.mxu0 %v2542_v53  ;;  %1848 = vmatprep.subr.bf16.mxu1 %v2544_v54  ;;  %v2637_v53 = vld [vmem:[%s3564_s1 + $0x384] ss:$16 sps:$4 sm:$0xff]   ;;  %v2640_v54 = vld [vmem:[%s3564_s1 + $0x38c] ss:$16 sps:$4 sm:$0xff]  }
  0x3b   : > { %1637 = vmatpush1.bf16.msra.mxu0 %v2546_v55  ;;  %1849 = vmatpush1.bf16.msra.mxu1 %v2547_v56  ;;  %v2635_v55 = vld [vmem:[%s3564_s1 + $0x380] ss:$16 sps:$4 sm:$0xff]   ;;  %v2638_v56 = vld [vmem:[%s3564_s1 + $0x388] ss:$16 sps:$4 sm:$0xff]  }
  0x3c   : > { %1638 = vmatprep.subr.bf16.mxu0 %v2548_v57  ;;  %1850 = vmatprep.subr.bf16.mxu1 %v2550_v58  ;;  %v2643_v57 = vld [vmem:[%s3564_s1 + $0x3a4] ss:$16 sps:$4 sm:$0xff]   ;;  %v2646_v58 = vld [vmem:[%s3564_s1 + $0x3ac] ss:$16 sps:$4 sm:$0xff]  }
  0x3f   : > { %1639 = vmatpush1.bf16.msra.mxu0 %v2552_v59  ;;  %1851 = vmatpush1.bf16.msra.mxu1 %v2553_v60  ;;  %v2641_v59 = vld [vmem:[%s3564_s1 + $0x3a0] ss:$16 sps:$4 sm:$0xff]   ;;  %v2644_v60 = vld [vmem:[%s3564_s1 + $0x3a8] ss:$16 sps:$4 sm:$0xff]  }
  0x40   : > { %1640 = vmatprep.subr.bf16.mxu0 %v2554_v61  ;;  %1852 = vmatprep.subr.bf16.mxu1 %v2556_v62  ;;  %v2651_v61 = vld [vmem:[%s3564_s1 + $0x3c4] ss:$16 sps:$4 sm:$0xff]   ;;  %v2654_v62 = vld [vmem:[%s3564_s1 + $0x3cc] ss:$16 sps:$4 sm:$0xff]  }
  0x43   : > { %1641 = vmatpush1.bf16.msra.mxu0 %v2558_v63  ;;  %1853 = vmatpush1.bf16.msra.mxu1 %v2559_v0  ;;  %v2649_v63 = vld [vmem:[%s3564_s1 + $0x3c0] ss:$16 sps:$4 sm:$0xff]   ;;  %v2652_v0 = vld [vmem:[%s3564_s1 + $0x3c8] ss:$16 sps:$4 sm:$0xff]  }
  0x44   : > { %1663 = vmatprep.subr.bf16.mxu0 %v2565_v1  ;;  %1875 = vmatprep.subr.bf16.mxu1 %v2568_v2  ;;  %v2658_v1 = vld [vmem:[%s3564_s1 + $0x3e4] ss:$16 sps:$4 sm:$0xff]   ;;  %v2661_v2 = vld [vmem:[%s3564_s1 + $0x3ec] ss:$16 sps:$4 sm:$0xff]  }
  0x46   : > { %1643 = vmatmul.mubr.bf16.vlgmr.msra.gmra.mrb[0].mxu0 %v2560_v3  ;;  %1855 = vmatmul.mubr.bf16.vlgmr.msra.gmra.mrb[0].mxu1 %v2560_v3  ;;  %v2656_v3 = vld [vmem:[%s3564_s1 + $0x3e0] ss:$16 sps:$4 sm:$0xff]  }
  0x47   : > { %1664 = vmatpush1.bf16.msra.mxu0 %v2563_v4  ;;  %1876 = vmatpush1.bf16.msra.mxu1 %v2566_v5  ;;  %v2659_v4 = vld [vmem:[%s3564_s1 + $0x3e8] ss:$16 sps:$4 sm:$0xff]   ;;  %v2667_v5 = vld [vmem:[%s3564_s1 + $0x404] ss:$16 sps:$4 sm:$0xff]  }
  0x48   : > { %1665 = vmatprep.subr.bf16.mxu0 %v2571_v6  ;;  %1877 = vmatprep.subr.bf16.mxu1 %v2574_v7  ;;  %v2670_v6 = vld [vmem:[%s3564_s1 + $0x40c] ss:$16 sps:$4 sm:$0xff]   ;;  %v2662_v7 = vld [vmem:[%s3000_s13 + $0x8] ss:$28 sps:$4 sm:$0xff]  }
  0x49   : > { %1652 = vmatprep.mubr.bf16.mxu0 %v2647_v24  ;;  %1864 = vmatprep.mubr.bf16.mxu1 %v2647_v24  ;;  %v2686_v24 = vld [vmem:[%s3564_s1 + $0x468] ss:$16 sps:$4 sm:$0xff]  }
  0x4b   : > { %1666 = vmatpush1.bf16.msra.mxu0 %v2569_v8  ;;  %1878 = vmatpush1.bf16.msra.mxu1 %v2572_v9  ;;  %v2665_v8 = vld [vmem:[%s3564_s1 + $0x400] ss:$16 sps:$4 sm:$0xff]   ;;  %v2668_v9 = vld [vmem:[%s3564_s1 + $0x408] ss:$16 sps:$4 sm:$0xff]  }
  0x4c   : > { %1667 = vmatprep.subr.bf16.mxu0 %v2577_v10  ;;  %1879 = vmatprep.subr.bf16.mxu1 %v2580_v11  ;;  %v2673_v10 = vld [vmem:[%s3564_s1 + $0x424] ss:$16 sps:$4 sm:$0xff]   ;;  %v2676_v11 = vld [vmem:[%s3564_s1 + $0x42c] ss:$16 sps:$4 sm:$0xff]  }
  0x4e   : > { %1653 = vmatmul.mubr.bf16.gmra.mrb[4].mxu0 %v2655_v29  ;;  %1865 = vmatmul.mubr.bf16.gmra.mrb[4].mxu1 %v2655_v29  ;;  %v2697_v29 = vld [vmem:[%s3564_s1 + $0x4a4] ss:$16 sps:$4 sm:$0xff]  }
  0x4f   : > { %1668 = vmatpush1.bf16.msra.mxu0 %v2575_v12  ;;  %1880 = vmatpush1.bf16.msra.mxu1 %v2578_v13  ;;  %v2749_v12 = vld [vmem:[%s3000_s13 + $0x44] ss:$28 sps:$4 sm:$0xff]  }
  0x50   : > { %1669 = vmatprep.subr.bf16.mxu0 %v2583_v14  ;;  %1881 = vmatprep.subr.bf16.mxu1 %v2586_v15  ;;  %v2671_v13 = vld [vmem:[%s3564_s1 + $0x420] ss:$16 sps:$4 sm:$0xff]   ;;  %v2674_v14 = vld [vmem:[%s3564_s1 + $0x428] ss:$16 sps:$4 sm:$0xff]   ;;  %v2679_v15 = vld [vmem:[%s3564_s1 + $0x444] ss:$16 sps:$4 sm:$0xff]  }
  0x51   : > { %1695 = vmatprep.mubr.bf16.mxu0 %v2664_v34  ;;  %1907 = vmatprep.mubr.bf16.mxu1 %v2664_v34  ;;  %v2706_v34 = vld [vmem:[%s3564_s1 + $0x4cc] ss:$16 sps:$4 sm:$0xff]  }
  0x53   : > { %1670 = vmatpush1.bf16.msra.mxu0 %v2581_v16  ;;  %1882 = vmatpush1.bf16.msra.mxu1 %v2584_v17  ;;  %v2682_v16 = vld [vmem:[%s3564_s1 + $0x44c] ss:$16 sps:$4 sm:$0xff]   ;;  %v2677_v17 = vld [vmem:[%s3564_s1 + $0x440] ss:$16 sps:$4 sm:$0xff]  }
  0x54   : > { %1671 = vmatprep.subr.bf16.mxu0 %v2589_v18  ;;  %1883 = vmatprep.subr.bf16.mxu1 %v2592_v19  ;;  %v2680_v18 = vld [vmem:[%s3564_s1 + $0x448] ss:$16 sps:$4 sm:$0xff]   ;;  %v2757_v19 = vld [vmem:[%s3000_s13 + $0x40] ss:$28 sps:$4 sm:$0xff]  }
  0x57   : > { %1672 = vmatpush1.bf16.msra.mxu0 %v2587_v20  ;;  %1884 = vmatpush1.bf16.msra.mxu1 %v2590_v21  ;;  %v2685_v20 = vld [vmem:[%s3564_s1 + $0x464] ss:$16 sps:$4 sm:$0xff]   ;;  %v2688_v21 = vld [vmem:[%s3564_s1 + $0x46c] ss:$16 sps:$4 sm:$0xff]  }
  0x58   : > { %1673 = vmatprep.subr.bf16.mxu0 %v2595_v22  ;;  %1885 = vmatprep.subr.bf16.mxu1 %v2598_v23  ;;  %v2766_v22 = vld [vmem:[%s3000_s13 + $0x14] ss:$28 sps:$4 sm:$0xff]  }
  0x59   : > { %v2683_v23 = vld [vmem:[%s3564_s1 + $0x460] ss:$16 sps:$4 sm:$0xff]  }
  0x5b   : > { %1674 = vmatpush1.bf16.msra.mxu0 %v2593_v25  ;;  %1886 = vmatpush1.bf16.msra.mxu1 %v2596_v26  ;;  %v2691_v25 = vld [vmem:[%s3564_s1 + $0x484] ss:$16 sps:$4 sm:$0xff]   ;;  %v2694_v26 = vld [vmem:[%s3564_s1 + $0x48c] ss:$16 sps:$4 sm:$0xff]  }
  0x5c   : > { %1675 = vmatprep.subr.bf16.mxu0 %v2601_v27  ;;  %1887 = vmatprep.subr.bf16.mxu1 %v2604_v28  ;;  %v2689_v27 = vld [vmem:[%s3564_s1 + $0x480] ss:$16 sps:$4 sm:$0xff]   ;;  %v2692_v28 = vld [vmem:[%s3564_s1 + $0x488] ss:$16 sps:$4 sm:$0xff]  }
  0x5f   : > { %1676 = vmatpush1.bf16.msra.mxu0 %v2599_v30  ;;  %1888 = vmatpush1.bf16.msra.mxu1 %v2602_v31  ;;  %v2700_v30 = vld [vmem:[%s3564_s1 + $0x4ac] ss:$16 sps:$4 sm:$0xff]   ;;  %v2695_v31 = vld [vmem:[%s3564_s1 + $0x4a0] ss:$16 sps:$4 sm:$0xff]  }
  0x60   : > { %1677 = vmatprep.subr.bf16.mxu0 %v2607_v32  ;;  %1889 = vmatprep.subr.bf16.mxu1 %v2610_v33  ;;  %v2698_v32 = vld [vmem:[%s3564_s1 + $0x4a8] ss:$16 sps:$4 sm:$0xff]   ;;  %v2703_v33 = vld [vmem:[%s3564_s1 + $0x4c4] ss:$16 sps:$4 sm:$0xff]  }
  0x63   : > { %1678 = vmatpush1.bf16.msra.mxu0 %v2605_v35  ;;  %1890 = vmatpush1.bf16.msra.mxu1 %v2608_v36  ;;  %v2701_v35 = vld [vmem:[%s3564_s1 + $0x4c0] ss:$16 sps:$4 sm:$0xff]   ;;  %v2704_v36 = vld [vmem:[%s3564_s1 + $0x4c8] ss:$16 sps:$4 sm:$0xff]  }
  0x64   : > { %1679 = vmatprep.subr.bf16.mxu0 %v2613_v37  ;;  %1891 = vmatprep.subr.bf16.mxu1 %v2616_v38  ;;  %v2709_v37 = vld [vmem:[%s3564_s1 + $0x4e4] ss:$16 sps:$4 sm:$0xff]   ;;  %v2712_v38 = vld [vmem:[%s3564_s1 + $0x4ec] ss:$16 sps:$4 sm:$0xff]  }
  0x67   : > { %1680 = vmatpush1.bf16.msra.mxu0 %v2611_v39  ;;  %1892 = vmatpush1.bf16.msra.mxu1 %v2614_v40  ;;  %v2707_v39 = vld [vmem:[%s3564_s1 + $0x4e0] ss:$16 sps:$4 sm:$0xff]   ;;  %v2710_v40 = vld [vmem:[%s3564_s1 + $0x4e8] ss:$16 sps:$4 sm:$0xff]  }
  0x68   : > { %1681 = vmatprep.subr.bf16.mxu0 %v2619_v41  ;;  %1893 = vmatprep.subr.bf16.mxu1 %v2622_v42  ;;  %v2715_v41 = vld [vmem:[%s3564_s1 + $0x504] ss:$16 sps:$4 sm:$0xff]   ;;  %v2718_v42 = vld [vmem:[%s3564_s1 + $0x50c] ss:$16 sps:$4 sm:$0xff]  }
  0x6b   : > { %1682 = vmatpush1.bf16.msra.mxu0 %v2617_v43  ;;  %1894 = vmatpush1.bf16.msra.mxu1 %v2620_v44  ;;  %v2713_v43 = vld [vmem:[%s3564_s1 + $0x500] ss:$16 sps:$4 sm:$0xff]   ;;  %v2716_v44 = vld [vmem:[%s3564_s1 + $0x508] ss:$16 sps:$4 sm:$0xff]  }
  0x6c   : > { %1683 = vmatprep.subr.bf16.mxu0 %v2625_v45  ;;  %1895 = vmatprep.subr.bf16.mxu1 %v2628_v46  ;;  %v2721_v45 = vld [vmem:[%s3564_s1 + $0x524] ss:$16 sps:$4 sm:$0xff]   ;;  %v2724_v46 = vld [vmem:[%s3564_s1 + $0x52c] ss:$16 sps:$4 sm:$0xff]  }
  0x6f   : > { %1684 = vmatpush1.bf16.msra.mxu0 %v2623_v47  ;;  %1896 = vmatpush1.bf16.msra.mxu1 %v2626_v48  ;;  %v2719_v47 = vld [vmem:[%s3564_s1 + $0x520] ss:$16 sps:$4 sm:$0xff]   ;;  %v2722_v48 = vld [vmem:[%s3564_s1 + $0x528] ss:$16 sps:$4 sm:$0xff]  }
  0x70   : > { %1685 = vmatprep.subr.bf16.mxu0 %v2631_v49  ;;  %1897 = vmatprep.subr.bf16.mxu1 %v2634_v50  ;;  %v2727_v49 = vld [vmem:[%s3564_s1 + $0x544] ss:$16 sps:$4 sm:$0xff]   ;;  %v2730_v50 = vld [vmem:[%s3564_s1 + $0x54c] ss:$16 sps:$4 sm:$0xff]  }
  0x73   : > { %1686 = vmatpush1.bf16.msra.mxu0 %v2629_v51  ;;  %1898 = vmatpush1.bf16.msra.mxu1 %v2632_v52  ;;  %v2725_v51 = vld [vmem:[%s3564_s1 + $0x540] ss:$16 sps:$4 sm:$0xff]   ;;  %v2728_v52 = vld [vmem:[%s3564_s1 + $0x548] ss:$16 sps:$4 sm:$0xff]  }
  0x74   : > { %1687 = vmatprep.subr.bf16.mxu0 %v2637_v53  ;;  %1899 = vmatprep.subr.bf16.mxu1 %v2640_v54  ;;  %v2733_v53 = vld [vmem:[%s3564_s1 + $0x564] ss:$16 sps:$4 sm:$0xff]   ;;  %v2736_v54 = vld [vmem:[%s3564_s1 + $0x56c] ss:$16 sps:$4 sm:$0xff]  }
  0x77   : > { %1688 = vmatpush1.bf16.msra.mxu0 %v2635_v55  ;;  %1900 = vmatpush1.bf16.msra.mxu1 %v2638_v56  ;;  %v2731_v55 = vld [vmem:[%s3564_s1 + $0x560] ss:$16 sps:$4 sm:$0xff]   ;;  %v2734_v56 = vld [vmem:[%s3564_s1 + $0x568] ss:$16 sps:$4 sm:$0xff]  }
  0x78   : > { %1689 = vmatprep.subr.bf16.mxu0 %v2643_v57  ;;  %1901 = vmatprep.subr.bf16.mxu1 %v2646_v58  ;;  %v2739_v57 = vld [vmem:[%s3564_s1 + $0x584] ss:$16 sps:$4 sm:$0xff]   ;;  %v2742_v58 = vld [vmem:[%s3564_s1 + $0x58c] ss:$16 sps:$4 sm:$0xff]  }
  0x7b   : > { %1690 = vmatpush1.bf16.msra.mxu0 %v2641_v59  ;;  %1902 = vmatpush1.bf16.msra.mxu1 %v2644_v60  ;;  %v2737_v59 = vld [vmem:[%s3564_s1 + $0x580] ss:$16 sps:$4 sm:$0xff]   ;;  %v2740_v60 = vld [vmem:[%s3564_s1 + $0x588] ss:$16 sps:$4 sm:$0xff]  }
  0x7c   : > { %1691 = vmatprep.subr.bf16.mxu0 %v2651_v61  ;;  %1903 = vmatprep.subr.bf16.mxu1 %v2654_v62  ;;  %v2745_v61 = vld [vmem:[%s3564_s1 + $0x5a4] ss:$16 sps:$4 sm:$0xff]   ;;  %v2748_v62 = vld [vmem:[%s3564_s1 + $0x5ac] ss:$16 sps:$4 sm:$0xff]  }
  0x7f   : > { %1692 = vmatpush1.bf16.msra.mxu0 %v2649_v63  ;;  %1904 = vmatpush1.bf16.msra.mxu1 %v2652_v0  ;;  %v2743_v63 = vld [vmem:[%s3564_s1 + $0x5a0] ss:$16 sps:$4 sm:$0xff]   ;;  %v2746_v0 = vld [vmem:[%s3564_s1 + $0x5a8] ss:$16 sps:$4 sm:$0xff]  }
  0x80   : > { %1693 = vmatprep.subr.bf16.mxu0 %v2658_v1  ;;  %1905 = vmatprep.subr.bf16.mxu1 %v2661_v2  ;;  %v2753_v1 = vld [vmem:[%s3564_s1 + $0x5c4] ss:$16 sps:$4 sm:$0xff]   ;;  %v2756_v2 = vld [vmem:[%s3564_s1 + $0x5cc] ss:$16 sps:$4 sm:$0xff]  }
  0x83   : > { %1694 = vmatpush1.bf16.msra.mxu0 %v2656_v3  ;;  %1906 = vmatpush1.bf16.msra.mxu1 %v2659_v4  ;;  %v2751_v3 = vld [vmem:[%s3564_s1 + $0x5c0] ss:$16 sps:$4 sm:$0xff]   ;;  %v2754_v4 = vld [vmem:[%s3564_s1 + $0x5c8] ss:$16 sps:$4 sm:$0xff]  }
  0x84   : > { %1716 = vmatprep.subr.bf16.mxu0 %v2667_v5  ;;  %1928 = vmatprep.subr.bf16.mxu1 %v2670_v6  ;;  %v2760_v5 = vld [vmem:[%s3564_s1 + $0x5e4] ss:$16 sps:$4 sm:$0xff]   ;;  %v2763_v6 = vld [vmem:[%s3564_s1 + $0x5ec] ss:$16 sps:$4 sm:$0xff]  }
  0x86   : > { %1696 = vmatmul.mubr.bf16.vlgmr.msra.gmra.mrb[0].mxu0 %v2662_v7  ;;  %1908 = vmatmul.mubr.bf16.vlgmr.msra.gmra.mrb[0].mxu1 %v2662_v7  ;;  %v2758_v7 = vld [vmem:[%s3564_s1 + $0x5e0] ss:$16 sps:$4 sm:$0xff]  }
  0x87   : > { %1717 = vmatpush1.bf16.msra.mxu0 %v2665_v8  ;;  %1929 = vmatpush1.bf16.msra.mxu1 %v2668_v9  ;;  %v2761_v8 = vld [vmem:[%s3564_s1 + $0x5e8] ss:$16 sps:$4 sm:$0xff]   ;;  %v2769_v9 = vld [vmem:[%s3564_s1 + $0x604] ss:$16 sps:$4 sm:$0xff]  }
  0x88   : > { %1718 = vmatprep.subr.bf16.mxu0 %v2673_v10  ;;  %1930 = vmatprep.subr.bf16.mxu1 %v2676_v11  ;;  %v2772_v10 = vld [vmem:[%s3564_s1 + $0x60c] ss:$16 sps:$4 sm:$0xff]  }
  0x89   : > { %1705 = vmatprep.mubr.bf16.mxu0 %v2749_v12  ;;  %1917 = vmatprep.mubr.bf16.mxu1 %v2749_v12  ;;  %v2764_v11 = vld [vmem:[%s3000_s13 + $0x10] ss:$28 sps:$4 sm:$0xff]  }
  0x8a   : > { %v2767_v12 = vld [vmem:[%s3564_s1 + $0x600] ss:$16 sps:$4 sm:$0xff]  }
  0x8b   : > { %1719 = vmatpush1.bf16.msra.mxu0 %v2671_v13  ;;  %1931 = vmatpush1.bf16.msra.mxu1 %v2674_v14  ;;  %v2770_v13 = vld [vmem:[%s3564_s1 + $0x608] ss:$16 sps:$4 sm:$0xff]   ;;  %v2775_v14 = vld [vmem:[%s3564_s1 + $0x624] ss:$16 sps:$4 sm:$0xff]  }
  0x8c   : > { %1720 = vmatprep.subr.bf16.mxu0 %v2679_v15  ;;  %1932 = vmatprep.subr.bf16.mxu1 %v2682_v16  ;;  %v2778_v15 = vld [vmem:[%s3564_s1 + $0x62c] ss:$16 sps:$4 sm:$0xff]  }
  0x8d   : > { %v2803_v16 = vld [vmem:[%s3000_s13 + $0x4c] ss:$28 sps:$4 sm:$0xff]  }
  0x8e   : > { %1706 = vmatmul.mubr.bf16.gmra.mrb[4].mxu0 %v2757_v19  ;;  %1918 = vmatmul.mubr.bf16.gmra.mrb[4].mxu1 %v2757_v19  ;;  %v2781_v19 = vld [vmem:[%s3564_s1 + $0x644] ss:$16 sps:$4 sm:$0xff]  }
  0x8f   : > { %1721 = vmatpush1.bf16.msra.mxu0 %v2677_v17  ;;  %1933 = vmatpush1.bf16.msra.mxu1 %v2680_v18  ;;  %v2773_v17 = vld [vmem:[%s3564_s1 + $0x620] ss:$16 sps:$4 sm:$0xff]   ;;  %v2776_v18 = vld [vmem:[%s3564_s1 + $0x628] ss:$16 sps:$4 sm:$0xff]  }
  0x90   : > { %1722 = vmatprep.subr.bf16.mxu0 %v2685_v20  ;;  %1934 = vmatprep.subr.bf16.mxu1 %v2688_v21  ;;  %v2784_v20 = vld [vmem:[%s3564_s1 + $0x64c] ss:$16 sps:$4 sm:$0xff]   ;;  %v2805_v21 = vld [vmem:[%s3000_s13 + $0x48] ss:$28 sps:$4 sm:$0xff]  }
  0x91   : > { %1748 = vmatprep.mubr.bf16.mxu0 %v2766_v22  ;;  %1960 = vmatprep.mubr.bf16.mxu1 %v2766_v22  ;;  %v2779_v22 = vld [vmem:[%s3564_s1 + $0x640] ss:$16 sps:$4 sm:$0xff]  }
  0x93   : > { %1723 = vmatpush1.bf16.msra.mxu0 %v2683_v23  ;;  %1935 = vmatpush1.bf16.msra.mxu1 %v2686_v24  ;;  %v2782_v23 = vld [vmem:[%s3564_s1 + $0x648] ss:$16 sps:$4 sm:$0xff]   ;;  %v2787_v24 = vld [vmem:[%s3564_s1 + $0x664] ss:$16 sps:$4 sm:$0xff]  }
  0x94   : > { %1724 = vmatprep.subr.bf16.mxu0 %v2691_v25  ;;  %1936 = vmatprep.subr.bf16.mxu1 %v2694_v26  ;;  %v2790_v25 = vld [vmem:[%s3564_s1 + $0x66c] ss:$16 sps:$4 sm:$0xff]   ;;  %v2785_v26 = vld [vmem:[%s3564_s1 + $0x660] ss:$16 sps:$4 sm:$0xff]  }
  0x97   : > { %1725 = vmatpush1.bf16.msra.mxu0 %v2689_v27  ;;  %1937 = vmatpush1.bf16.msra.mxu1 %v2692_v28  ;;  %v2788_v27 = vld [vmem:[%s3564_s1 + $0x668] ss:$16 sps:$4 sm:$0xff]   ;;  %v2793_v28 = vld [vmem:[%s3564_s1 + $0x684] ss:$16 sps:$4 sm:$0xff]  }
  0x98   : > { %1726 = vmatprep.subr.bf16.mxu0 %v2697_v29  ;;  %1938 = vmatprep.subr.bf16.mxu1 %v2700_v30  ;;  %v2796_v29 = vld [vmem:[%s3564_s1 + $0x68c] ss:$16 sps:$4 sm:$0xff]   ;;  %v2828_v30 = vmov 0  }
  0x9b   : > { %1727 = vmatpush1.bf16.msra.mxu0 %v2695_v31  ;;  %1939 = vmatpush1.bf16.msra.mxu1 %v2698_v32  ;;  %v2791_v31 = vld [vmem:[%s3564_s1 + $0x680] ss:$16 sps:$4 sm:$0xff]   ;;  %v2794_v32 = vld [vmem:[%s3564_s1 + $0x688] ss:$16 sps:$4 sm:$0xff]  }
  0x9c   : > { %1728 = vmatprep.subr.bf16.mxu0 %v2703_v33  ;;  %1940 = vmatprep.subr.bf16.mxu1 %v2706_v34  ;;  %v2799_v33 = vld [vmem:[%s3564_s1 + $0x6a4] ss:$16 sps:$4 sm:$0xff]   ;;  %v2802_v34 = vld [vmem:[%s3564_s1 + $0x6ac] ss:$16 sps:$4 sm:$0xff]  }
  0x9f   : > { %1729 = vmatpush1.bf16.msra.mxu0 %v2701_v35  ;;  %1941 = vmatpush1.bf16.msra.mxu1 %v2704_v36  ;;  %v2797_v35 = vld [vmem:[%s3564_s1 + $0x6a0] ss:$16 sps:$4 sm:$0xff]   ;;  %v2800_v36 = vld [vmem:[%s3564_s1 + $0x6a8] ss:$16 sps:$4 sm:$0xff]  }
  0xa0   : > { %1730 = vmatprep.subr.bf16.mxu0 %v2709_v37  ;;  %1942 = vmatprep.subr.bf16.mxu1 %v2712_v38  ;;  %v2808_v37 = vld [vmem:[%s3564_s1 + $0x6c4] ss:$16 sps:$4 sm:$0xff]   ;;  %v2811_v38 = vld [vmem:[%s3564_s1 + $0x6cc] ss:$16 sps:$4 sm:$0xff]  }
  0xa3   : > { %1731 = vmatpush1.bf16.msra.mxu0 %v2707_v39  ;;  %1943 = vmatpush1.bf16.msra.mxu1 %v2710_v40  ;;  %v2806_v39 = vld [vmem:[%s3564_s1 + $0x6c0] ss:$16 sps:$4 sm:$0xff]   ;;  %v2809_v40 = vld [vmem:[%s3564_s1 + $0x6c8] ss:$16 sps:$4 sm:$0xff]  }
  0xa4   : > { %1732 = vmatprep.subr.bf16.mxu0 %v2715_v41  ;;  %1944 = vmatprep.subr.bf16.mxu1 %v2718_v42  ;;  %v2814_v41 = vld [vmem:[%s3564_s1 + $0x6e4] ss:$16 sps:$4 sm:$0xff]   ;;  %v2817_v42 = vld [vmem:[%s3564_s1 + $0x6ec] ss:$16 sps:$4 sm:$0xff]  }
  0xa7   : > { %1733 = vmatpush1.bf16.msra.mxu0 %v2713_v43  ;;  %1945 = vmatpush1.bf16.msra.mxu1 %v2716_v44  ;;  %v2812_v43 = vld [vmem:[%s3564_s1 + $0x6e0] ss:$16 sps:$4 sm:$0xff]   ;;  %v2815_v44 = vld [vmem:[%s3564_s1 + $0x6e8] ss:$16 sps:$4 sm:$0xff]  }
  0xa8   : > { %1734 = vmatprep.subr.bf16.mxu0 %v2721_v45  ;;  %1946 = vmatprep.subr.bf16.mxu1 %v2724_v46  ;;  %v2818_v45 = vld [vmem:[%s3000_s13 + $0x18] ss:$28 sps:$4 sm:$0xff]   ;;  %v2819_v46 = vld [vmem:[%s3000_s13 + $0x50] ss:$28 sps:$4 sm:$0xff]   ;;  %s2145_s13 = sshll.u32 %s3568_s24, 2 }
  0xa9   : > { %s175_s8 = scalar_lea.vmem %s3566_s3, %s2145_s13 }
  0xab   : > { %1735 = vmatpush1.bf16.msra.mxu0 %v2719_v47  ;;  %1947 = vmatpush1.bf16.msra.mxu1 %v2722_v48 }
  0xac   : > { %1736 = vmatprep.subr.bf16.mxu0 %v2727_v49  ;;  %1948 = vmatprep.subr.bf16.mxu1 %v2730_v50 }
  0xaf   : > { %1737 = vmatpush1.bf16.msra.mxu0 %v2725_v51  ;;  %1949 = vmatpush1.bf16.msra.mxu1 %v2728_v52 }
  0xb0   : > { %1738 = vmatprep.subr.bf16.mxu0 %v2733_v53  ;;  %1950 = vmatprep.subr.bf16.mxu1 %v2736_v54 }
  0xb3   : > { %1739 = vmatpush1.bf16.msra.mxu0 %v2731_v55  ;;  %1951 = vmatpush1.bf16.msra.mxu1 %v2734_v56  ;;  %v2384_v55 = vld [vmem:[%s3565_s2] ss:$0 sm:$0xff] }
  0xb4   : > { %1740 = vmatprep.subr.bf16.mxu0 %v2739_v57  ;;  %1952 = vmatprep.subr.bf16.mxu1 %v2742_v58 }
  0xb7   : > { %1741 = vmatpush1.bf16.msra.mxu0 %v2737_v59  ;;  %1953 = vmatpush1.bf16.msra.mxu1 %v2740_v60 }
  0xb8   : > { %1742 = vmatprep.subr.bf16.mxu0 %v2745_v61  ;;  %1954 = vmatprep.subr.bf16.mxu1 %v2748_v62 }
  0xbb   : > { %1743 = vmatpush1.bf16.msra.mxu0 %v2743_v63  ;;  %1955 = vmatpush1.bf16.msra.mxu1 %v2746_v0 }
  0xbc   : > { %1744 = vmatprep.subr.bf16.mxu0 %v2753_v1  ;;  %1956 = vmatprep.subr.bf16.mxu1 %v2756_v2 }
  0xbf   : > { %1745 = vmatpush1.bf16.msra.mxu0 %v2751_v3  ;;  %1957 = vmatpush1.bf16.msra.mxu1 %v2754_v4 }
  0xc0   : > { %1746 = vmatprep.subr.bf16.mxu0 %v2760_v5  ;;  %1958 = vmatprep.subr.bf16.mxu1 %v2763_v6 }
  0xc3   : > { %1747 = vmatpush1.bf16.msra.mxu0 %v2758_v7  ;;  %1959 = vmatpush1.bf16.msra.mxu1 %v2761_v8 }
  0xc4   : > { %1769 = vmatprep.subr.bf16.mxu0 %v2769_v9  ;;  %1981 = vmatprep.subr.bf16.mxu1 %v2772_v10 }
  0xc6   : > { %1749 = vmatmul.mubr.bf16.vlgmr.msra.gmra.mrb[0].mxu0 %v2764_v11  ;;  %1961 = vmatmul.mubr.bf16.vlgmr.msra.gmra.mrb[0].mxu1 %v2764_v11 }
  0xc7   : > { %1770 = vmatpush1.bf16.msra.mxu0 %v2767_v12  ;;  %1982 = vmatpush1.bf16.msra.mxu1 %v2770_v13 }
  0xc8   : > { %1771 = vmatprep.subr.bf16.mxu0 %v2775_v14  ;;  %1983 = vmatprep.subr.bf16.mxu1 %v2778_v15 }
  0xc9   : > { %1758 = vmatprep.mubr.bf16.mxu0 %v2803_v16  ;;  %1970 = vmatprep.mubr.bf16.mxu1 %v2803_v16 }
  0xcb   : > { %1772 = vmatpush1.bf16.msra.mxu0 %v2773_v17  ;;  %1984 = vmatpush1.bf16.msra.mxu1 %v2776_v18 }
  0xcc   : > { %1773 = vmatprep.subr.bf16.mxu0 %v2781_v19  ;;  %1985 = vmatprep.subr.bf16.mxu1 %v2784_v20 }
  0xce   : > { %1759 = vmatmul.mubr.bf16.gmra.mrb[4].mxu0 %v2805_v21  ;;  %1971 = vmatmul.mubr.bf16.gmra.mrb[4].mxu1 %v2805_v21 }
  0xcf   : > { %1774 = vmatpush1.bf16.msra.mxu0 %v2779_v22  ;;  %1986 = vmatpush1.bf16.msra.mxu1 %v2782_v23 }
  0xd0   : > { %1775 = vmatprep.subr.bf16.mxu0 %v2787_v24  ;;  %1987 = vmatprep.subr.bf16.mxu1 %v2790_v25 }
  0xd1   : > { %1801 = vmatprep.mubr.bf16.mxu0 %v2828_v30  ;;  %2013 = vmatprep.mubr.bf16.mxu1 %v2828_v30 }
  0xd3   : > { %1776 = vmatpush1.bf16.msra.mxu0 %v2785_v26  ;;  %1988 = vmatpush1.bf16.msra.mxu1 %v2788_v27 }
  0xd4   : > { %1777 = vmatprep.subr.bf16.mxu0 %v2793_v28  ;;  %1989 = vmatprep.subr.bf16.mxu1 %v2796_v29 }
  0xd7   : > { %1778 = vmatpush1.bf16.msra.mxu0 %v2791_v31  ;;  %1990 = vmatpush1.bf16.msra.mxu1 %v2794_v32 }
  0xd8   : > { %1779 = vmatprep.subr.bf16.mxu0 %v2799_v33  ;;  %1991 = vmatprep.subr.bf16.mxu1 %v2802_v34 }
  0xdb   : > { %1780 = vmatpush1.bf16.msra.mxu0 %v2797_v35  ;;  %1992 = vmatpush1.bf16.msra.mxu1 %v2800_v36 }
  0xdc   : > { %1781 = vmatprep.subr.bf16.mxu0 %v2808_v37  ;;  %1993 = vmatprep.subr.bf16.mxu1 %v2811_v38 }
  0xdf   : > { %1782 = vmatpush1.bf16.msra.mxu0 %v2806_v39  ;;  %1994 = vmatpush1.bf16.msra.mxu1 %v2809_v40 }
  0xe0   : > { %1783 = vmatprep.subr.bf16.mxu0 %v2814_v41  ;;  %1995 = vmatprep.subr.bf16.mxu1 %v2817_v42 }
  0xe3   : > { %1784 = vmatpush1.bf16.msra.mxu0 %v2812_v43  ;;  %1996 = vmatpush1.bf16.msra.mxu1 %v2815_v44 }
  0xe6   : > { %1802 = vmatmul.mubr.bf16.vlgmr.msra.gmra.mrb[0].mxu0 %v2818_v45  ;;  %2014 = vmatmul.mubr.bf16.vlgmr.msra.gmra.mrb[0].mxu1 %v2818_v45 }
  0xe7   : > { %1811 = vmatprep.mubr.bf16.mxu0 %v2828_v30  ;;  %2023 = vmatprep.mubr.bf16.mxu1 %v2828_v30 }
  0xee   : > { %1812 = vmatmul.mubr.bf16.gmra.mrb[4].mxu0 %v2819_v46  ;;  %2024 = vmatmul.mubr.bf16.gmra.mrb[4].mxu1 %v2819_v46 }
 0x1b9   : > { %v1803_v47 = vpop.f32.mrb[0].mxu0  ;;  %v2015_v48 = vpop.f32.mrb[0].mxu1 }
 0x1ba   : > { %v1805_v49 = vpop.f32.mrb[1].mxu0  ;;  %v2017_v50 = vpop.f32.mrb[1].mxu1 }
 0x1bb   : > { %v2034_v51 = vmax.f32 %v1803_v47, %v1805_v49  ;;  %v2038_v52 = vmax.f32 %v2015_v48, %v2017_v50  ;;  %v1807_v53 = vpop.f32.mrb[2].mxu0  ;;  %v2019_v54 = vpop.f32.mrb[2].mxu1 }
 0x1bc   : > { %v1809_v56 = vpop.f32.mrb[3].mxu0  ;;  %v2021_v57 = vpop.f32.mrb[3].mxu1 }
 0x1bd   : > { %v2042_v58 = vmax.f32 %v2034_v51, %v2038_v52  ;;  %v2035_v59 = vmax.f32 %v1807_v53, %v1809_v56  ;;  %v2039_v60 = vmax.f32 %v2019_v54, %v2021_v57 }
 0x1bf   : > { %v2053_v61 = vadd.f32 %v2384_v55, %v2042_v58  ;;  %v2043_v62 = vmax.f32 %v2035_v59, %v2039_v60 }
 0x1c1   : > { %v2054_v63 = vadd.f32 %v2384_v55, %v2043_v62  ;;  %v1813_v0 = vpop.f32.mrb[4].mxu0  ;;  %v2025_v1 = vpop.f32.mrb[4].mxu1  ;;  %v2057_v4 = vmax.f32 %v2053_v61, 0.0 }
 0x1c2   : > { %v1815_v2 = vpop.f32.mrb[5].mxu0  ;;  %v2027_v3 = vpop.f32.mrb[5].mxu1 }
 0x1c3   : > { %v2058_v5 = vmax.f32 %v2054_v63, 0.0  ;;  %v2036_v6 = vmax.f32 %v1813_v0, %v1815_v2  ;;  %v2040_v7 = vmax.f32 %v2025_v1, %v2027_v3  ;;  %v1817_v8 = vpop.f32.mrb[6].mxu0  ;;  %v2029_v9 = vpop.f32.mrb[6].mxu1 }
 0x1c4   : > { %v1819_v10 = vpop.f32.mrb[7].mxu0  ;;  %v2031_v11 = vpop.f32.mrb[7].mxu1 }
 0x1c5   : > { %v2398_v12 = vpack.c.bf16 %v2058_v5, %v2057_v4  ;;  %v2044_v13 = vmax.f32 %v2036_v6, %v2040_v7  ;;  %v2037_v14 = vmax.f32 %v1817_v8, %v1819_v10  ;;  %v2041_v15 = vmax.f32 %v2029_v9, %v2031_v11 }
 0x1c7   : > { %2399 = vst [vmem:[%s175_s8] sm:$0xff] %v2398_v12   ;;  %v2055_v16 = vadd.f32 %v2384_v55, %v2044_v13  ;;  %v2045_v17 = vmax.f32 %v2037_v14, %v2041_v15 }
 0x1c9   : > { %v2056_v18 = vadd.f32 %v2384_v55, %v2045_v17  ;;  %v2059_v19 = vmax.f32 %v2055_v16, 0.0 }
 0x1cb   : > { %v2060_v20 = vmax.f32 %v2056_v18, 0.0 }
 0x1cd   : > { %v2403_v21 = vpack.c.bf16 %v2060_v20, %v2059_v19 }
 0x1cf   : > { %2405 = vst [vmem:[%s175_s8 + $0x8] sm:$0xff] %v2403_v21  }
 0x1d0 PF: > { %s13_s12 = sadd.s32 1, %s2826_s12  }
 0x1d1   : > { %p10_p4 = scmp.ge.s32.totalorder %s13_s12, 4  }
 0x1d3   :  { %12 = sbr.rel (!%p10_p4) target bundleno = 1 (0x1), region = 62 }

// kernel: combined_lenet_forward.5
= control target key start
LH: loop header
LB: loop body
LE: loop exit
PB: predicated region body
PF: predicated region fallthrough
CT: control target
= control target key end

     0   :  { %vm9799_vm0 = vmmov 0   ;;  %s12721_s1 = inlined_call_operand.vmem [shape: bf16[3200,512], index: 1, kind: input, shape index: {}]   ;;  %s12722_s0 = inlined_call_operand.vmem [shape: bf16[16,3200], index: 0, kind: input, shape index: {}]   ;;  %s12723_s3 = inlined_call_operand.vmem [shape: bf16[512,384], index: 3, kind: input, shape index: {}]   ;;  %s12724_s2 = inlined_call_operand.vmem [shape: f32[1,512], index: 2, kind: input, shape index: {}]   ;;  %s12725_s5 = inlined_call_operand.vmem [shape: bf16[384,128], index: 5, kind: input, shape index: {}]   ;;  %s12726_s4 = inlined_call_operand.vmem [shape: f32[1,384], index: 4, kind: input, shape index: {}]   ;;  %s12727_s6 = inlined_call_operand.vmem [shape: f32[1,128], index: 6, kind: input, shape index: {}]   ;;  %s12728_s7 = inlined_call_operand.vmem [shape: f32[16,128], index: 7, kind: output, shape index: {}]  }
   0x1   :  { %v8408_v0 = vld [vmem:[%s12721_s1 + $0x4] ss:$16 sps:$4 sm:$0xff]   ;;  %v8410_v1 = vld [vmem:[%s12721_s1 + $0xc] ss:$16 sps:$4 sm:$0xff]   ;;  %v8412_v2 = vld [vmem:[%s12721_s1] ss:$16 sps:$4 sm:$0xff]  }
   0x2   :  { %5001 = vmatprep.subr.bf16.mxu0 %v8408_v0  ;;  %v8413_v3 = vld [vmem:[%s12721_s1 + $0x8] ss:$16 sps:$4 sm:$0xff]   ;;  %5560 = vmatprep.subr.bf16.mxu1 %v8410_v1  ;;  %v8414_v4 = vld [vmem:[%s12721_s1 + $0x24] ss:$16 sps:$4 sm:$0xff]   ;;  %v8416_v5 = vld [vmem:[%s12721_s1 + $0x2c] ss:$16 sps:$4 sm:$0xff]  }
   0x3   :  { %5002 = vmatpush1.bf16.msra.mxu0 %v8412_v2  ;;  %5561 = vmatpush1.bf16.msra.mxu1 %v8413_v3  ;;  %v8418_v6 = vld [vmem:[%s12721_s1 + $0x20] ss:$16 sps:$4 sm:$0xff]   ;;  %v8419_v7 = vld [vmem:[%s12721_s1 + $0x28] ss:$16 sps:$4 sm:$0xff]   ;;  %v8420_v8 = vld [vmem:[%s12721_s1 + $0x44] ss:$16 sps:$4 sm:$0xff]  }
   0x4   :  { %5003 = vmatprep.subr.bf16.mxu0 %v8414_v4  ;;  %5562 = vmatprep.subr.bf16.mxu1 %v8416_v5  ;;  %v8422_v9 = vld [vmem:[%s12721_s1 + $0x4c] ss:$16 sps:$4 sm:$0xff]   ;;  %v8424_v10 = vld [vmem:[%s12721_s1 + $0x40] ss:$16 sps:$4 sm:$0xff]   ;;  %v8425_v11 = vld [vmem:[%s12721_s1 + $0x48] ss:$16 sps:$4 sm:$0xff]  }
   0x5   :  { %v8426_v12 = vld [vmem:[%s12721_s1 + $0x64] ss:$16 sps:$4 sm:$0xff]   ;;  %v8428_v13 = vld [vmem:[%s12721_s1 + $0x6c] ss:$16 sps:$4 sm:$0xff]   ;;  %v8430_v14 = vld [vmem:[%s12721_s1 + $0x60] ss:$16 sps:$4 sm:$0xff]  }
   0x6   :  { %v8431_v15 = vld [vmem:[%s12721_s1 + $0x68] ss:$16 sps:$4 sm:$0xff]   ;;  %v8432_v16 = vld [vmem:[%s12721_s1 + $0x84] ss:$16 sps:$4 sm:$0xff]   ;;  %v8434_v17 = vld [vmem:[%s12721_s1 + $0x8c] ss:$16 sps:$4 sm:$0xff]  }
   0x7   :  { %5004 = vmatpush1.bf16.msra.mxu0 %v8418_v6  ;;  %5563 = vmatpush1.bf16.msra.mxu1 %v8419_v7  ;;  %v8436_v18 = vld [vmem:[%s12721_s1 + $0x80] ss:$16 sps:$4 sm:$0xff]   ;;  %v8437_v19 = vld [vmem:[%s12721_s1 + $0x88] ss:$16 sps:$4 sm:$0xff]   ;;  %v8438_v20 = vld [vmem:[%s12721_s1 + $0xa4] ss:$16 sps:$4 sm:$0xff]  }
   0x8   :  { %5005 = vmatprep.subr.bf16.mxu0 %v8420_v8  ;;  %5564 = vmatprep.subr.bf16.mxu1 %v8422_v9  ;;  %v8440_v21 = vld [vmem:[%s12721_s1 + $0xac] ss:$16 sps:$4 sm:$0xff]   ;;  %v8442_v22 = vld [vmem:[%s12721_s1 + $0xa0] ss:$16 sps:$4 sm:$0xff]   ;;  %v8443_v23 = vld [vmem:[%s12721_s1 + $0xa8] ss:$16 sps:$4 sm:$0xff]  }
   0x9   :  { %v8444_v24 = vld [vmem:[%s12721_s1 + $0xc4] ss:$16 sps:$4 sm:$0xff]   ;;  %v8446_v25 = vld [vmem:[%s12721_s1 + $0xcc] ss:$16 sps:$4 sm:$0xff]   ;;  %v8448_v26 = vld [vmem:[%s12721_s1 + $0xc0] ss:$16 sps:$4 sm:$0xff]  }
   0xa   :  { %v8449_v27 = vld [vmem:[%s12721_s1 + $0xc8] ss:$16 sps:$4 sm:$0xff]   ;;  %v8450_v28 = vld [vmem:[%s12721_s1 + $0xe4] ss:$16 sps:$4 sm:$0xff]   ;;  %v8452_v29 = vld [vmem:[%s12721_s1 + $0xec] ss:$16 sps:$4 sm:$0xff]  }
   0xb   :  { %5006 = vmatpush1.bf16.msra.mxu0 %v8424_v10  ;;  %5565 = vmatpush1.bf16.msra.mxu1 %v8425_v11  ;;  %v8454_v30 = vld [vmem:[%s12721_s1 + $0xe0] ss:$16 sps:$4 sm:$0xff]   ;;  %v8455_v31 = vld [vmem:[%s12721_s1 + $0xe8] ss:$16 sps:$4 sm:$0xff]   ;;  %v8456_v32 = vld [vmem:[%s12721_s1 + $0x104] ss:$16 sps:$4 sm:$0xff]  }
   0xc   :  { %5007 = vmatprep.subr.bf16.mxu0 %v8426_v12  ;;  %5566 = vmatprep.subr.bf16.mxu1 %v8428_v13  ;;  %v8458_v33 = vld [vmem:[%s12721_s1 + $0x10c] ss:$16 sps:$4 sm:$0xff]   ;;  %v8460_v34 = vld [vmem:[%s12721_s1 + $0x100] ss:$16 sps:$4 sm:$0xff]   ;;  %v8461_v35 = vld [vmem:[%s12721_s1 + $0x108] ss:$16 sps:$4 sm:$0xff]  }
   0xd   :  { %v8462_v36 = vld [vmem:[%s12721_s1 + $0x124] ss:$16 sps:$4 sm:$0xff]   ;;  %v8464_v37 = vld [vmem:[%s12721_s1 + $0x12c] ss:$16 sps:$4 sm:$0xff]   ;;  %v8466_v38 = vld [vmem:[%s12721_s1 + $0x120] ss:$16 sps:$4 sm:$0xff]  }
   0xe   :  { %v8467_v39 = vld [vmem:[%s12721_s1 + $0x128] ss:$16 sps:$4 sm:$0xff]   ;;  %v8468_v40 = vld [vmem:[%s12721_s1 + $0x144] ss:$16 sps:$4 sm:$0xff]   ;;  %v8470_v41 = vld [vmem:[%s12721_s1 + $0x14c] ss:$16 sps:$4 sm:$0xff]  }
   0xf   :  { %5008 = vmatpush1.bf16.msra.mxu0 %v8430_v14  ;;  %5567 = vmatpush1.bf16.msra.mxu1 %v8431_v15  ;;  %v8472_v42 = vld [vmem:[%s12721_s1 + $0x140] ss:$16 sps:$4 sm:$0xff]   ;;  %v8473_v43 = vld [vmem:[%s12721_s1 + $0x148] ss:$16 sps:$4 sm:$0xff]   ;;  %v8474_v44 = vld [vmem:[%s12721_s1 + $0x164] ss:$16 sps:$4 sm:$0xff]  }
  0x10   :  { %5009 = vmatprep.subr.bf16.mxu0 %v8432_v16  ;;  %5568 = vmatprep.subr.bf16.mxu1 %v8434_v17  ;;  %v8476_v45 = vld [vmem:[%s12721_s1 + $0x16c] ss:$16 sps:$4 sm:$0xff]   ;;  %v8478_v46 = vld [vmem:[%s12721_s1 + $0x160] ss:$16 sps:$4 sm:$0xff]   ;;  %v8479_v47 = vld [vmem:[%s12721_s1 + $0x168] ss:$16 sps:$4 sm:$0xff]  }
  0x11   :  { %v8506_v48 = vld [vmem:[%s12722_s0 + $0x4] ss:$100 sps:$4 sm:$0xff]   ;;  %v8482_v50 = vld [vmem:[%s12721_s1 + $0x18c] ss:$16 sps:$4 sm:$0xff]   ;;  %v8484_v51 = vld [vmem:[%s12721_s1 + $0x180] ss:$16 sps:$4 sm:$0xff]  }
  0x12   :  { %v8480_v49 = vld [vmem:[%s12721_s1 + $0x184] ss:$16 sps:$4 sm:$0xff]   ;;  %5033 = vmatprep.mubr.bf16.mxu0 %v8506_v48  ;;  %5592 = vmatprep.mubr.bf16.mxu1 %v8506_v48  ;;  %v8485_v52 = vld [vmem:[%s12721_s1 + $0x188] ss:$16 sps:$4 sm:$0xff]   ;;  %v8488_v54 = vld [vmem:[%s12721_s1 + $0x1ac] ss:$16 sps:$4 sm:$0xff]  }
  0x13   :  { %5010 = vmatpush1.bf16.msra.mxu0 %v8436_v18  ;;  %5569 = vmatpush1.bf16.msra.mxu1 %v8437_v19  ;;  %v8486_v53 = vld [vmem:[%s12721_s1 + $0x1a4] ss:$16 sps:$4 sm:$0xff]   ;;  %v8490_v55 = vld [vmem:[%s12721_s1 + $0x1a0] ss:$16 sps:$4 sm:$0xff]   ;;  %v8491_v56 = vld [vmem:[%s12721_s1 + $0x1a8] ss:$16 sps:$4 sm:$0xff]  }
  0x14   :  { %5011 = vmatprep.subr.bf16.mxu0 %v8438_v20  ;;  %5570 = vmatprep.subr.bf16.mxu1 %v8440_v21  ;;  %v8492_v57 = vld [vmem:[%s12721_s1 + $0x1c4] ss:$16 sps:$4 sm:$0xff]   ;;  %v8494_v58 = vld [vmem:[%s12721_s1 + $0x1cc] ss:$16 sps:$4 sm:$0xff]   ;;  %v8496_v59 = vld [vmem:[%s12721_s1 + $0x1c0] ss:$16 sps:$4 sm:$0xff]  }
  0x15   :  { %v8497_v60 = vld [vmem:[%s12721_s1 + $0x1c8] ss:$16 sps:$4 sm:$0xff]   ;;  %v8498_v61 = vld [vmem:[%s12721_s1 + $0x1e4] ss:$16 sps:$4 sm:$0xff]   ;;  %v8500_v62 = vld [vmem:[%s12721_s1 + $0x1ec] ss:$16 sps:$4 sm:$0xff]  }
  0x16   :  { %v8502_v63 = vld [vmem:[%s12721_s1 + $0x1e0] ss:$16 sps:$4 sm:$0xff]   ;;  %v8503_v0 = vld [vmem:[%s12721_s1 + $0x1e8] ss:$16 sps:$4 sm:$0xff]   ;;  %v8509_v1 = vld [vmem:[%s12721_s1 + $0x204] ss:$16 sps:$4 sm:$0xff]  }
  0x17   :  { %5012 = vmatpush1.bf16.msra.mxu0 %v8442_v22  ;;  %5571 = vmatpush1.bf16.msra.mxu1 %v8443_v23  ;;  %v8512_v2 = vld [vmem:[%s12721_s1 + $0x20c] ss:$16 sps:$4 sm:$0xff]   ;;  %v8504_v3 = vld [vmem:[%s12722_s0] ss:$100 sps:$4 sm:$0xff]   ;;  %v8510_v5 = vld [vmem:[%s12721_s1 + $0x208] ss:$16 sps:$4 sm:$0xff]  }
  0x18   :  { %5013 = vmatprep.subr.bf16.mxu0 %v8444_v24  ;;  %5572 = vmatprep.subr.bf16.mxu1 %v8446_v25  ;;  %v8507_v4 = vld [vmem:[%s12721_s1 + $0x200] ss:$16 sps:$4 sm:$0xff]   ;;  %v8515_v6 = vld [vmem:[%s12721_s1 + $0x224] ss:$16 sps:$4 sm:$0xff]   ;;  %v8518_v7 = vld [vmem:[%s12721_s1 + $0x22c] ss:$16 sps:$4 sm:$0xff]  }
  0x19   :  { %v8513_v8 = vld [vmem:[%s12721_s1 + $0x220] ss:$16 sps:$4 sm:$0xff]   ;;  %v8516_v9 = vld [vmem:[%s12721_s1 + $0x228] ss:$16 sps:$4 sm:$0xff]   ;;  %v8521_v10 = vld [vmem:[%s12721_s1 + $0x244] ss:$16 sps:$4 sm:$0xff]  }
  0x1a   :  { %v8524_v11 = vld [vmem:[%s12721_s1 + $0x24c] ss:$16 sps:$4 sm:$0xff]   ;;  %v8519_v12 = vld [vmem:[%s12721_s1 + $0x240] ss:$16 sps:$4 sm:$0xff]   ;;  %v8522_v13 = vld [vmem:[%s12721_s1 + $0x248] ss:$16 sps:$4 sm:$0xff]  }
  0x1b   :  { %5014 = vmatpush1.bf16.msra.mxu0 %v8448_v26  ;;  %5573 = vmatpush1.bf16.msra.mxu1 %v8449_v27  ;;  %v8527_v14 = vld [vmem:[%s12721_s1 + $0x264] ss:$16 sps:$4 sm:$0xff]   ;;  %v8530_v15 = vld [vmem:[%s12721_s1 + $0x26c] ss:$16 sps:$4 sm:$0xff]   ;;  %v8525_v16 = vld [vmem:[%s12721_s1 + $0x260] ss:$16 sps:$4 sm:$0xff]  }
  0x1c   :  { %5015 = vmatprep.subr.bf16.mxu0 %v8450_v28  ;;  %5574 = vmatprep.subr.bf16.mxu1 %v8452_v29  ;;  %v8528_v17 = vld [vmem:[%s12721_s1 + $0x268] ss:$16 sps:$4 sm:$0xff]   ;;  %v8533_v18 = vld [vmem:[%s12721_s1 + $0x284] ss:$16 sps:$4 sm:$0xff]   ;;  %v8536_v19 = vld [vmem:[%s12721_s1 + $0x28c] ss:$16 sps:$4 sm:$0xff]  }
  0x1d   :  { %v8531_v20 = vld [vmem:[%s12721_s1 + $0x280] ss:$16 sps:$4 sm:$0xff]   ;;  %v8534_v21 = vld [vmem:[%s12721_s1 + $0x288] ss:$16 sps:$4 sm:$0xff]   ;;  %v8539_v22 = vld [vmem:[%s12721_s1 + $0x2a4] ss:$16 sps:$4 sm:$0xff]  }
  0x1e   :  { %v8542_v23 = vld [vmem:[%s12721_s1 + $0x2ac] ss:$16 sps:$4 sm:$0xff]   ;;  %v8537_v24 = vld [vmem:[%s12721_s1 + $0x2a0] ss:$16 sps:$4 sm:$0xff]   ;;  %v8540_v25 = vld [vmem:[%s12721_s1 + $0x2a8] ss:$16 sps:$4 sm:$0xff]  }
  0x1f   :  { %5016 = vmatpush1.bf16.msra.mxu0 %v8454_v30  ;;  %5575 = vmatpush1.bf16.msra.mxu1 %v8455_v31  ;;  %v8545_v26 = vld [vmem:[%s12721_s1 + $0x2c4] ss:$16 sps:$4 sm:$0xff]   ;;  %v8548_v27 = vld [vmem:[%s12721_s1 + $0x2cc] ss:$16 sps:$4 sm:$0xff]   ;;  %v8543_v28 = vld [vmem:[%s12721_s1 + $0x2c0] ss:$16 sps:$4 sm:$0xff]  }
  0x20   :  { %5017 = vmatprep.subr.bf16.mxu0 %v8456_v32  ;;  %5576 = vmatprep.subr.bf16.mxu1 %v8458_v33  ;;  %v8546_v29 = vld [vmem:[%s12721_s1 + $0x2c8] ss:$16 sps:$4 sm:$0xff]   ;;  %v8605_v30 = vld [vmem:[%s12722_s0 + $0xc] ss:$100 sps:$4 sm:$0xff]   ;;  %v8551_v31 = vld [vmem:[%s12721_s1 + $0x2e4] ss:$16 sps:$4 sm:$0xff]  }
  0x21   :  { %v8554_v32 = vld [vmem:[%s12721_s1 + $0x2ec] ss:$16 sps:$4 sm:$0xff]   ;;  %v8549_v33 = vld [vmem:[%s12721_s1 + $0x2e0] ss:$16 sps:$4 sm:$0xff]  }
  0x22   :  { %v8578_v48 = vld [vmem:[%s12721_s1 + $0x36c] ss:$16 sps:$4 sm:$0xff]  }
  0x23   :  { %5018 = vmatpush1.bf16.msra.mxu0 %v8460_v34  ;;  %5577 = vmatpush1.bf16.msra.mxu1 %v8461_v35  ;;  %v8552_v34 = vld [vmem:[%s12721_s1 + $0x2e8] ss:$16 sps:$4 sm:$0xff]   ;;  %v8557_v35 = vld [vmem:[%s12721_s1 + $0x304] ss:$16 sps:$4 sm:$0xff]  }
  0x24   :  { %5019 = vmatprep.subr.bf16.mxu0 %v8462_v36  ;;  %5578 = vmatprep.subr.bf16.mxu1 %v8464_v37  ;;  %v8560_v36 = vld [vmem:[%s12721_s1 + $0x30c] ss:$16 sps:$4 sm:$0xff]   ;;  %v8555_v37 = vld [vmem:[%s12721_s1 + $0x300] ss:$16 sps:$4 sm:$0xff]  }
  0x27   :  { %5020 = vmatpush1.bf16.msra.mxu0 %v8466_v38  ;;  %5579 = vmatpush1.bf16.msra.mxu1 %v8467_v39  ;;  %v8558_v38 = vld [vmem:[%s12721_s1 + $0x308] ss:$16 sps:$4 sm:$0xff]   ;;  %v8563_v39 = vld [vmem:[%s12721_s1 + $0x324] ss:$16 sps:$4 sm:$0xff]  }
  0x28   :  { %5021 = vmatprep.subr.bf16.mxu0 %v8468_v40  ;;  %5580 = vmatprep.subr.bf16.mxu1 %v8470_v41  ;;  %v8566_v40 = vld [vmem:[%s12721_s1 + $0x32c] ss:$16 sps:$4 sm:$0xff]   ;;  %v8561_v41 = vld [vmem:[%s12721_s1 + $0x320] ss:$16 sps:$4 sm:$0xff]  }
  0x2b   :  { %5022 = vmatpush1.bf16.msra.mxu0 %v8472_v42  ;;  %5581 = vmatpush1.bf16.msra.mxu1 %v8473_v43  ;;  %v8564_v42 = vld [vmem:[%s12721_s1 + $0x328] ss:$16 sps:$4 sm:$0xff]   ;;  %v8569_v43 = vld [vmem:[%s12721_s1 + $0x344] ss:$16 sps:$4 sm:$0xff]  }
  0x2c   :  { %5023 = vmatprep.subr.bf16.mxu0 %v8474_v44  ;;  %5582 = vmatprep.subr.bf16.mxu1 %v8476_v45  ;;  %v8572_v44 = vld [vmem:[%s12721_s1 + $0x34c] ss:$16 sps:$4 sm:$0xff]   ;;  %v8567_v45 = vld [vmem:[%s12721_s1 + $0x340] ss:$16 sps:$4 sm:$0xff]  }
  0x2f   :  { %5024 = vmatpush1.bf16.msra.mxu0 %v8478_v46  ;;  %5583 = vmatpush1.bf16.msra.mxu1 %v8479_v47  ;;  %v8570_v46 = vld [vmem:[%s12721_s1 + $0x348] ss:$16 sps:$4 sm:$0xff]   ;;  %v8575_v47 = vld [vmem:[%s12721_s1 + $0x364] ss:$16 sps:$4 sm:$0xff]  }
  0x30   :  { %5025 = vmatprep.subr.bf16.mxu0 %v8480_v49  ;;  %5584 = vmatprep.subr.bf16.mxu1 %v8482_v50  ;;  %v8573_v49 = vld [vmem:[%s12721_s1 + $0x360] ss:$16 sps:$4 sm:$0xff]   ;;  %v8576_v50 = vld [vmem:[%s12721_s1 + $0x368] ss:$16 sps:$4 sm:$0xff]  }
  0x33   :  { %5026 = vmatpush1.bf16.msra.mxu0 %v8484_v51  ;;  %5585 = vmatpush1.bf16.msra.mxu1 %v8485_v52  ;;  %v8581_v51 = vld [vmem:[%s12721_s1 + $0x384] ss:$16 sps:$4 sm:$0xff]   ;;  %v8584_v52 = vld [vmem:[%s12721_s1 + $0x38c] ss:$16 sps:$4 sm:$0xff]  }
  0x34   :  { %5027 = vmatprep.subr.bf16.mxu0 %v8486_v53  ;;  %5586 = vmatprep.subr.bf16.mxu1 %v8488_v54  ;;  %v8579_v53 = vld [vmem:[%s12721_s1 + $0x380] ss:$16 sps:$4 sm:$0xff]   ;;  %v8582_v54 = vld [vmem:[%s12721_s1 + $0x388] ss:$16 sps:$4 sm:$0xff]  }
  0x37   :  { %5028 = vmatpush1.bf16.msra.mxu0 %v8490_v55  ;;  %5587 = vmatpush1.bf16.msra.mxu1 %v8491_v56  ;;  %v8587_v55 = vld [vmem:[%s12721_s1 + $0x3a4] ss:$16 sps:$4 sm:$0xff]   ;;  %v8590_v56 = vld [vmem:[%s12721_s1 + $0x3ac] ss:$16 sps:$4 sm:$0xff]  }
  0x38   :  { %5029 = vmatprep.subr.bf16.mxu0 %v8492_v57  ;;  %5588 = vmatprep.subr.bf16.mxu1 %v8494_v58  ;;  %v8585_v57 = vld [vmem:[%s12721_s1 + $0x3a0] ss:$16 sps:$4 sm:$0xff]   ;;  %v8588_v58 = vld [vmem:[%s12721_s1 + $0x3a8] ss:$16 sps:$4 sm:$0xff]  }
  0x3b   :  { %5030 = vmatpush1.bf16.msra.mxu0 %v8496_v59  ;;  %5589 = vmatpush1.bf16.msra.mxu1 %v8497_v60  ;;  %v8593_v59 = vld [vmem:[%s12721_s1 + $0x3c4] ss:$16 sps:$4 sm:$0xff]   ;;  %v8596_v60 = vld [vmem:[%s12721_s1 + $0x3cc] ss:$16 sps:$4 sm:$0xff]  }
  0x3c   :  { %5031 = vmatprep.subr.bf16.mxu0 %v8498_v61  ;;  %5590 = vmatprep.subr.bf16.mxu1 %v8500_v62  ;;  %v8591_v61 = vld [vmem:[%s12721_s1 + $0x3c0] ss:$16 sps:$4 sm:$0xff]   ;;  %v8594_v62 = vld [vmem:[%s12721_s1 + $0x3c8] ss:$16 sps:$4 sm:$0xff]  }
  0x3f   :  { %5032 = vmatpush1.bf16.msra.mxu0 %v8502_v63  ;;  %5591 = vmatpush1.bf16.msra.mxu1 %v8503_v0  ;;  %v8599_v63 = vld [vmem:[%s12721_s1 + $0x3e4] ss:$16 sps:$4 sm:$0xff]   ;;  %v8602_v0 = vld [vmem:[%s12721_s1 + $0x3ec] ss:$16 sps:$4 sm:$0xff]  }
  0x40   :  { %5044 = vmatprep.subr.bf16.mxu0 %v8509_v1  ;;  %5603 = vmatprep.subr.bf16.mxu1 %v8512_v2  ;;  %v8597_v1 = vld [vmem:[%s12721_s1 + $0x3e0] ss:$16 sps:$4 sm:$0xff]   ;;  %v8600_v2 = vld [vmem:[%s12721_s1 + $0x3e8] ss:$16 sps:$4 sm:$0xff]  }
  0x42   :  { %5034 = vmatmul.mubr.bf16.vlgmr.msra.gmra.mrb[0].mxu0 %v8504_v3  ;;  %5593 = vmatmul.mubr.bf16.vlgmr.msra.gmra.mrb[0].mxu1 %v8504_v3  ;;  %v8608_v3 = vld [vmem:[%s12721_s1 + $0x404] ss:$16 sps:$4 sm:$0xff]  }
  0x43   :  { %5045 = vmatpush1.bf16.msra.mxu0 %v8507_v4  ;;  %5604 = vmatpush1.bf16.msra.mxu1 %v8510_v5  ;;  %v8611_v4 = vld [vmem:[%s12721_s1 + $0x40c] ss:$16 sps:$4 sm:$0xff]  }
  0x44   :  { %5046 = vmatprep.subr.bf16.mxu0 %v8515_v6  ;;  %5605 = vmatprep.subr.bf16.mxu1 %v8518_v7  ;;  %v8603_v5 = vld [vmem:[%s12722_s0 + $0x8] ss:$100 sps:$4 sm:$0xff]   ;;  %v8606_v6 = vld [vmem:[%s12721_s1 + $0x400] ss:$16 sps:$4 sm:$0xff]  }
  0x45   :  { %5076 = vmatprep.mubr.bf16.mxu0 %v8605_v30  ;;  %5635 = vmatprep.mubr.bf16.mxu1 %v8605_v30  ;;  %v8609_v7 = vld [vmem:[%s12721_s1 + $0x408] ss:$16 sps:$4 sm:$0xff]   ;;  %v8647_v30 = vld [vmem:[%s12721_s1 + $0x4cc] ss:$16 sps:$4 sm:$0xff]  }
  0x47   :  { %5047 = vmatpush1.bf16.msra.mxu0 %v8513_v8  ;;  %5606 = vmatpush1.bf16.msra.mxu1 %v8516_v9  ;;  %v8614_v8 = vld [vmem:[%s12721_s1 + $0x424] ss:$16 sps:$4 sm:$0xff]   ;;  %v8617_v9 = vld [vmem:[%s12721_s1 + $0x42c] ss:$16 sps:$4 sm:$0xff]  }
  0x48   :  { %5048 = vmatprep.subr.bf16.mxu0 %v8521_v10  ;;  %5607 = vmatprep.subr.bf16.mxu1 %v8524_v11  ;;  %v8612_v10 = vld [vmem:[%s12721_s1 + $0x420] ss:$16 sps:$4 sm:$0xff]   ;;  %v8615_v11 = vld [vmem:[%s12721_s1 + $0x428] ss:$16 sps:$4 sm:$0xff]  }
  0x4b   :  { %5049 = vmatpush1.bf16.msra.mxu0 %v8519_v12  ;;  %5608 = vmatpush1.bf16.msra.mxu1 %v8522_v13  ;;  %v8704_v12 = vld [vmem:[%s12722_s0 + $0x14] ss:$100 sps:$4 sm:$0xff]  }
  0x4c   :  { %5050 = vmatprep.subr.bf16.mxu0 %v8527_v14  ;;  %5609 = vmatprep.subr.bf16.mxu1 %v8530_v15  ;;  %v8620_v13 = vld [vmem:[%s12721_s1 + $0x444] ss:$16 sps:$4 sm:$0xff]   ;;  %v8623_v14 = vld [vmem:[%s12721_s1 + $0x44c] ss:$16 sps:$4 sm:$0xff]   ;;  %v8618_v15 = vld [vmem:[%s12721_s1 + $0x440] ss:$16 sps:$4 sm:$0xff]  }
  0x4f   :  { %5051 = vmatpush1.bf16.msra.mxu0 %v8525_v16  ;;  %5610 = vmatpush1.bf16.msra.mxu1 %v8528_v17  ;;  %v8621_v16 = vld [vmem:[%s12721_s1 + $0x448] ss:$16 sps:$4 sm:$0xff]   ;;  %v8626_v17 = vld [vmem:[%s12721_s1 + $0x464] ss:$16 sps:$4 sm:$0xff]  }
  0x50   :  { %5052 = vmatprep.subr.bf16.mxu0 %v8533_v18  ;;  %5611 = vmatprep.subr.bf16.mxu1 %v8536_v19  ;;  %v8629_v18 = vld [vmem:[%s12721_s1 + $0x46c] ss:$16 sps:$4 sm:$0xff]   ;;  %v8624_v19 = vld [vmem:[%s12721_s1 + $0x460] ss:$16 sps:$4 sm:$0xff]  }
  0x53   :  { %5053 = vmatpush1.bf16.msra.mxu0 %v8531_v20  ;;  %5612 = vmatpush1.bf16.msra.mxu1 %v8534_v21  ;;  %v8627_v20 = vld [vmem:[%s12721_s1 + $0x468] ss:$16 sps:$4 sm:$0xff]   ;;  %v8632_v21 = vld [vmem:[%s12721_s1 + $0x484] ss:$16 sps:$4 sm:$0xff]  }
  0x54   :  { %5054 = vmatprep.subr.bf16.mxu0 %v8539_v22  ;;  %5613 = vmatprep.subr.bf16.mxu1 %v8542_v23  ;;  %v8635_v22 = vld [vmem:[%s12721_s1 + $0x48c] ss:$16 sps:$4 sm:$0xff]   ;;  %v8630_v23 = vld [vmem:[%s12721_s1 + $0x480] ss:$16 sps:$4 sm:$0xff]  }
  0x57   :  { %5055 = vmatpush1.bf16.msra.mxu0 %v8537_v24  ;;  %5614 = vmatpush1.bf16.msra.mxu1 %v8540_v25  ;;  %v8633_v24 = vld [vmem:[%s12721_s1 + $0x488] ss:$16 sps:$4 sm:$0xff]   ;;  %v8638_v25 = vld [vmem:[%s12721_s1 + $0x4a4] ss:$16 sps:$4 sm:$0xff]  }
  0x58   :  { %5056 = vmatprep.subr.bf16.mxu0 %v8545_v26  ;;  %5615 = vmatprep.subr.bf16.mxu1 %v8548_v27  ;;  %v8641_v26 = vld [vmem:[%s12721_s1 + $0x4ac] ss:$16 sps:$4 sm:$0xff]   ;;  %v8636_v27 = vld [vmem:[%s12721_s1 + $0x4a0] ss:$16 sps:$4 sm:$0xff]  }
  0x5b   :  { %5057 = vmatpush1.bf16.msra.mxu0 %v8543_v28  ;;  %5616 = vmatpush1.bf16.msra.mxu1 %v8546_v29  ;;  %v8639_v28 = vld [vmem:[%s12721_s1 + $0x4a8] ss:$16 sps:$4 sm:$0xff]   ;;  %v8644_v29 = vld [vmem:[%s12721_s1 + $0x4c4] ss:$16 sps:$4 sm:$0xff]  }
  0x5c   :  { %5058 = vmatprep.subr.bf16.mxu0 %v8551_v31  ;;  %5617 = vmatprep.subr.bf16.mxu1 %v8554_v32  ;;  %v8642_v31 = vld [vmem:[%s12721_s1 + $0x4c0] ss:$16 sps:$4 sm:$0xff]   ;;  %v8645_v32 = vld [vmem:[%s12721_s1 + $0x4c8] ss:$16 sps:$4 sm:$0xff]  }
  0x5f   :  { %5059 = vmatpush1.bf16.msra.mxu0 %v8549_v33  ;;  %5618 = vmatpush1.bf16.msra.mxu1 %v8552_v34  ;;  %v8650_v33 = vld [vmem:[%s12721_s1 + $0x4e4] ss:$16 sps:$4 sm:$0xff]   ;;  %v8653_v34 = vld [vmem:[%s12721_s1 + $0x4ec] ss:$16 sps:$4 sm:$0xff]  }
  0x60   :  { %5060 = vmatprep.subr.bf16.mxu0 %v8557_v35  ;;  %5619 = vmatprep.subr.bf16.mxu1 %v8560_v36  ;;  %v8648_v35 = vld [vmem:[%s12721_s1 + $0x4e0] ss:$16 sps:$4 sm:$0xff]   ;;  %v8651_v36 = vld [vmem:[%s12721_s1 + $0x4e8] ss:$16 sps:$4 sm:$0xff]  }
  0x63   :  { %5061 = vmatpush1.bf16.msra.mxu0 %v8555_v37  ;;  %5620 = vmatpush1.bf16.msra.mxu1 %v8558_v38  ;;  %v8656_v37 = vld [vmem:[%s12721_s1 + $0x504] ss:$16 sps:$4 sm:$0xff]   ;;  %v8659_v38 = vld [vmem:[%s12721_s1 + $0x50c] ss:$16 sps:$4 sm:$0xff]  }
  0x64   :  { %5062 = vmatprep.subr.bf16.mxu0 %v8563_v39  ;;  %5621 = vmatprep.subr.bf16.mxu1 %v8566_v40  ;;  %v8654_v39 = vld [vmem:[%s12721_s1 + $0x500] ss:$16 sps:$4 sm:$0xff]   ;;  %v8657_v40 = vld [vmem:[%s12721_s1 + $0x508] ss:$16 sps:$4 sm:$0xff]  }
  0x67   :  { %5063 = vmatpush1.bf16.msra.mxu0 %v8561_v41  ;;  %5622 = vmatpush1.bf16.msra.mxu1 %v8564_v42  ;;  %v8662_v41 = vld [vmem:[%s12721_s1 + $0x524] ss:$16 sps:$4 sm:$0xff]   ;;  %v8665_v42 = vld [vmem:[%s12721_s1 + $0x52c] ss:$16 sps:$4 sm:$0xff]  }
  0x68   :  { %5064 = vmatprep.subr.bf16.mxu0 %v8569_v43  ;;  %5623 = vmatprep.subr.bf16.mxu1 %v8572_v44  ;;  %v8660_v43 = vld [vmem:[%s12721_s1 + $0x520] ss:$16 sps:$4 sm:$0xff]   ;;  %v8663_v44 = vld [vmem:[%s12721_s1 + $0x528] ss:$16 sps:$4 sm:$0xff]  }
  0x6b   :  { %5065 = vmatpush1.bf16.msra.mxu0 %v8567_v45  ;;  %5624 = vmatpush1.bf16.msra.mxu1 %v8570_v46  ;;  %v8668_v45 = vld [vmem:[%s12721_s1 + $0x544] ss:$16 sps:$4 sm:$0xff]   ;;  %v8671_v46 = vld [vmem:[%s12721_s1 + $0x54c] ss:$16 sps:$4 sm:$0xff]  }
  0x6c   :  { %5066 = vmatprep.subr.bf16.mxu0 %v8575_v47  ;;  %5625 = vmatprep.subr.bf16.mxu1 %v8578_v48  ;;  %v8666_v47 = vld [vmem:[%s12721_s1 + $0x540] ss:$16 sps:$4 sm:$0xff]   ;;  %v8669_v48 = vld [vmem:[%s12721_s1 + $0x548] ss:$16 sps:$4 sm:$0xff]  }
  0x6f   :  { %5067 = vmatpush1.bf16.msra.mxu0 %v8573_v49  ;;  %5626 = vmatpush1.bf16.msra.mxu1 %v8576_v50  ;;  %v8674_v49 = vld [vmem:[%s12721_s1 + $0x564] ss:$16 sps:$4 sm:$0xff]   ;;  %v8677_v50 = vld [vmem:[%s12721_s1 + $0x56c] ss:$16 sps:$4 sm:$0xff]  }
  0x70   :  { %5068 = vmatprep.subr.bf16.mxu0 %v8581_v51  ;;  %5627 = vmatprep.subr.bf16.mxu1 %v8584_v52  ;;  %v8672_v51 = vld [vmem:[%s12721_s1 + $0x560] ss:$16 sps:$4 sm:$0xff]   ;;  %v8675_v52 = vld [vmem:[%s12721_s1 + $0x568] ss:$16 sps:$4 sm:$0xff]  }
  0x73   :  { %5069 = vmatpush1.bf16.msra.mxu0 %v8579_v53  ;;  %5628 = vmatpush1.bf16.msra.mxu1 %v8582_v54  ;;  %v8680_v53 = vld [vmem:[%s12721_s1 + $0x584] ss:$16 sps:$4 sm:$0xff]   ;;  %v8683_v54 = vld [vmem:[%s12721_s1 + $0x58c] ss:$16 sps:$4 sm:$0xff]  }
  0x74   :  { %5070 = vmatprep.subr.bf16.mxu0 %v8587_v55  ;;  %5629 = vmatprep.subr.bf16.mxu1 %v8590_v56  ;;  %v8678_v55 = vld [vmem:[%s12721_s1 + $0x580] ss:$16 sps:$4 sm:$0xff]   ;;  %v8681_v56 = vld [vmem:[%s12721_s1 + $0x588] ss:$16 sps:$4 sm:$0xff]  }
  0x77   :  { %5071 = vmatpush1.bf16.msra.mxu0 %v8585_v57  ;;  %5630 = vmatpush1.bf16.msra.mxu1 %v8588_v58  ;;  %v8686_v57 = vld [vmem:[%s12721_s1 + $0x5a4] ss:$16 sps:$4 sm:$0xff]   ;;  %v8689_v58 = vld [vmem:[%s12721_s1 + $0x5ac] ss:$16 sps:$4 sm:$0xff]  }
  0x78   :  { %5072 = vmatprep.subr.bf16.mxu0 %v8593_v59  ;;  %5631 = vmatprep.subr.bf16.mxu1 %v8596_v60  ;;  %v8684_v59 = vld [vmem:[%s12721_s1 + $0x5a0] ss:$16 sps:$4 sm:$0xff]   ;;  %v8687_v60 = vld [vmem:[%s12721_s1 + $0x5a8] ss:$16 sps:$4 sm:$0xff]  }
  0x7b   :  { %5073 = vmatpush1.bf16.msra.mxu0 %v8591_v61  ;;  %5632 = vmatpush1.bf16.msra.mxu1 %v8594_v62  ;;  %v8692_v61 = vld [vmem:[%s12721_s1 + $0x5c4] ss:$16 sps:$4 sm:$0xff]   ;;  %v8695_v62 = vld [vmem:[%s12721_s1 + $0x5cc] ss:$16 sps:$4 sm:$0xff]  }
  0x7c   :  { %5074 = vmatprep.subr.bf16.mxu0 %v8599_v63  ;;  %5633 = vmatprep.subr.bf16.mxu1 %v8602_v0  ;;  %v8690_v63 = vld [vmem:[%s12721_s1 + $0x5c0] ss:$16 sps:$4 sm:$0xff]   ;;  %v8693_v0 = vld [vmem:[%s12721_s1 + $0x5c8] ss:$16 sps:$4 sm:$0xff]  }
  0x7f   :  { %5075 = vmatpush1.bf16.msra.mxu0 %v8597_v1  ;;  %5634 = vmatpush1.bf16.msra.mxu1 %v8600_v2  ;;  %v8698_v1 = vld [vmem:[%s12721_s1 + $0x5e4] ss:$16 sps:$4 sm:$0xff]   ;;  %v8701_v2 = vld [vmem:[%s12721_s1 + $0x5ec] ss:$16 sps:$4 sm:$0xff]  }
  0x80   :  { %5087 = vmatprep.subr.bf16.mxu0 %v8608_v3  ;;  %5646 = vmatprep.subr.bf16.mxu1 %v8611_v4  ;;  %v8696_v3 = vld [vmem:[%s12721_s1 + $0x5e0] ss:$16 sps:$4 sm:$0xff]   ;;  %v8699_v4 = vld [vmem:[%s12721_s1 + $0x5e8] ss:$16 sps:$4 sm:$0xff]  }
  0x82   :  { %5077 = vmatmul.mubr.bf16.vlgmr.msra.gmra.mrb[0].mxu0 %v8603_v5  ;;  %5636 = vmatmul.mubr.bf16.vlgmr.msra.gmra.mrb[0].mxu1 %v8603_v5  ;;  %v8707_v5 = vld [vmem:[%s12721_s1 + $0x604] ss:$16 sps:$4 sm:$0xff]  }
  0x83   :  { %5088 = vmatpush1.bf16.msra.mxu0 %v8606_v6  ;;  %5647 = vmatpush1.bf16.msra.mxu1 %v8609_v7  ;;  %v8710_v6 = vld [vmem:[%s12721_s1 + $0x60c] ss:$16 sps:$4 sm:$0xff]   ;;  %v8702_v7 = vld [vmem:[%s12722_s0 + $0x10] ss:$100 sps:$4 sm:$0xff]  }
  0x84   :  { %5089 = vmatprep.subr.bf16.mxu0 %v8614_v8  ;;  %5648 = vmatprep.subr.bf16.mxu1 %v8617_v9  ;;  %v8705_v8 = vld [vmem:[%s12721_s1 + $0x600] ss:$16 sps:$4 sm:$0xff]   ;;  %v8708_v9 = vld [vmem:[%s12721_s1 + $0x608] ss:$16 sps:$4 sm:$0xff]  }
  0x85   :  { %5119 = vmatprep.mubr.bf16.mxu0 %v8704_v12  ;;  %5678 = vmatprep.mubr.bf16.mxu1 %v8704_v12  ;;  %v8803_v12 = vld [vmem:[%s12722_s0 + $0x1c] ss:$100 sps:$4 sm:$0xff]  }
  0x87   :  { %5090 = vmatpush1.bf16.msra.mxu0 %v8612_v10  ;;  %5649 = vmatpush1.bf16.msra.mxu1 %v8615_v11  ;;  %v8713_v10 = vld [vmem:[%s12721_s1 + $0x624] ss:$16 sps:$4 sm:$0xff]   ;;  %v8716_v11 = vld [vmem:[%s12721_s1 + $0x62c] ss:$16 sps:$4 sm:$0xff]  }
  0x88   :  { %5091 = vmatprep.subr.bf16.mxu0 %v8620_v13  ;;  %5650 = vmatprep.subr.bf16.mxu1 %v8623_v14  ;;  %v8711_v13 = vld [vmem:[%s12721_s1 + $0x620] ss:$16 sps:$4 sm:$0xff]   ;;  %v8714_v14 = vld [vmem:[%s12721_s1 + $0x628] ss:$16 sps:$4 sm:$0xff]  }
  0x8b   :  { %5092 = vmatpush1.bf16.msra.mxu0 %v8618_v15  ;;  %5651 = vmatpush1.bf16.msra.mxu1 %v8621_v16  ;;  %v8719_v15 = vld [vmem:[%s12721_s1 + $0x644] ss:$16 sps:$4 sm:$0xff]   ;;  %v8722_v16 = vld [vmem:[%s12721_s1 + $0x64c] ss:$16 sps:$4 sm:$0xff]  }
  0x8c   :  { %5093 = vmatprep.subr.bf16.mxu0 %v8626_v17  ;;  %5652 = vmatprep.subr.bf16.mxu1 %v8629_v18  ;;  %v8717_v17 = vld [vmem:[%s12721_s1 + $0x640] ss:$16 sps:$4 sm:$0xff]   ;;  %v8720_v18 = vld [vmem:[%s12721_s1 + $0x648] ss:$16 sps:$4 sm:$0xff]  }
  0x8f   :  { %5094 = vmatpush1.bf16.msra.mxu0 %v8624_v19  ;;  %5653 = vmatpush1.bf16.msra.mxu1 %v8627_v20  ;;  %v8725_v19 = vld [vmem:[%s12721_s1 + $0x664] ss:$16 sps:$4 sm:$0xff]   ;;  %v8728_v20 = vld [vmem:[%s12721_s1 + $0x66c] ss:$16 sps:$4 sm:$0xff]  }
  0x90   :  { %5095 = vmatprep.subr.bf16.mxu0 %v8632_v21  ;;  %5654 = vmatprep.subr.bf16.mxu1 %v8635_v22  ;;  %v8723_v21 = vld [vmem:[%s12721_s1 + $0x660] ss:$16 sps:$4 sm:$0xff]   ;;  %v8726_v22 = vld [vmem:[%s12721_s1 + $0x668] ss:$16 sps:$4 sm:$0xff]  }
  0x93   :  { %5096 = vmatpush1.bf16.msra.mxu0 %v8630_v23  ;;  %5655 = vmatpush1.bf16.msra.mxu1 %v8633_v24  ;;  %v8731_v23 = vld [vmem:[%s12721_s1 + $0x684] ss:$16 sps:$4 sm:$0xff]   ;;  %v8734_v24 = vld [vmem:[%s12721_s1 + $0x68c] ss:$16 sps:$4 sm:$0xff]  }
  0x94   :  { %5097 = vmatprep.subr.bf16.mxu0 %v8638_v25  ;;  %5656 = vmatprep.subr.bf16.mxu1 %v8641_v26  ;;  %v8729_v25 = vld [vmem:[%s12721_s1 + $0x680] ss:$16 sps:$4 sm:$0xff]   ;;  %v8732_v26 = vld [vmem:[%s12721_s1 + $0x688] ss:$16 sps:$4 sm:$0xff]  }
  0x97   :  { %5098 = vmatpush1.bf16.msra.mxu0 %v8636_v27  ;;  %5657 = vmatpush1.bf16.msra.mxu1 %v8639_v28  ;;  %v8737_v27 = vld [vmem:[%s12721_s1 + $0x6a4] ss:$16 sps:$4 sm:$0xff]   ;;  %v8740_v28 = vld [vmem:[%s12721_s1 + $0x6ac] ss:$16 sps:$4 sm:$0xff]  }
  0x98   :  { %5099 = vmatprep.subr.bf16.mxu0 %v8644_v29  ;;  %5658 = vmatprep.subr.bf16.mxu1 %v8647_v30  ;;  %v8735_v29 = vld [vmem:[%s12721_s1 + $0x6a0] ss:$16 sps:$4 sm:$0xff]   ;;  %v8738_v30 = vld [vmem:[%s12721_s1 + $0x6a8] ss:$16 sps:$4 sm:$0xff]  }
  0x9b   :  { %5100 = vmatpush1.bf16.msra.mxu0 %v8642_v31  ;;  %5659 = vmatpush1.bf16.msra.mxu1 %v8645_v32  ;;  %v8743_v31 = vld [vmem:[%s12721_s1 + $0x6c4] ss:$16 sps:$4 sm:$0xff]   ;;  %v8746_v32 = vld [vmem:[%s12721_s1 + $0x6cc] ss:$16 sps:$4 sm:$0xff]  }
  0x9c   :  { %5101 = vmatprep.subr.bf16.mxu0 %v8650_v33  ;;  %5660 = vmatprep.subr.bf16.mxu1 %v8653_v34  ;;  %v8741_v33 = vld [vmem:[%s12721_s1 + $0x6c0] ss:$16 sps:$4 sm:$0xff]   ;;  %v8744_v34 = vld [vmem:[%s12721_s1 + $0x6c8] ss:$16 sps:$4 sm:$0xff]  }
  0x9f   :  { %5102 = vmatpush1.bf16.msra.mxu0 %v8648_v35  ;;  %5661 = vmatpush1.bf16.msra.mxu1 %v8651_v36  ;;  %v8749_v35 = vld [vmem:[%s12721_s1 + $0x6e4] ss:$16 sps:$4 sm:$0xff]   ;;  %v8752_v36 = vld [vmem:[%s12721_s1 + $0x6ec] ss:$16 sps:$4 sm:$0xff]  }
  0xa0   :  { %5103 = vmatprep.subr.bf16.mxu0 %v8656_v37  ;;  %5662 = vmatprep.subr.bf16.mxu1 %v8659_v38  ;;  %v8747_v37 = vld [vmem:[%s12721_s1 + $0x6e0] ss:$16 sps:$4 sm:$0xff]   ;;  %v8750_v38 = vld [vmem:[%s12721_s1 + $0x6e8] ss:$16 sps:$4 sm:$0xff]  }
  0xa3   :  { %5104 = vmatpush1.bf16.msra.mxu0 %v8654_v39  ;;  %5663 = vmatpush1.bf16.msra.mxu1 %v8657_v40  ;;  %v8755_v39 = vld [vmem:[%s12721_s1 + $0x704] ss:$16 sps:$4 sm:$0xff]   ;;  %v8758_v40 = vld [vmem:[%s12721_s1 + $0x70c] ss:$16 sps:$4 sm:$0xff]  }
  0xa4   :  { %5105 = vmatprep.subr.bf16.mxu0 %v8662_v41  ;;  %5664 = vmatprep.subr.bf16.mxu1 %v8665_v42  ;;  %v8753_v41 = vld [vmem:[%s12721_s1 + $0x700] ss:$16 sps:$4 sm:$0xff]   ;;  %v8756_v42 = vld [vmem:[%s12721_s1 + $0x708] ss:$16 sps:$4 sm:$0xff]  }
  0xa7   :  { %5106 = vmatpush1.bf16.msra.mxu0 %v8660_v43  ;;  %5665 = vmatpush1.bf16.msra.mxu1 %v8663_v44  ;;  %v8761_v43 = vld [vmem:[%s12721_s1 + $0x724] ss:$16 sps:$4 sm:$0xff]   ;;  %v8764_v44 = vld [vmem:[%s12721_s1 + $0x72c] ss:$16 sps:$4 sm:$0xff]  }
  0xa8   :  { %5107 = vmatprep.subr.bf16.mxu0 %v8668_v45  ;;  %5666 = vmatprep.subr.bf16.mxu1 %v8671_v46  ;;  %v8759_v45 = vld [vmem:[%s12721_s1 + $0x720] ss:$16 sps:$4 sm:$0xff]   ;;  %v8762_v46 = vld [vmem:[%s12721_s1 + $0x728] ss:$16 sps:$4 sm:$0xff]  }
  0xab   :  { %5108 = vmatpush1.bf16.msra.mxu0 %v8666_v47  ;;  %5667 = vmatpush1.bf16.msra.mxu1 %v8669_v48  ;;  %v8767_v47 = vld [vmem:[%s12721_s1 + $0x744] ss:$16 sps:$4 sm:$0xff]   ;;  %v8770_v48 = vld [vmem:[%s12721_s1 + $0x74c] ss:$16 sps:$4 sm:$0xff]  }
  0xac   :  { %5109 = vmatprep.subr.bf16.mxu0 %v8674_v49  ;;  %5668 = vmatprep.subr.bf16.mxu1 %v8677_v50  ;;  %v8765_v49 = vld [vmem:[%s12721_s1 + $0x740] ss:$16 sps:$4 sm:$0xff]   ;;  %v8768_v50 = vld [vmem:[%s12721_s1 + $0x748] ss:$16 sps:$4 sm:$0xff]  }
  0xaf   :  { %5110 = vmatpush1.bf16.msra.mxu0 %v8672_v51  ;;  %5669 = vmatpush1.bf16.msra.mxu1 %v8675_v52  ;;  %v8773_v51 = vld [vmem:[%s12721_s1 + $0x764] ss:$16 sps:$4 sm:$0xff]   ;;  %v8776_v52 = vld [vmem:[%s12721_s1 + $0x76c] ss:$16 sps:$4 sm:$0xff]  }
  0xb0   :  { %5111 = vmatprep.subr.bf16.mxu0 %v8680_v53  ;;  %5670 = vmatprep.subr.bf16.mxu1 %v8683_v54  ;;  %v8771_v53 = vld [vmem:[%s12721_s1 + $0x760] ss:$16 sps:$4 sm:$0xff]   ;;  %v8774_v54 = vld [vmem:[%s12721_s1 + $0x768] ss:$16 sps:$4 sm:$0xff]  }
  0xb3   :  { %5112 = vmatpush1.bf16.msra.mxu0 %v8678_v55  ;;  %5671 = vmatpush1.bf16.msra.mxu1 %v8681_v56  ;;  %v8779_v55 = vld [vmem:[%s12721_s1 + $0x784] ss:$16 sps:$4 sm:$0xff]   ;;  %v8782_v56 = vld [vmem:[%s12721_s1 + $0x78c] ss:$16 sps:$4 sm:$0xff]  }
  0xb4   :  { %5113 = vmatprep.subr.bf16.mxu0 %v8686_v57  ;;  %5672 = vmatprep.subr.bf16.mxu1 %v8689_v58  ;;  %v8777_v57 = vld [vmem:[%s12721_s1 + $0x780] ss:$16 sps:$4 sm:$0xff]   ;;  %v8780_v58 = vld [vmem:[%s12721_s1 + $0x788] ss:$16 sps:$4 sm:$0xff]  }
  0xb7   :  { %5114 = vmatpush1.bf16.msra.mxu0 %v8684_v59  ;;  %5673 = vmatpush1.bf16.msra.mxu1 %v8687_v60  ;;  %v8785_v59 = vld [vmem:[%s12721_s1 + $0x7a4] ss:$16 sps:$4 sm:$0xff]   ;;  %v8788_v60 = vld [vmem:[%s12721_s1 + $0x7ac] ss:$16 sps:$4 sm:$0xff]  }
  0xb8   :  { %5115 = vmatprep.subr.bf16.mxu0 %v8692_v61  ;;  %5674 = vmatprep.subr.bf16.mxu1 %v8695_v62  ;;  %v8783_v61 = vld [vmem:[%s12721_s1 + $0x7a0] ss:$16 sps:$4 sm:$0xff]   ;;  %v8786_v62 = vld [vmem:[%s12721_s1 + $0x7a8] ss:$16 sps:$4 sm:$0xff]  }
  0xbb   :  { %5116 = vmatpush1.bf16.msra.mxu0 %v8690_v63  ;;  %5675 = vmatpush1.bf16.msra.mxu1 %v8693_v0  ;;  %v8791_v63 = vld [vmem:[%s12721_s1 + $0x7c4] ss:$16 sps:$4 sm:$0xff]   ;;  %v8794_v0 = vld [vmem:[%s12721_s1 + $0x7cc] ss:$16 sps:$4 sm:$0xff]  }
  0xbc   :  { %5117 = vmatprep.subr.bf16.mxu0 %v8698_v1  ;;  %5676 = vmatprep.subr.bf16.mxu1 %v8701_v2  ;;  %v8789_v1 = vld [vmem:[%s12721_s1 + $0x7c0] ss:$16 sps:$4 sm:$0xff]   ;;  %v8792_v2 = vld [vmem:[%s12721_s1 + $0x7c8] ss:$16 sps:$4 sm:$0xff]  }
  0xbf   :  { %5118 = vmatpush1.bf16.msra.mxu0 %v8696_v3  ;;  %5677 = vmatpush1.bf16.msra.mxu1 %v8699_v4  ;;  %v8797_v3 = vld [vmem:[%s12721_s1 + $0x7e4] ss:$16 sps:$4 sm:$0xff]   ;;  %v8800_v4 = vld [vmem:[%s12721_s1 + $0x7ec] ss:$16 sps:$4 sm:$0xff]  }
  0xc0   :  { %5130 = vmatprep.subr.bf16.mxu0 %v8707_v5  ;;  %5689 = vmatprep.subr.bf16.mxu1 %v8710_v6  ;;  %v8795_v5 = vld [vmem:[%s12721_s1 + $0x7e0] ss:$16 sps:$4 sm:$0xff]   ;;  %v8798_v6 = vld [vmem:[%s12721_s1 + $0x7e8] ss:$16 sps:$4 sm:$0xff]  }
  0xc2   :  { %5120 = vmatmul.mubr.bf16.vlgmr.msra.gmra.mrb[0].mxu0 %v8702_v7  ;;  %5679 = vmatmul.mubr.bf16.vlgmr.msra.gmra.mrb[0].mxu1 %v8702_v7  ;;  %v8806_v7 = vld [vmem:[%s12721_s1 + $0x804] ss:$16 sps:$4 sm:$0xff]  }
  0xc3   :  { %5131 = vmatpush1.bf16.msra.mxu0 %v8705_v8  ;;  %5690 = vmatpush1.bf16.msra.mxu1 %v8708_v9  ;;  %v8809_v8 = vld [vmem:[%s12721_s1 + $0x80c] ss:$16 sps:$4 sm:$0xff]  }
  0xc4   :  { %5132 = vmatprep.subr.bf16.mxu0 %v8713_v10  ;;  %5691 = vmatprep.subr.bf16.mxu1 %v8716_v11  ;;  %v8801_v9 = vld [vmem:[%s12722_s0 + $0x18] ss:$100 sps:$4 sm:$0xff]   ;;  %v8804_v10 = vld [vmem:[%s12721_s1 + $0x800] ss:$16 sps:$4 sm:$0xff]  }
  0xc5   :  { %5162 = vmatprep.mubr.bf16.mxu0 %v8803_v12  ;;  %5721 = vmatprep.mubr.bf16.mxu1 %v8803_v12  ;;  %v8807_v11 = vld [vmem:[%s12721_s1 + $0x808] ss:$16 sps:$4 sm:$0xff]   ;;  %v8812_v12 = vld [vmem:[%s12721_s1 + $0x824] ss:$16 sps:$4 sm:$0xff]  }
  0xc7   :  { %5133 = vmatpush1.bf16.msra.mxu0 %v8711_v13  ;;  %5692 = vmatpush1.bf16.msra.mxu1 %v8714_v14  ;;  %v8815_v13 = vld [vmem:[%s12721_s1 + $0x82c] ss:$16 sps:$4 sm:$0xff]   ;;  %v8902_v14 = vld [vmem:[%s12722_s0 + $0x24] ss:$100 sps:$4 sm:$0xff]  }
  0xc8   :  { %5134 = vmatprep.subr.bf16.mxu0 %v8719_v15  ;;  %5693 = vmatprep.subr.bf16.mxu1 %v8722_v16  ;;  %v8810_v15 = vld [vmem:[%s12721_s1 + $0x820] ss:$16 sps:$4 sm:$0xff]   ;;  %v8813_v16 = vld [vmem:[%s12721_s1 + $0x828] ss:$16 sps:$4 sm:$0xff]  }
  0xcb   :  { %5135 = vmatpush1.bf16.msra.mxu0 %v8717_v17  ;;  %5694 = vmatpush1.bf16.msra.mxu1 %v8720_v18  ;;  %v8818_v17 = vld [vmem:[%s12721_s1 + $0x844] ss:$16 sps:$4 sm:$0xff]   ;;  %v8821_v18 = vld [vmem:[%s12721_s1 + $0x84c] ss:$16 sps:$4 sm:$0xff]  }
  0xcc   :  { %5136 = vmatprep.subr.bf16.mxu0 %v8725_v19  ;;  %5695 = vmatprep.subr.bf16.mxu1 %v8728_v20  ;;  %v8816_v19 = vld [vmem:[%s12721_s1 + $0x840] ss:$16 sps:$4 sm:$0xff]   ;;  %v8819_v20 = vld [vmem:[%s12721_s1 + $0x848] ss:$16 sps:$4 sm:$0xff]  }
  0xcf   :  { %5137 = vmatpush1.bf16.msra.mxu0 %v8723_v21  ;;  %5696 = vmatpush1.bf16.msra.mxu1 %v8726_v22  ;;  %v8824_v21 = vld [vmem:[%s12721_s1 + $0x864] ss:$16 sps:$4 sm:$0xff]   ;;  %v8827_v22 = vld [vmem:[%s12721_s1 + $0x86c] ss:$16 sps:$4 sm:$0xff]  }
  0xd0   :  { %5138 = vmatprep.subr.bf16.mxu0 %v8731_v23  ;;  %5697 = vmatprep.subr.bf16.mxu1 %v8734_v24  ;;  %v8822_v23 = vld [vmem:[%s12721_s1 + $0x860] ss:$16 sps:$4 sm:$0xff]   ;;  %v8825_v24 = vld [vmem:[%s12721_s1 + $0x868] ss:$16 sps:$4 sm:$0xff]  }
  0xd3   :  { %5139 = vmatpush1.bf16.msra.mxu0 %v8729_v25  ;;  %5698 = vmatpush1.bf16.msra.mxu1 %v8732_v26  ;;  %v8830_v25 = vld [vmem:[%s12721_s1 + $0x884] ss:$16 sps:$4 sm:$0xff]   ;;  %v8833_v26 = vld [vmem:[%s12721_s1 + $0x88c] ss:$16 sps:$4 sm:$0xff]  }
  0xd4   :  { %5140 = vmatprep.subr.bf16.mxu0 %v8737_v27  ;;  %5699 = vmatprep.subr.bf16.mxu1 %v8740_v28  ;;  %v8828_v27 = vld [vmem:[%s12721_s1 + $0x880] ss:$16 sps:$4 sm:$0xff]   ;;  %v8831_v28 = vld [vmem:[%s12721_s1 + $0x888] ss:$16 sps:$4 sm:$0xff]  }
  0xd7   :  { %5141 = vmatpush1.bf16.msra.mxu0 %v8735_v29  ;;  %5700 = vmatpush1.bf16.msra.mxu1 %v8738_v30  ;;  %v8836_v29 = vld [vmem:[%s12721_s1 + $0x8a4] ss:$16 sps:$4 sm:$0xff]   ;;  %v8839_v30 = vld [vmem:[%s12721_s1 + $0x8ac] ss:$16 sps:$4 sm:$0xff]  }
  0xd8   :  { %5142 = vmatprep.subr.bf16.mxu0 %v8743_v31  ;;  %5701 = vmatprep.subr.bf16.mxu1 %v8746_v32  ;;  %v8834_v31 = vld [vmem:[%s12721_s1 + $0x8a0] ss:$16 sps:$4 sm:$0xff]   ;;  %v8837_v32 = vld [vmem:[%s12721_s1 + $0x8a8] ss:$16 sps:$4 sm:$0xff]  }
  0xdb   :  { %5143 = vmatpush1.bf16.msra.mxu0 %v8741_v33  ;;  %5702 = vmatpush1.bf16.msra.mxu1 %v8744_v34  ;;  %v8842_v33 = vld [vmem:[%s12721_s1 + $0x8c4] ss:$16 sps:$4 sm:$0xff]   ;;  %v8845_v34 = vld [vmem:[%s12721_s1 + $0x8cc] ss:$16 sps:$4 sm:$0xff]  }
  0xdc   :  { %5144 = vmatprep.subr.bf16.mxu0 %v8749_v35  ;;  %5703 = vmatprep.subr.bf16.mxu1 %v8752_v36  ;;  %v8840_v35 = vld [vmem:[%s12721_s1 + $0x8c0] ss:$16 sps:$4 sm:$0xff]   ;;  %v8843_v36 = vld [vmem:[%s12721_s1 + $0x8c8] ss:$16 sps:$4 sm:$0xff]  }
  0xdf   :  { %5145 = vmatpush1.bf16.msra.mxu0 %v8747_v37  ;;  %5704 = vmatpush1.bf16.msra.mxu1 %v8750_v38  ;;  %v8848_v37 = vld [vmem:[%s12721_s1 + $0x8e4] ss:$16 sps:$4 sm:$0xff]   ;;  %v8851_v38 = vld [vmem:[%s12721_s1 + $0x8ec] ss:$16 sps:$4 sm:$0xff]  }
  0xe0   :  { %5146 = vmatprep.subr.bf16.mxu0 %v8755_v39  ;;  %5705 = vmatprep.subr.bf16.mxu1 %v8758_v40  ;;  %v8846_v39 = vld [vmem:[%s12721_s1 + $0x8e0] ss:$16 sps:$4 sm:$0xff]   ;;  %v8849_v40 = vld [vmem:[%s12721_s1 + $0x8e8] ss:$16 sps:$4 sm:$0xff]  }
  0xe3   :  { %5147 = vmatpush1.bf16.msra.mxu0 %v8753_v41  ;;  %5706 = vmatpush1.bf16.msra.mxu1 %v8756_v42  ;;  %v8854_v41 = vld [vmem:[%s12721_s1 + $0x904] ss:$16 sps:$4 sm:$0xff]   ;;  %v8857_v42 = vld [vmem:[%s12721_s1 + $0x90c] ss:$16 sps:$4 sm:$0xff]  }
  0xe4   :  { %5148 = vmatprep.subr.bf16.mxu0 %v8761_v43  ;;  %5707 = vmatprep.subr.bf16.mxu1 %v8764_v44  ;;  %v8852_v43 = vld [vmem:[%s12721_s1 + $0x900] ss:$16 sps:$4 sm:$0xff]   ;;  %v8855_v44 = vld [vmem:[%s12721_s1 + $0x908] ss:$16 sps:$4 sm:$0xff]  }
  0xe7   :  { %5149 = vmatpush1.bf16.msra.mxu0 %v8759_v45  ;;  %5708 = vmatpush1.bf16.msra.mxu1 %v8762_v46  ;;  %v8860_v45 = vld [vmem:[%s12721_s1 + $0x924] ss:$16 sps:$4 sm:$0xff]   ;;  %v8863_v46 = vld [vmem:[%s12721_s1 + $0x92c] ss:$16 sps:$4 sm:$0xff]  }
  0xe8   :  { %5150 = vmatprep.subr.bf16.mxu0 %v8767_v47  ;;  %5709 = vmatprep.subr.bf16.mxu1 %v8770_v48  ;;  %v8858_v47 = vld [vmem:[%s12721_s1 + $0x920] ss:$16 sps:$4 sm:$0xff]   ;;  %v8861_v48 = vld [vmem:[%s12721_s1 + $0x928] ss:$16 sps:$4 sm:$0xff]  }
  0xeb   :  { %5151 = vmatpush1.bf16.msra.mxu0 %v8765_v49  ;;  %5710 = vmatpush1.bf16.msra.mxu1 %v8768_v50  ;;  %v8866_v49 = vld [vmem:[%s12721_s1 + $0x944] ss:$16 sps:$4 sm:$0xff]   ;;  %v8869_v50 = vld [vmem:[%s12721_s1 + $0x94c] ss:$16 sps:$4 sm:$0xff]  }
  0xec   :  { %5152 = vmatprep.subr.bf16.mxu0 %v8773_v51  ;;  %5711 = vmatprep.subr.bf16.mxu1 %v8776_v52  ;;  %v8864_v51 = vld [vmem:[%s12721_s1 + $0x940] ss:$16 sps:$4 sm:$0xff]   ;;  %v8867_v52 = vld [vmem:[%s12721_s1 + $0x948] ss:$16 sps:$4 sm:$0xff]  }
  0xef   :  { %5153 = vmatpush1.bf16.msra.mxu0 %v8771_v53  ;;  %5712 = vmatpush1.bf16.msra.mxu1 %v8774_v54  ;;  %v8872_v53 = vld [vmem:[%s12721_s1 + $0x964] ss:$16 sps:$4 sm:$0xff]   ;;  %v8875_v54 = vld [vmem:[%s12721_s1 + $0x96c] ss:$16 sps:$4 sm:$0xff]  }
  0xf0   :  { %5154 = vmatprep.subr.bf16.mxu0 %v8779_v55  ;;  %5713 = vmatprep.subr.bf16.mxu1 %v8782_v56  ;;  %v8870_v55 = vld [vmem:[%s12721_s1 + $0x960] ss:$16 sps:$4 sm:$0xff]   ;;  %v8873_v56 = vld [vmem:[%s12721_s1 + $0x968] ss:$16 sps:$4 sm:$0xff]  }
  0xf3   :  { %5155 = vmatpush1.bf16.msra.mxu0 %v8777_v57  ;;  %5714 = vmatpush1.bf16.msra.mxu1 %v8780_v58  ;;  %v8878_v57 = vld [vmem:[%s12721_s1 + $0x984] ss:$16 sps:$4 sm:$0xff]   ;;  %v8881_v58 = vld [vmem:[%s12721_s1 + $0x98c] ss:$16 sps:$4 sm:$0xff]  }
  0xf4   :  { %5156 = vmatprep.subr.bf16.mxu0 %v8785_v59  ;;  %5715 = vmatprep.subr.bf16.mxu1 %v8788_v60  ;;  %v8876_v59 = vld [vmem:[%s12721_s1 + $0x980] ss:$16 sps:$4 sm:$0xff]   ;;  %v8879_v60 = vld [vmem:[%s12721_s1 + $0x988] ss:$16 sps:$4 sm:$0xff]  }
  0xf7   :  { %5157 = vmatpush1.bf16.msra.mxu0 %v8783_v61  ;;  %5716 = vmatpush1.bf16.msra.mxu1 %v8786_v62  ;;  %v8884_v61 = vld [vmem:[%s12721_s1 + $0x9a4] ss:$16 sps:$4 sm:$0xff]   ;;  %v8887_v62 = vld [vmem:[%s12721_s1 + $0x9ac] ss:$16 sps:$4 sm:$0xff]  }
  0xf8   :  { %5158 = vmatprep.subr.bf16.mxu0 %v8791_v63  ;;  %5717 = vmatprep.subr.bf16.mxu1 %v8794_v0  ;;  %v8882_v63 = vld [vmem:[%s12721_s1 + $0x9a0] ss:$16 sps:$4 sm:$0xff]   ;;  %v8885_v0 = vld [vmem:[%s12721_s1 + $0x9a8] ss:$16 sps:$4 sm:$0xff]  }
  0xfb   :  { %5159 = vmatpush1.bf16.msra.mxu0 %v8789_v1  ;;  %5718 = vmatpush1.bf16.msra.mxu1 %v8792_v2  ;;  %v8890_v1 = vld [vmem:[%s12721_s1 + $0x9c4] ss:$16 sps:$4 sm:$0xff]   ;;  %v8893_v2 = vld [vmem:[%s12721_s1 + $0x9cc] ss:$16 sps:$4 sm:$0xff]  }
  0xfc   :  { %5160 = vmatprep.subr.bf16.mxu0 %v8797_v3  ;;  %5719 = vmatprep.subr.bf16.mxu1 %v8800_v4  ;;  %v8888_v3 = vld [vmem:[%s12721_s1 + $0x9c0] ss:$16 sps:$4 sm:$0xff]   ;;  %v8891_v4 = vld [vmem:[%s12721_s1 + $0x9c8] ss:$16 sps:$4 sm:$0xff]  }
  0xff   :  { %5161 = vmatpush1.bf16.msra.mxu0 %v8795_v5  ;;  %5720 = vmatpush1.bf16.msra.mxu1 %v8798_v6  ;;  %v8896_v5 = vld [vmem:[%s12721_s1 + $0x9e4] ss:$16 sps:$4 sm:$0xff]   ;;  %v8899_v6 = vld [vmem:[%s12721_s1 + $0x9ec] ss:$16 sps:$4 sm:$0xff]  }
 0x100   :  { %5173 = vmatprep.subr.bf16.mxu0 %v8806_v7  ;;  %5732 = vmatprep.subr.bf16.mxu1 %v8809_v8  ;;  %v8894_v7 = vld [vmem:[%s12721_s1 + $0x9e0] ss:$16 sps:$4 sm:$0xff]   ;;  %v8897_v8 = vld [vmem:[%s12721_s1 + $0x9e8] ss:$16 sps:$4 sm:$0xff]  }
 0x102   :  { %5163 = vmatmul.mubr.bf16.vlgmr.msra.gmra.mrb[0].mxu0 %v8801_v9  ;;  %5722 = vmatmul.mubr.bf16.vlgmr.msra.gmra.mrb[0].mxu1 %v8801_v9  ;;  %v8900_v9 = vld [vmem:[%s12722_s0 + $0x20] ss:$100 sps:$4 sm:$0xff]  }
 0x103   :  { %5174 = vmatpush1.bf16.msra.mxu0 %v8804_v10  ;;  %5733 = vmatpush1.bf16.msra.mxu1 %v8807_v11  ;;  %v8905_v10 = vld [vmem:[%s12721_s1 + $0xa04] ss:$16 sps:$4 sm:$0xff]   ;;  %v8908_v11 = vld [vmem:[%s12721_s1 + $0xa0c] ss:$16 sps:$4 sm:$0xff]  }
 0x104   :  { %5175 = vmatprep.subr.bf16.mxu0 %v8812_v12  ;;  %5734 = vmatprep.subr.bf16.mxu1 %v8815_v13  ;;  %v8903_v12 = vld [vmem:[%s12721_s1 + $0xa00] ss:$16 sps:$4 sm:$0xff]   ;;  %v8906_v13 = vld [vmem:[%s12721_s1 + $0xa08] ss:$16 sps:$4 sm:$0xff]  }
 0x105   :  { %5205 = vmatprep.mubr.bf16.mxu0 %v8902_v14  ;;  %5764 = vmatprep.mubr.bf16.mxu1 %v8902_v14  ;;  %v8911_v14 = vld [vmem:[%s12721_s1 + $0xa24] ss:$16 sps:$4 sm:$0xff]  }
 0x107   :  { %5176 = vmatpush1.bf16.msra.mxu0 %v8810_v15  ;;  %5735 = vmatpush1.bf16.msra.mxu1 %v8813_v16  ;;  %v8914_v15 = vld [vmem:[%s12721_s1 + $0xa2c] ss:$16 sps:$4 sm:$0xff]  }
 0x108   :  { %5177 = vmatprep.subr.bf16.mxu0 %v8818_v17  ;;  %5736 = vmatprep.subr.bf16.mxu1 %v8821_v18  ;;  %v9001_v16 = vld [vmem:[%s12722_s0 + $0x2c] ss:$100 sps:$4 sm:$0xff]   ;;  %v8912_v18 = vld [vmem:[%s12721_s1 + $0xa28] ss:$16 sps:$4 sm:$0xff]  }
 0x109   :  { %v8909_v17 = vld [vmem:[%s12721_s1 + $0xa20] ss:$16 sps:$4 sm:$0xff]  }
 0x10b   :  { %5178 = vmatpush1.bf16.msra.mxu0 %v8816_v19  ;;  %5737 = vmatpush1.bf16.msra.mxu1 %v8819_v20  ;;  %v8917_v19 = vld [vmem:[%s12721_s1 + $0xa44] ss:$16 sps:$4 sm:$0xff]   ;;  %v8920_v20 = vld [vmem:[%s12721_s1 + $0xa4c] ss:$16 sps:$4 sm:$0xff]  }
 0x10c   :  { %5179 = vmatprep.subr.bf16.mxu0 %v8824_v21  ;;  %5738 = vmatprep.subr.bf16.mxu1 %v8827_v22  ;;  %v8915_v21 = vld [vmem:[%s12721_s1 + $0xa40] ss:$16 sps:$4 sm:$0xff]   ;;  %v8918_v22 = vld [vmem:[%s12721_s1 + $0xa48] ss:$16 sps:$4 sm:$0xff]  }
 0x10f   :  { %5180 = vmatpush1.bf16.msra.mxu0 %v8822_v23  ;;  %5739 = vmatpush1.bf16.msra.mxu1 %v8825_v24  ;;  %v8923_v23 = vld [vmem:[%s12721_s1 + $0xa64] ss:$16 sps:$4 sm:$0xff]   ;;  %v8926_v24 = vld [vmem:[%s12721_s1 + $0xa6c] ss:$16 sps:$4 sm:$0xff]  }
 0x110   :  { %5181 = vmatprep.subr.bf16.mxu0 %v8830_v25  ;;  %5740 = vmatprep.subr.bf16.mxu1 %v8833_v26  ;;  %v8921_v25 = vld [vmem:[%s12721_s1 + $0xa60] ss:$16 sps:$4 sm:$0xff]   ;;  %v8924_v26 = vld [vmem:[%s12721_s1 + $0xa68] ss:$16 sps:$4 sm:$0xff]  }
 0x113   :  { %5182 = vmatpush1.bf16.msra.mxu0 %v8828_v27  ;;  %5741 = vmatpush1.bf16.msra.mxu1 %v8831_v28  ;;  %v8929_v27 = vld [vmem:[%s12721_s1 + $0xa84] ss:$16 sps:$4 sm:$0xff]   ;;  %v8932_v28 = vld [vmem:[%s12721_s1 + $0xa8c] ss:$16 sps:$4 sm:$0xff]  }
 0x114   :  { %5183 = vmatprep.subr.bf16.mxu0 %v8836_v29  ;;  %5742 = vmatprep.subr.bf16.mxu1 %v8839_v30  ;;  %v8927_v29 = vld [vmem:[%s12721_s1 + $0xa80] ss:$16 sps:$4 sm:$0xff]   ;;  %v8930_v30 = vld [vmem:[%s12721_s1 + $0xa88] ss:$16 sps:$4 sm:$0xff]  }
 0x117   :  { %5184 = vmatpush1.bf16.msra.mxu0 %v8834_v31  ;;  %5743 = vmatpush1.bf16.msra.mxu1 %v8837_v32  ;;  %v8935_v31 = vld [vmem:[%s12721_s1 + $0xaa4] ss:$16 sps:$4 sm:$0xff]   ;;  %v8938_v32 = vld [vmem:[%s12721_s1 + $0xaac] ss:$16 sps:$4 sm:$0xff]  }
 0x118   :  { %5185 = vmatprep.subr.bf16.mxu0 %v8842_v33  ;;  %5744 = vmatprep.subr.bf16.mxu1 %v8845_v34  ;;  %v8933_v33 = vld [vmem:[%s12721_s1 + $0xaa0] ss:$16 sps:$4 sm:$0xff]   ;;  %v8936_v34 = vld [vmem:[%s12721_s1 + $0xaa8] ss:$16 sps:$4 sm:$0xff]  }
 0x11b   :  { %5186 = vmatpush1.bf16.msra.mxu0 %v8840_v35  ;;  %5745 = vmatpush1.bf16.msra.mxu1 %v8843_v36  ;;  %v8941_v35 = vld [vmem:[%s12721_s1 + $0xac4] ss:$16 sps:$4 sm:$0xff]   ;;  %v8944_v36 = vld [vmem:[%s12721_s1 + $0xacc] ss:$16 sps:$4 sm:$0xff]  }
 0x11c   :  { %5187 = vmatprep.subr.bf16.mxu0 %v8848_v37  ;;  %5746 = vmatprep.subr.bf16.mxu1 %v8851_v38  ;;  %v8939_v37 = vld [vmem:[%s12721_s1 + $0xac0] ss:$16 sps:$4 sm:$0xff]   ;;  %v8942_v38 = vld [vmem:[%s12721_s1 + $0xac8] ss:$16 sps:$4 sm:$0xff]  }
 0x11f   :  { %5188 = vmatpush1.bf16.msra.mxu0 %v8846_v39  ;;  %5747 = vmatpush1.bf16.msra.mxu1 %v8849_v40  ;;  %v8947_v39 = vld [vmem:[%s12721_s1 + $0xae4] ss:$16 sps:$4 sm:$0xff]   ;;  %v8950_v40 = vld [vmem:[%s12721_s1 + $0xaec] ss:$16 sps:$4 sm:$0xff]  }
 0x120   :  { %5189 = vmatprep.subr.bf16.mxu0 %v8854_v41  ;;  %5748 = vmatprep.subr.bf16.mxu1 %v8857_v42  ;;  %v8945_v41 = vld [vmem:[%s12721_s1 + $0xae0] ss:$16 sps:$4 sm:$0xff]   ;;  %v8948_v42 = vld [vmem:[%s12721_s1 + $0xae8] ss:$16 sps:$4 sm:$0xff]  }
 0x123   :  { %5190 = vmatpush1.bf16.msra.mxu0 %v8852_v43  ;;  %5749 = vmatpush1.bf16.msra.mxu1 %v8855_v44  ;;  %v8953_v43 = vld [vmem:[%s12721_s1 + $0xb04] ss:$16 sps:$4 sm:$0xff]   ;;  %v8956_v44 = vld [vmem:[%s12721_s1 + $0xb0c] ss:$16 sps:$4 sm:$0xff]  }
 0x124   :  { %5191 = vmatprep.subr.bf16.mxu0 %v8860_v45  ;;  %5750 = vmatprep.subr.bf16.mxu1 %v8863_v46  ;;  %v8951_v45 = vld [vmem:[%s12721_s1 + $0xb00] ss:$16 sps:$4 sm:$0xff]   ;;  %v8954_v46 = vld [vmem:[%s12721_s1 + $0xb08] ss:$16 sps:$4 sm:$0xff]  }
 0x127   :  { %5192 = vmatpush1.bf16.msra.mxu0 %v8858_v47  ;;  %5751 = vmatpush1.bf16.msra.mxu1 %v8861_v48  ;;  %v8959_v47 = vld [vmem:[%s12721_s1 + $0xb24] ss:$16 sps:$4 sm:$0xff]   ;;  %v8962_v48 = vld [vmem:[%s12721_s1 + $0xb2c] ss:$16 sps:$4 sm:$0xff]  }
 0x128   :  { %5193 = vmatprep.subr.bf16.mxu0 %v8866_v49  ;;  %5752 = vmatprep.subr.bf16.mxu1 %v8869_v50  ;;  %v8957_v49 = vld [vmem:[%s12721_s1 + $0xb20] ss:$16 sps:$4 sm:$0xff]   ;;  %v8960_v50 = vld [vmem:[%s12721_s1 + $0xb28] ss:$16 sps:$4 sm:$0xff]  }
 0x12b   :  { %5194 = vmatpush1.bf16.msra.mxu0 %v8864_v51  ;;  %5753 = vmatpush1.bf16.msra.mxu1 %v8867_v52  ;;  %v8965_v51 = vld [vmem:[%s12721_s1 + $0xb44] ss:$16 sps:$4 sm:$0xff]   ;;  %v8968_v52 = vld [vmem:[%s12721_s1 + $0xb4c] ss:$16 sps:$4 sm:$0xff]  }
 0x12c   :  { %5195 = vmatprep.subr.bf16.mxu0 %v8872_v53  ;;  %5754 = vmatprep.subr.bf16.mxu1 %v8875_v54  ;;  %v8963_v53 = vld [vmem:[%s12721_s1 + $0xb40] ss:$16 sps:$4 sm:$0xff]   ;;  %v8966_v54 = vld [vmem:[%s12721_s1 + $0xb48] ss:$16 sps:$4 sm:$0xff]  }
 0x12f   :  { %5196 = vmatpush1.bf16.msra.mxu0 %v8870_v55  ;;  %5755 = vmatpush1.bf16.msra.mxu1 %v8873_v56  ;;  %v8971_v55 = vld [vmem:[%s12721_s1 + $0xb64] ss:$16 sps:$4 sm:$0xff]   ;;  %v8974_v56 = vld [vmem:[%s12721_s1 + $0xb6c] ss:$16 sps:$4 sm:$0xff]  }
 0x130   :  { %5197 = vmatprep.subr.bf16.mxu0 %v8878_v57  ;;  %5756 = vmatprep.subr.bf16.mxu1 %v8881_v58  ;;  %v8969_v57 = vld [vmem:[%s12721_s1 + $0xb60] ss:$16 sps:$4 sm:$0xff]   ;;  %v8972_v58 = vld [vmem:[%s12721_s1 + $0xb68] ss:$16 sps:$4 sm:$0xff]  }
 0x133   :  { %5198 = vmatpush1.bf16.msra.mxu0 %v8876_v59  ;;  %5757 = vmatpush1.bf16.msra.mxu1 %v8879_v60  ;;  %v8977_v59 = vld [vmem:[%s12721_s1 + $0xb84] ss:$16 sps:$4 sm:$0xff]   ;;  %v8980_v60 = vld [vmem:[%s12721_s1 + $0xb8c] ss:$16 sps:$4 sm:$0xff]  }
 0x134   :  { %5199 = vmatprep.subr.bf16.mxu0 %v8884_v61  ;;  %5758 = vmatprep.subr.bf16.mxu1 %v8887_v62  ;;  %v8975_v61 = vld [vmem:[%s12721_s1 + $0xb80] ss:$16 sps:$4 sm:$0xff]   ;;  %v8978_v62 = vld [vmem:[%s12721_s1 + $0xb88] ss:$16 sps:$4 sm:$0xff]  }
 0x137   :  { %5200 = vmatpush1.bf16.msra.mxu0 %v8882_v63  ;;  %5759 = vmatpush1.bf16.msra.mxu1 %v8885_v0  ;;  %v8983_v63 = vld [vmem:[%s12721_s1 + $0xba4] ss:$16 sps:$4 sm:$0xff]   ;;  %v8986_v0 = vld [vmem:[%s12721_s1 + $0xbac] ss:$16 sps:$4 sm:$0xff]  }
 0x138   :  { %5201 = vmatprep.subr.bf16.mxu0 %v8890_v1  ;;  %5760 = vmatprep.subr.bf16.mxu1 %v8893_v2  ;;  %v8981_v1 = vld [vmem:[%s12721_s1 + $0xba0] ss:$16 sps:$4 sm:$0xff]   ;;  %v8984_v2 = vld [vmem:[%s12721_s1 + $0xba8] ss:$16 sps:$4 sm:$0xff]  }
 0x13b   :  { %5202 = vmatpush1.bf16.msra.mxu0 %v8888_v3  ;;  %5761 = vmatpush1.bf16.msra.mxu1 %v8891_v4  ;;  %v8989_v3 = vld [vmem:[%s12721_s1 + $0xbc4] ss:$16 sps:$4 sm:$0xff]   ;;  %v8992_v4 = vld [vmem:[%s12721_s1 + $0xbcc] ss:$16 sps:$4 sm:$0xff]  }
 0x13c   :  { %5203 = vmatprep.subr.bf16.mxu0 %v8896_v5  ;;  %5762 = vmatprep.subr.bf16.mxu1 %v8899_v6  ;;  %v8987_v5 = vld [vmem:[%s12721_s1 + $0xbc0] ss:$16 sps:$4 sm:$0xff]   ;;  %v8990_v6 = vld [vmem:[%s12721_s1 + $0xbc8] ss:$16 sps:$4 sm:$0xff]  }
 0x13f   :  { %5204 = vmatpush1.bf16.msra.mxu0 %v8894_v7  ;;  %5763 = vmatpush1.bf16.msra.mxu1 %v8897_v8  ;;  %v8995_v7 = vld [vmem:[%s12721_s1 + $0xbe4] ss:$16 sps:$4 sm:$0xff]   ;;  %v8998_v8 = vld [vmem:[%s12721_s1 + $0xbec] ss:$16 sps:$4 sm:$0xff]  }
 0x140   :  { %5216 = vmatprep.subr.bf16.mxu0 %v8905_v10  ;;  %5775 = vmatprep.subr.bf16.mxu1 %v8908_v11  ;;  %v8996_v10 = vld [vmem:[%s12721_s1 + $0xbe8] ss:$16 sps:$4 sm:$0xff]  }
 0x141   :  { %v8999_v11 = vld [vmem:[%s12722_s0 + $0x28] ss:$100 sps:$4 sm:$0xff]  }
 0x142   :  { %5206 = vmatmul.mubr.bf16.vlgmr.msra.gmra.mrb[0].mxu0 %v8900_v9  ;;  %5765 = vmatmul.mubr.bf16.vlgmr.msra.gmra.mrb[0].mxu1 %v8900_v9  ;;  %v8993_v9 = vld [vmem:[%s12721_s1 + $0xbe0] ss:$16 sps:$4 sm:$0xff]  }
 0x143   :  { %5217 = vmatpush1.bf16.msra.mxu0 %v8903_v12  ;;  %5776 = vmatpush1.bf16.msra.mxu1 %v8906_v13  ;;  %v9004_v12 = vld [vmem:[%s12721_s1 + $0xc04] ss:$16 sps:$4 sm:$0xff]   ;;  %v9007_v13 = vld [vmem:[%s12721_s1 + $0xc0c] ss:$16 sps:$4 sm:$0xff]  }
 0x144   :  { %5218 = vmatprep.subr.bf16.mxu0 %v8911_v14  ;;  %5777 = vmatprep.subr.bf16.mxu1 %v8914_v15  ;;  %v9002_v14 = vld [vmem:[%s12721_s1 + $0xc00] ss:$16 sps:$4 sm:$0xff]   ;;  %v9005_v15 = vld [vmem:[%s12721_s1 + $0xc08] ss:$16 sps:$4 sm:$0xff]  }
 0x145   :  { %5248 = vmatprep.mubr.bf16.mxu0 %v9001_v16  ;;  %5807 = vmatprep.mubr.bf16.mxu1 %v9001_v16  ;;  %v9010_v16 = vld [vmem:[%s12721_s1 + $0xc24] ss:$16 sps:$4 sm:$0xff]  }
 0x147   :  { %5219 = vmatpush1.bf16.msra.mxu0 %v8909_v17  ;;  %5778 = vmatpush1.bf16.msra.mxu1 %v8912_v18  ;;  %v9013_v17 = vld [vmem:[%s12721_s1 + $0xc2c] ss:$16 sps:$4 sm:$0xff]   ;;  %v9100_v18 = vld [vmem:[%s12722_s0 + $0x34] ss:$100 sps:$4 sm:$0xff]  }
 0x148   :  { %5220 = vmatprep.subr.bf16.mxu0 %v8917_v19  ;;  %5779 = vmatprep.subr.bf16.mxu1 %v8920_v20  ;;  %v9008_v19 = vld [vmem:[%s12721_s1 + $0xc20] ss:$16 sps:$4 sm:$0xff]   ;;  %v9011_v20 = vld [vmem:[%s12721_s1 + $0xc28] ss:$16 sps:$4 sm:$0xff]  }
 0x14b   :  { %5221 = vmatpush1.bf16.msra.mxu0 %v8915_v21  ;;  %5780 = vmatpush1.bf16.msra.mxu1 %v8918_v22  ;;  %v9016_v21 = vld [vmem:[%s12721_s1 + $0xc44] ss:$16 sps:$4 sm:$0xff]   ;;  %v9019_v22 = vld [vmem:[%s12721_s1 + $0xc4c] ss:$16 sps:$4 sm:$0xff]  }
 0x14c   :  { %5222 = vmatprep.subr.bf16.mxu0 %v8923_v23  ;;  %5781 = vmatprep.subr.bf16.mxu1 %v8926_v24  ;;  %v9014_v23 = vld [vmem:[%s12721_s1 + $0xc40] ss:$16 sps:$4 sm:$0xff]   ;;  %v9017_v24 = vld [vmem:[%s12721_s1 + $0xc48] ss:$16 sps:$4 sm:$0xff]  }
 0x14f   :  { %5223 = vmatpush1.bf16.msra.mxu0 %v8921_v25  ;;  %5782 = vmatpush1.bf16.msra.mxu1 %v8924_v26  ;;  %v9022_v25 = vld [vmem:[%s12721_s1 + $0xc64] ss:$16 sps:$4 sm:$0xff]   ;;  %v9025_v26 = vld [vmem:[%s12721_s1 + $0xc6c] ss:$16 sps:$4 sm:$0xff]  }
 0x150   :  { %5224 = vmatprep.subr.bf16.mxu0 %v8929_v27  ;;  %5783 = vmatprep.subr.bf16.mxu1 %v8932_v28  ;;  %v9020_v27 = vld [vmem:[%s12721_s1 + $0xc60] ss:$16 sps:$4 sm:$0xff]   ;;  %v9023_v28 = vld [vmem:[%s12721_s1 + $0xc68] ss:$16 sps:$4 sm:$0xff]  }
 0x153   :  { %5225 = vmatpush1.bf16.msra.mxu0 %v8927_v29  ;;  %5784 = vmatpush1.bf16.msra.mxu1 %v8930_v30  ;;  %v9028_v29 = vld [vmem:[%s12721_s1 + $0xc84] ss:$16 sps:$4 sm:$0xff]   ;;  %v9031_v30 = vld [vmem:[%s12721_s1 + $0xc8c] ss:$16 sps:$4 sm:$0xff]  }
 0x154   :  { %5226 = vmatprep.subr.bf16.mxu0 %v8935_v31  ;;  %5785 = vmatprep.subr.bf16.mxu1 %v8938_v32  ;;  %v9026_v31 = vld [vmem:[%s12721_s1 + $0xc80] ss:$16 sps:$4 sm:$0xff]   ;;  %v9029_v32 = vld [vmem:[%s12721_s1 + $0xc88] ss:$16 sps:$4 sm:$0xff]  }
 0x157   :  { %5227 = vmatpush1.bf16.msra.mxu0 %v8933_v33  ;;  %5786 = vmatpush1.bf16.msra.mxu1 %v8936_v34  ;;  %v9034_v33 = vld [vmem:[%s12721_s1 + $0xca4] ss:$16 sps:$4 sm:$0xff]   ;;  %v9037_v34 = vld [vmem:[%s12721_s1 + $0xcac] ss:$16 sps:$4 sm:$0xff]  }
 0x158   :  { %5228 = vmatprep.subr.bf16.mxu0 %v8941_v35  ;;  %5787 = vmatprep.subr.bf16.mxu1 %v8944_v36  ;;  %v9032_v35 = vld [vmem:[%s12721_s1 + $0xca0] ss:$16 sps:$4 sm:$0xff]   ;;  %v9035_v36 = vld [vmem:[%s12721_s1 + $0xca8] ss:$16 sps:$4 sm:$0xff]  }
 0x15b   :  { %5229 = vmatpush1.bf16.msra.mxu0 %v8939_v37  ;;  %5788 = vmatpush1.bf16.msra.mxu1 %v8942_v38  ;;  %v9040_v37 = vld [vmem:[%s12721_s1 + $0xcc4] ss:$16 sps:$4 sm:$0xff]   ;;  %v9043_v38 = vld [vmem:[%s12721_s1 + $0xccc] ss:$16 sps:$4 sm:$0xff]  }
 0x15c   :  { %5230 = vmatprep.subr.bf16.mxu0 %v8947_v39  ;;  %5789 = vmatprep.subr.bf16.mxu1 %v8950_v40  ;;  %v9038_v39 = vld [vmem:[%s12721_s1 + $0xcc0] ss:$16 sps:$4 sm:$0xff]   ;;  %v9041_v40 = vld [vmem:[%s12721_s1 + $0xcc8] ss:$16 sps:$4 sm:$0xff]  }
 0x15f   :  { %5231 = vmatpush1.bf16.msra.mxu0 %v8945_v41  ;;  %5790 = vmatpush1.bf16.msra.mxu1 %v8948_v42  ;;  %v9046_v41 = vld [vmem:[%s12721_s1 + $0xce4] ss:$16 sps:$4 sm:$0xff]   ;;  %v9049_v42 = vld [vmem:[%s12721_s1 + $0xcec] ss:$16 sps:$4 sm:$0xff]  }
 0x160   :  { %5232 = vmatprep.subr.bf16.mxu0 %v8953_v43  ;;  %5791 = vmatprep.subr.bf16.mxu1 %v8956_v44  ;;  %v9044_v43 = vld [vmem:[%s12721_s1 + $0xce0] ss:$16 sps:$4 sm:$0xff]   ;;  %v9047_v44 = vld [vmem:[%s12721_s1 + $0xce8] ss:$16 sps:$4 sm:$0xff]  }
 0x163   :  { %5233 = vmatpush1.bf16.msra.mxu0 %v8951_v45  ;;  %5792 = vmatpush1.bf16.msra.mxu1 %v8954_v46  ;;  %v9052_v45 = vld [vmem:[%s12721_s1 + $0xd04] ss:$16 sps:$4 sm:$0xff]   ;;  %v9055_v46 = vld [vmem:[%s12721_s1 + $0xd0c] ss:$16 sps:$4 sm:$0xff]  }
 0x164   :  { %5234 = vmatprep.subr.bf16.mxu0 %v8959_v47  ;;  %5793 = vmatprep.subr.bf16.mxu1 %v8962_v48  ;;  %v9050_v47 = vld [vmem:[%s12721_s1 + $0xd00] ss:$16 sps:$4 sm:$0xff]   ;;  %v9053_v48 = vld [vmem:[%s12721_s1 + $0xd08] ss:$16 sps:$4 sm:$0xff]  }
 0x167   :  { %5235 = vmatpush1.bf16.msra.mxu0 %v8957_v49  ;;  %5794 = vmatpush1.bf16.msra.mxu1 %v8960_v50  ;;  %v9058_v49 = vld [vmem:[%s12721_s1 + $0xd24] ss:$16 sps:$4 sm:$0xff]   ;;  %v9061_v50 = vld [vmem:[%s12721_s1 + $0xd2c] ss:$16 sps:$4 sm:$0xff]  }
 0x168   :  { %5236 = vmatprep.subr.bf16.mxu0 %v8965_v51  ;;  %5795 = vmatprep.subr.bf16.mxu1 %v8968_v52  ;;  %v9056_v51 = vld [vmem:[%s12721_s1 + $0xd20] ss:$16 sps:$4 sm:$0xff]   ;;  %v9059_v52 = vld [vmem:[%s12721_s1 + $0xd28] ss:$16 sps:$4 sm:$0xff]  }
 0x16b   :  { %5237 = vmatpush1.bf16.msra.mxu0 %v8963_v53  ;;  %5796 = vmatpush1.bf16.msra.mxu1 %v8966_v54  ;;  %v9064_v53 = vld [vmem:[%s12721_s1 + $0xd44] ss:$16 sps:$4 sm:$0xff]   ;;  %v9067_v54 = vld [vmem:[%s12721_s1 + $0xd4c] ss:$16 sps:$4 sm:$0xff]  }
 0x16c   :  { %5238 = vmatprep.subr.bf16.mxu0 %v8971_v55  ;;  %5797 = vmatprep.subr.bf16.mxu1 %v8974_v56  ;;  %v9062_v55 = vld [vmem:[%s12721_s1 + $0xd40] ss:$16 sps:$4 sm:$0xff]   ;;  %v9065_v56 = vld [vmem:[%s12721_s1 + $0xd48] ss:$16 sps:$4 sm:$0xff]  }
 0x16f   :  { %5239 = vmatpush1.bf16.msra.mxu0 %v8969_v57  ;;  %5798 = vmatpush1.bf16.msra.mxu1 %v8972_v58  ;;  %v9070_v57 = vld [vmem:[%s12721_s1 + $0xd64] ss:$16 sps:$4 sm:$0xff]   ;;  %v9073_v58 = vld [vmem:[%s12721_s1 + $0xd6c] ss:$16 sps:$4 sm:$0xff]  }
 0x170   :  { %5240 = vmatprep.subr.bf16.mxu0 %v8977_v59  ;;  %5799 = vmatprep.subr.bf16.mxu1 %v8980_v60  ;;  %v9068_v59 = vld [vmem:[%s12721_s1 + $0xd60] ss:$16 sps:$4 sm:$0xff]   ;;  %v9071_v60 = vld [vmem:[%s12721_s1 + $0xd68] ss:$16 sps:$4 sm:$0xff]  }
 0x173   :  { %5241 = vmatpush1.bf16.msra.mxu0 %v8975_v61  ;;  %5800 = vmatpush1.bf16.msra.mxu1 %v8978_v62  ;;  %v9076_v61 = vld [vmem:[%s12721_s1 + $0xd84] ss:$16 sps:$4 sm:$0xff]   ;;  %v9079_v62 = vld [vmem:[%s12721_s1 + $0xd8c] ss:$16 sps:$4 sm:$0xff]  }
 0x174   :  { %5242 = vmatprep.subr.bf16.mxu0 %v8983_v63  ;;  %5801 = vmatprep.subr.bf16.mxu1 %v8986_v0  ;;  %v9074_v63 = vld [vmem:[%s12721_s1 + $0xd80] ss:$16 sps:$4 sm:$0xff]   ;;  %v9077_v0 = vld [vmem:[%s12721_s1 + $0xd88] ss:$16 sps:$4 sm:$0xff]  }
 0x177   :  { %5243 = vmatpush1.bf16.msra.mxu0 %v8981_v1  ;;  %5802 = vmatpush1.bf16.msra.mxu1 %v8984_v2  ;;  %v9082_v1 = vld [vmem:[%s12721_s1 + $0xda4] ss:$16 sps:$4 sm:$0xff]   ;;  %v9085_v2 = vld [vmem:[%s12721_s1 + $0xdac] ss:$16 sps:$4 sm:$0xff]  }
 0x178   :  { %5244 = vmatprep.subr.bf16.mxu0 %v8989_v3  ;;  %5803 = vmatprep.subr.bf16.mxu1 %v8992_v4  ;;  %v9080_v3 = vld [vmem:[%s12721_s1 + $0xda0] ss:$16 sps:$4 sm:$0xff]   ;;  %v9083_v4 = vld [vmem:[%s12721_s1 + $0xda8] ss:$16 sps:$4 sm:$0xff]  }
 0x17b   :  { %5245 = vmatpush1.bf16.msra.mxu0 %v8987_v5  ;;  %5804 = vmatpush1.bf16.msra.mxu1 %v8990_v6  ;;  %v9088_v5 = vld [vmem:[%s12721_s1 + $0xdc4] ss:$16 sps:$4 sm:$0xff]   ;;  %v9091_v6 = vld [vmem:[%s12721_s1 + $0xdcc] ss:$16 sps:$4 sm:$0xff]  }
 0x17c   :  { %5246 = vmatprep.subr.bf16.mxu0 %v8995_v7  ;;  %5805 = vmatprep.subr.bf16.mxu1 %v8998_v8  ;;  %v9086_v7 = vld [vmem:[%s12721_s1 + $0xdc0] ss:$16 sps:$4 sm:$0xff]   ;;  %v9089_v8 = vld [vmem:[%s12721_s1 + $0xdc8] ss:$16 sps:$4 sm:$0xff]  }
 0x17f   :  { %5247 = vmatpush1.bf16.msra.mxu0 %v8993_v9  ;;  %5806 = vmatpush1.bf16.msra.mxu1 %v8996_v10  ;;  %v9094_v9 = vld [vmem:[%s12721_s1 + $0xde4] ss:$16 sps:$4 sm:$0xff]   ;;  %v9097_v10 = vld [vmem:[%s12721_s1 + $0xdec] ss:$16 sps:$4 sm:$0xff]  }
 0x180   :  { %5259 = vmatprep.subr.bf16.mxu0 %v9004_v12  ;;  %5818 = vmatprep.subr.bf16.mxu1 %v9007_v13  ;;  %v9095_v12 = vld [vmem:[%s12721_s1 + $0xde8] ss:$16 sps:$4 sm:$0xff]   ;;  %v9098_v13 = vld [vmem:[%s12722_s0 + $0x30] ss:$100 sps:$4 sm:$0xff]  }
 0x182   :  { %5249 = vmatmul.mubr.bf16.vlgmr.msra.gmra.mrb[0].mxu0 %v8999_v11  ;;  %5808 = vmatmul.mubr.bf16.vlgmr.msra.gmra.mrb[0].mxu1 %v8999_v11  ;;  %v9092_v11 = vld [vmem:[%s12721_s1 + $0xde0] ss:$16 sps:$4 sm:$0xff]  }
 0x183   :  { %5260 = vmatpush1.bf16.msra.mxu0 %v9002_v14  ;;  %5819 = vmatpush1.bf16.msra.mxu1 %v9005_v15  ;;  %v9103_v14 = vld [vmem:[%s12721_s1 + $0xe04] ss:$16 sps:$4 sm:$0xff]   ;;  %v9106_v15 = vld [vmem:[%s12721_s1 + $0xe0c] ss:$16 sps:$4 sm:$0xff]  }
 0x184   :  { %5261 = vmatprep.subr.bf16.mxu0 %v9010_v16  ;;  %5820 = vmatprep.subr.bf16.mxu1 %v9013_v17  ;;  %v9101_v16 = vld [vmem:[%s12721_s1 + $0xe00] ss:$16 sps:$4 sm:$0xff]   ;;  %v9104_v17 = vld [vmem:[%s12721_s1 + $0xe08] ss:$16 sps:$4 sm:$0xff]  }
 0x185   :  { %5291 = vmatprep.mubr.bf16.mxu0 %v9100_v18  ;;  %5850 = vmatprep.mubr.bf16.mxu1 %v9100_v18  ;;  %v9109_v18 = vld [vmem:[%s12721_s1 + $0xe24] ss:$16 sps:$4 sm:$0xff]  }
 0x187   :  { %5262 = vmatpush1.bf16.msra.mxu0 %v9008_v19  ;;  %5821 = vmatpush1.bf16.msra.mxu1 %v9011_v20  ;;  %v9112_v19 = vld [vmem:[%s12721_s1 + $0xe2c] ss:$16 sps:$4 sm:$0xff]  }
 0x188   :  { %5263 = vmatprep.subr.bf16.mxu0 %v9016_v21  ;;  %5822 = vmatprep.subr.bf16.mxu1 %v9019_v22  ;;  %v9199_v20 = vld [vmem:[%s12722_s0 + $0x3c] ss:$100 sps:$4 sm:$0xff]   ;;  %v9110_v22 = vld [vmem:[%s12721_s1 + $0xe28] ss:$16 sps:$4 sm:$0xff]  }
 0x189   :  { %v9107_v21 = vld [vmem:[%s12721_s1 + $0xe20] ss:$16 sps:$4 sm:$0xff]  }
 0x18b   :  { %5264 = vmatpush1.bf16.msra.mxu0 %v9014_v23  ;;  %5823 = vmatpush1.bf16.msra.mxu1 %v9017_v24  ;;  %v9115_v23 = vld [vmem:[%s12721_s1 + $0xe44] ss:$16 sps:$4 sm:$0xff]   ;;  %v9118_v24 = vld [vmem:[%s12721_s1 + $0xe4c] ss:$16 sps:$4 sm:$0xff]  }
 0x18c   :  { %5265 = vmatprep.subr.bf16.mxu0 %v9022_v25  ;;  %5824 = vmatprep.subr.bf16.mxu1 %v9025_v26  ;;  %v9113_v25 = vld [vmem:[%s12721_s1 + $0xe40] ss:$16 sps:$4 sm:$0xff]   ;;  %v9116_v26 = vld [vmem:[%s12721_s1 + $0xe48] ss:$16 sps:$4 sm:$0xff]  }
 0x18f   :  { %5266 = vmatpush1.bf16.msra.mxu0 %v9020_v27  ;;  %5825 = vmatpush1.bf16.msra.mxu1 %v9023_v28  ;;  %v9121_v27 = vld [vmem:[%s12721_s1 + $0xe64] ss:$16 sps:$4 sm:$0xff]   ;;  %v9124_v28 = vld [vmem:[%s12721_s1 + $0xe6c] ss:$16 sps:$4 sm:$0xff]  }
 0x190   :  { %5267 = vmatprep.subr.bf16.mxu0 %v9028_v29  ;;  %5826 = vmatprep.subr.bf16.mxu1 %v9031_v30  ;;  %v9119_v29 = vld [vmem:[%s12721_s1 + $0xe60] ss:$16 sps:$4 sm:$0xff]   ;;  %v9122_v30 = vld [vmem:[%s12721_s1 + $0xe68] ss:$16 sps:$4 sm:$0xff]  }
 0x193   :  { %5268 = vmatpush1.bf16.msra.mxu0 %v9026_v31  ;;  %5827 = vmatpush1.bf16.msra.mxu1 %v9029_v32  ;;  %v9127_v31 = vld [vmem:[%s12721_s1 + $0xe84] ss:$16 sps:$4 sm:$0xff]   ;;  %v9130_v32 = vld [vmem:[%s12721_s1 + $0xe8c] ss:$16 sps:$4 sm:$0xff]  }
 0x194   :  { %5269 = vmatprep.subr.bf16.mxu0 %v9034_v33  ;;  %5828 = vmatprep.subr.bf16.mxu1 %v9037_v34  ;;  %v9125_v33 = vld [vmem:[%s12721_s1 + $0xe80] ss:$16 sps:$4 sm:$0xff]   ;;  %v9128_v34 = vld [vmem:[%s12721_s1 + $0xe88] ss:$16 sps:$4 sm:$0xff]  }
 0x197   :  { %5270 = vmatpush1.bf16.msra.mxu0 %v9032_v35  ;;  %5829 = vmatpush1.bf16.msra.mxu1 %v9035_v36  ;;  %v9133_v35 = vld [vmem:[%s12721_s1 + $0xea4] ss:$16 sps:$4 sm:$0xff]   ;;  %v9136_v36 = vld [vmem:[%s12721_s1 + $0xeac] ss:$16 sps:$4 sm:$0xff]  }
 0x198   :  { %5271 = vmatprep.subr.bf16.mxu0 %v9040_v37  ;;  %5830 = vmatprep.subr.bf16.mxu1 %v9043_v38  ;;  %v9131_v37 = vld [vmem:[%s12721_s1 + $0xea0] ss:$16 sps:$4 sm:$0xff]   ;;  %v9134_v38 = vld [vmem:[%s12721_s1 + $0xea8] ss:$16 sps:$4 sm:$0xff]  }
 0x19b   :  { %5272 = vmatpush1.bf16.msra.mxu0 %v9038_v39  ;;  %5831 = vmatpush1.bf16.msra.mxu1 %v9041_v40  ;;  %v9139_v39 = vld [vmem:[%s12721_s1 + $0xec4] ss:$16 sps:$4 sm:$0xff]   ;;  %v9142_v40 = vld [vmem:[%s12721_s1 + $0xecc] ss:$16 sps:$4 sm:$0xff]  }
 0x19c   :  { %5273 = vmatprep.subr.bf16.mxu0 %v9046_v41  ;;  %5832 = vmatprep.subr.bf16.mxu1 %v9049_v42  ;;  %v9137_v41 = vld [vmem:[%s12721_s1 + $0xec0] ss:$16 sps:$4 sm:$0xff]   ;;  %v9140_v42 = vld [vmem:[%s12721_s1 + $0xec8] ss:$16 sps:$4 sm:$0xff]  }
 0x19f   :  { %5274 = vmatpush1.bf16.msra.mxu0 %v9044_v43  ;;  %5833 = vmatpush1.bf16.msra.mxu1 %v9047_v44  ;;  %v9145_v43 = vld [vmem:[%s12721_s1 + $0xee4] ss:$16 sps:$4 sm:$0xff]   ;;  %v9148_v44 = vld [vmem:[%s12721_s1 + $0xeec] ss:$16 sps:$4 sm:$0xff]  }
 0x1a0   :  { %5275 = vmatprep.subr.bf16.mxu0 %v9052_v45  ;;  %5834 = vmatprep.subr.bf16.mxu1 %v9055_v46  ;;  %v9143_v45 = vld [vmem:[%s12721_s1 + $0xee0] ss:$16 sps:$4 sm:$0xff]   ;;  %v9146_v46 = vld [vmem:[%s12721_s1 + $0xee8] ss:$16 sps:$4 sm:$0xff]  }
 0x1a3   :  { %5276 = vmatpush1.bf16.msra.mxu0 %v9050_v47  ;;  %5835 = vmatpush1.bf16.msra.mxu1 %v9053_v48  ;;  %v9151_v47 = vld [vmem:[%s12721_s1 + $0xf04] ss:$16 sps:$4 sm:$0xff]   ;;  %v9154_v48 = vld [vmem:[%s12721_s1 + $0xf0c] ss:$16 sps:$4 sm:$0xff]  }
 0x1a4   :  { %5277 = vmatprep.subr.bf16.mxu0 %v9058_v49  ;;  %5836 = vmatprep.subr.bf16.mxu1 %v9061_v50  ;;  %v9149_v49 = vld [vmem:[%s12721_s1 + $0xf00] ss:$16 sps:$4 sm:$0xff]   ;;  %v9152_v50 = vld [vmem:[%s12721_s1 + $0xf08] ss:$16 sps:$4 sm:$0xff]  }
 0x1a7   :  { %5278 = vmatpush1.bf16.msra.mxu0 %v9056_v51  ;;  %5837 = vmatpush1.bf16.msra.mxu1 %v9059_v52  ;;  %v9157_v51 = vld [vmem:[%s12721_s1 + $0xf24] ss:$16 sps:$4 sm:$0xff]   ;;  %v9160_v52 = vld [vmem:[%s12721_s1 + $0xf2c] ss:$16 sps:$4 sm:$0xff]  }
 0x1a8   :  { %5279 = vmatprep.subr.bf16.mxu0 %v9064_v53  ;;  %5838 = vmatprep.subr.bf16.mxu1 %v9067_v54  ;;  %v9155_v53 = vld [vmem:[%s12721_s1 + $0xf20] ss:$16 sps:$4 sm:$0xff]   ;;  %v9158_v54 = vld [vmem:[%s12721_s1 + $0xf28] ss:$16 sps:$4 sm:$0xff]  }
 0x1ab   :  { %5280 = vmatpush1.bf16.msra.mxu0 %v9062_v55  ;;  %5839 = vmatpush1.bf16.msra.mxu1 %v9065_v56  ;;  %v9163_v55 = vld [vmem:[%s12721_s1 + $0xf44] ss:$16 sps:$4 sm:$0xff]   ;;  %v9166_v56 = vld [vmem:[%s12721_s1 + $0xf4c] ss:$16 sps:$4 sm:$0xff]  }
 0x1ac   :  { %5281 = vmatprep.subr.bf16.mxu0 %v9070_v57  ;;  %5840 = vmatprep.subr.bf16.mxu1 %v9073_v58  ;;  %v9161_v57 = vld [vmem:[%s12721_s1 + $0xf40] ss:$16 sps:$4 sm:$0xff]   ;;  %v9164_v58 = vld [vmem:[%s12721_s1 + $0xf48] ss:$16 sps:$4 sm:$0xff]  }
 0x1af   :  { %5282 = vmatpush1.bf16.msra.mxu0 %v9068_v59  ;;  %5841 = vmatpush1.bf16.msra.mxu1 %v9071_v60  ;;  %v9169_v59 = vld [vmem:[%s12721_s1 + $0xf64] ss:$16 sps:$4 sm:$0xff]   ;;  %v9172_v60 = vld [vmem:[%s12721_s1 + $0xf6c] ss:$16 sps:$4 sm:$0xff]  }
 0x1b0   :  { %5283 = vmatprep.subr.bf16.mxu0 %v9076_v61  ;;  %5842 = vmatprep.subr.bf16.mxu1 %v9079_v62  ;;  %v9167_v61 = vld [vmem:[%s12721_s1 + $0xf60] ss:$16 sps:$4 sm:$0xff]   ;;  %v9170_v62 = vld [vmem:[%s12721_s1 + $0xf68] ss:$16 sps:$4 sm:$0xff]  }
 0x1b3   :  { %5284 = vmatpush1.bf16.msra.mxu0 %v9074_v63  ;;  %5843 = vmatpush1.bf16.msra.mxu1 %v9077_v0  ;;  %v9175_v63 = vld [vmem:[%s12721_s1 + $0xf84] ss:$16 sps:$4 sm:$0xff]   ;;  %v9178_v0 = vld [vmem:[%s12721_s1 + $0xf8c] ss:$16 sps:$4 sm:$0xff]  }
 0x1b4   :  { %5285 = vmatprep.subr.bf16.mxu0 %v9082_v1  ;;  %5844 = vmatprep.subr.bf16.mxu1 %v9085_v2  ;;  %v9173_v1 = vld [vmem:[%s12721_s1 + $0xf80] ss:$16 sps:$4 sm:$0xff]   ;;  %v9176_v2 = vld [vmem:[%s12721_s1 + $0xf88] ss:$16 sps:$4 sm:$0xff]  }
 0x1b7   :  { %5286 = vmatpush1.bf16.msra.mxu0 %v9080_v3  ;;  %5845 = vmatpush1.bf16.msra.mxu1 %v9083_v4  ;;  %v9181_v3 = vld [vmem:[%s12721_s1 + $0xfa4] ss:$16 sps:$4 sm:$0xff]   ;;  %v9184_v4 = vld [vmem:[%s12721_s1 + $0xfac] ss:$16 sps:$4 sm:$0xff]  }
 0x1b8   :  { %5287 = vmatprep.subr.bf16.mxu0 %v9088_v5  ;;  %5846 = vmatprep.subr.bf16.mxu1 %v9091_v6  ;;  %v9179_v5 = vld [vmem:[%s12721_s1 + $0xfa0] ss:$16 sps:$4 sm:$0xff]   ;;  %v9182_v6 = vld [vmem:[%s12721_s1 + $0xfa8] ss:$16 sps:$4 sm:$0xff]  }
 0x1bb   :  { %5288 = vmatpush1.bf16.msra.mxu0 %v9086_v7  ;;  %5847 = vmatpush1.bf16.msra.mxu1 %v9089_v8  ;;  %v9187_v7 = vld [vmem:[%s12721_s1 + $0xfc4] ss:$16 sps:$4 sm:$0xff]   ;;  %v9190_v8 = vld [vmem:[%s12721_s1 + $0xfcc] ss:$16 sps:$4 sm:$0xff]  }
 0x1bc   :  { %5289 = vmatprep.subr.bf16.mxu0 %v9094_v9  ;;  %5848 = vmatprep.subr.bf16.mxu1 %v9097_v10  ;;  %v9185_v9 = vld [vmem:[%s12721_s1 + $0xfc0] ss:$16 sps:$4 sm:$0xff]   ;;  %v9188_v10 = vld [vmem:[%s12721_s1 + $0xfc8] ss:$16 sps:$4 sm:$0xff]  }
 0x1bf   :  { %5290 = vmatpush1.bf16.msra.mxu0 %v9092_v11  ;;  %5849 = vmatpush1.bf16.msra.mxu1 %v9095_v12  ;;  %v9193_v11 = vld [vmem:[%s12721_s1 + $0xfe4] ss:$16 sps:$4 sm:$0xff]   ;;  %v9196_v12 = vld [vmem:[%s12721_s1 + $0xfec] ss:$16 sps:$4 sm:$0xff]  }
 0x1c0   :  { %5302 = vmatprep.subr.bf16.mxu0 %v9103_v14  ;;  %5861 = vmatprep.subr.bf16.mxu1 %v9106_v15  ;;  %v9194_v14 = vld [vmem:[%s12721_s1 + $0xfe8] ss:$16 sps:$4 sm:$0xff]   ;;  %v9202_v15 = vld [vmem:[%s12721_s1 + $0x1004] ss:$16 sps:$4 sm:$0xff]  }
 0x1c2   :  { %5292 = vmatmul.mubr.bf16.vlgmr.msra.gmra.mrb[0].mxu0 %v9098_v13  ;;  %5851 = vmatmul.mubr.bf16.vlgmr.msra.gmra.mrb[0].mxu1 %v9098_v13  ;;  %v9191_v13 = vld [vmem:[%s12721_s1 + $0xfe0] ss:$16 sps:$4 sm:$0xff]  }
 0x1c3   :  { %5303 = vmatpush1.bf16.msra.mxu0 %v9101_v16  ;;  %5862 = vmatpush1.bf16.msra.mxu1 %v9104_v17  ;;  %v9205_v16 = vld [vmem:[%s12721_s1 + $0x100c] ss:$16 sps:$4 sm:$0xff]  }
 0x1c4   :  { %5304 = vmatprep.subr.bf16.mxu0 %v9109_v18  ;;  %5863 = vmatprep.subr.bf16.mxu1 %v9112_v19  ;;  %v9197_v17 = vld [vmem:[%s12722_s0 + $0x38] ss:$100 sps:$4 sm:$0xff]   ;;  %v9200_v18 = vld [vmem:[%s12721_s1 + $0x1000] ss:$16 sps:$4 sm:$0xff]  }
 0x1c5   :  { %5334 = vmatprep.mubr.bf16.mxu0 %v9199_v20  ;;  %5893 = vmatprep.mubr.bf16.mxu1 %v9199_v20  ;;  %v9203_v19 = vld [vmem:[%s12721_s1 + $0x1008] ss:$16 sps:$4 sm:$0xff]   ;;  %v9208_v20 = vld [vmem:[%s12721_s1 + $0x1024] ss:$16 sps:$4 sm:$0xff]  }
 0x1c7   :  { %5305 = vmatpush1.bf16.msra.mxu0 %v9107_v21  ;;  %5864 = vmatpush1.bf16.msra.mxu1 %v9110_v22  ;;  %v9211_v21 = vld [vmem:[%s12721_s1 + $0x102c] ss:$16 sps:$4 sm:$0xff]   ;;  %v9298_v22 = vld [vmem:[%s12722_s0 + $0x44] ss:$100 sps:$4 sm:$0xff]  }
 0x1c8   :  { %5306 = vmatprep.subr.bf16.mxu0 %v9115_v23  ;;  %5865 = vmatprep.subr.bf16.mxu1 %v9118_v24  ;;  %v9206_v23 = vld [vmem:[%s12721_s1 + $0x1020] ss:$16 sps:$4 sm:$0xff]   ;;  %v9209_v24 = vld [vmem:[%s12721_s1 + $0x1028] ss:$16 sps:$4 sm:$0xff]  }
 0x1cb   :  { %5307 = vmatpush1.bf16.msra.mxu0 %v9113_v25  ;;  %5866 = vmatpush1.bf16.msra.mxu1 %v9116_v26  ;;  %v9214_v25 = vld [vmem:[%s12721_s1 + $0x1044] ss:$16 sps:$4 sm:$0xff]   ;;  %v9217_v26 = vld [vmem:[%s12721_s1 + $0x104c] ss:$16 sps:$4 sm:$0xff]  }
 0x1cc   :  { %5308 = vmatprep.subr.bf16.mxu0 %v9121_v27  ;;  %5867 = vmatprep.subr.bf16.mxu1 %v9124_v28  ;;  %v9212_v27 = vld [vmem:[%s12721_s1 + $0x1040] ss:$16 sps:$4 sm:$0xff]   ;;  %v9215_v28 = vld [vmem:[%s12721_s1 + $0x1048] ss:$16 sps:$4 sm:$0xff]  }
 0x1cf   :  { %5309 = vmatpush1.bf16.msra.mxu0 %v9119_v29  ;;  %5868 = vmatpush1.bf16.msra.mxu1 %v9122_v30  ;;  %v9220_v29 = vld [vmem:[%s12721_s1 + $0x1064] ss:$16 sps:$4 sm:$0xff]   ;;  %v9223_v30 = vld [vmem:[%s12721_s1 + $0x106c] ss:$16 sps:$4 sm:$0xff]  }
 0x1d0   :  { %5310 = vmatprep.subr.bf16.mxu0 %v9127_v31  ;;  %5869 = vmatprep.subr.bf16.mxu1 %v9130_v32  ;;  %v9218_v31 = vld [vmem:[%s12721_s1 + $0x1060] ss:$16 sps:$4 sm:$0xff]   ;;  %v9221_v32 = vld [vmem:[%s12721_s1 + $0x1068] ss:$16 sps:$4 sm:$0xff]  }
 0x1d3   :  { %5311 = vmatpush1.bf16.msra.mxu0 %v9125_v33  ;;  %5870 = vmatpush1.bf16.msra.mxu1 %v9128_v34  ;;  %v9226_v33 = vld [vmem:[%s12721_s1 + $0x1084] ss:$16 sps:$4 sm:$0xff]   ;;  %v9229_v34 = vld [vmem:[%s12721_s1 + $0x108c] ss:$16 sps:$4 sm:$0xff]  }
 0x1d4   :  { %5312 = vmatprep.subr.bf16.mxu0 %v9133_v35  ;;  %5871 = vmatprep.subr.bf16.mxu1 %v9136_v36  ;;  %v9224_v35 = vld [vmem:[%s12721_s1 + $0x1080] ss:$16 sps:$4 sm:$0xff]   ;;  %v9227_v36 = vld [vmem:[%s12721_s1 + $0x1088] ss:$16 sps:$4 sm:$0xff]  }
 0x1d7   :  { %5313 = vmatpush1.bf16.msra.mxu0 %v9131_v37  ;;  %5872 = vmatpush1.bf16.msra.mxu1 %v9134_v38  ;;  %v9232_v37 = vld [vmem:[%s12721_s1 + $0x10a4] ss:$16 sps:$4 sm:$0xff]   ;;  %v9235_v38 = vld [vmem:[%s12721_s1 + $0x10ac] ss:$16 sps:$4 sm:$0xff]  }
 0x1d8   :  { %5314 = vmatprep.subr.bf16.mxu0 %v9139_v39  ;;  %5873 = vmatprep.subr.bf16.mxu1 %v9142_v40  ;;  %v9230_v39 = vld [vmem:[%s12721_s1 + $0x10a0] ss:$16 sps:$4 sm:$0xff]   ;;  %v9233_v40 = vld [vmem:[%s12721_s1 + $0x10a8] ss:$16 sps:$4 sm:$0xff]  }
 0x1db   :  { %5315 = vmatpush1.bf16.msra.mxu0 %v9137_v41  ;;  %5874 = vmatpush1.bf16.msra.mxu1 %v9140_v42  ;;  %v9238_v41 = vld [vmem:[%s12721_s1 + $0x10c4] ss:$16 sps:$4 sm:$0xff]   ;;  %v9241_v42 = vld [vmem:[%s12721_s1 + $0x10cc] ss:$16 sps:$4 sm:$0xff]  }
 0x1dc   :  { %5316 = vmatprep.subr.bf16.mxu0 %v9145_v43  ;;  %5875 = vmatprep.subr.bf16.mxu1 %v9148_v44  ;;  %v9236_v43 = vld [vmem:[%s12721_s1 + $0x10c0] ss:$16 sps:$4 sm:$0xff]   ;;  %v9239_v44 = vld [vmem:[%s12721_s1 + $0x10c8] ss:$16 sps:$4 sm:$0xff]  }
 0x1df   :  { %5317 = vmatpush1.bf16.msra.mxu0 %v9143_v45  ;;  %5876 = vmatpush1.bf16.msra.mxu1 %v9146_v46  ;;  %v9244_v45 = vld [vmem:[%s12721_s1 + $0x10e4] ss:$16 sps:$4 sm:$0xff]   ;;  %v9247_v46 = vld [vmem:[%s12721_s1 + $0x10ec] ss:$16 sps:$4 sm:$0xff]  }
 0x1e0   :  { %5318 = vmatprep.subr.bf16.mxu0 %v9151_v47  ;;  %5877 = vmatprep.subr.bf16.mxu1 %v9154_v48  ;;  %v9242_v47 = vld [vmem:[%s12721_s1 + $0x10e0] ss:$16 sps:$4 sm:$0xff]   ;;  %v9245_v48 = vld [vmem:[%s12721_s1 + $0x10e8] ss:$16 sps:$4 sm:$0xff]  }
 0x1e3   :  { %5319 = vmatpush1.bf16.msra.mxu0 %v9149_v49  ;;  %5878 = vmatpush1.bf16.msra.mxu1 %v9152_v50  ;;  %v9250_v49 = vld [vmem:[%s12721_s1 + $0x1104] ss:$16 sps:$4 sm:$0xff]   ;;  %v9253_v50 = vld [vmem:[%s12721_s1 + $0x110c] ss:$16 sps:$4 sm:$0xff]  }
 0x1e4   :  { %5320 = vmatprep.subr.bf16.mxu0 %v9157_v51  ;;  %5879 = vmatprep.subr.bf16.mxu1 %v9160_v52  ;;  %v9248_v51 = vld [vmem:[%s12721_s1 + $0x1100] ss:$16 sps:$4 sm:$0xff]   ;;  %v9251_v52 = vld [vmem:[%s12721_s1 + $0x1108] ss:$16 sps:$4 sm:$0xff]  }
 0x1e7   :  { %5321 = vmatpush1.bf16.msra.mxu0 %v9155_v53  ;;  %5880 = vmatpush1.bf16.msra.mxu1 %v9158_v54  ;;  %v9256_v53 = vld [vmem:[%s12721_s1 + $0x1124] ss:$16 sps:$4 sm:$0xff]   ;;  %v9259_v54 = vld [vmem:[%s12721_s1 + $0x112c] ss:$16 sps:$4 sm:$0xff]  }
 0x1e8   :  { %5322 = vmatprep.subr.bf16.mxu0 %v9163_v55  ;;  %5881 = vmatprep.subr.bf16.mxu1 %v9166_v56  ;;  %v9254_v55 = vld [vmem:[%s12721_s1 + $0x1120] ss:$16 sps:$4 sm:$0xff]   ;;  %v9257_v56 = vld [vmem:[%s12721_s1 + $0x1128] ss:$16 sps:$4 sm:$0xff]  }
 0x1eb   :  { %5323 = vmatpush1.bf16.msra.mxu0 %v9161_v57  ;;  %5882 = vmatpush1.bf16.msra.mxu1 %v9164_v58  ;;  %v9262_v57 = vld [vmem:[%s12721_s1 + $0x1144] ss:$16 sps:$4 sm:$0xff]   ;;  %v9265_v58 = vld [vmem:[%s12721_s1 + $0x114c] ss:$16 sps:$4 sm:$0xff]  }
 0x1ec   :  { %5324 = vmatprep.subr.bf16.mxu0 %v9169_v59  ;;  %5883 = vmatprep.subr.bf16.mxu1 %v9172_v60  ;;  %v9260_v59 = vld [vmem:[%s12721_s1 + $0x1140] ss:$16 sps:$4 sm:$0xff]   ;;  %v9263_v60 = vld [vmem:[%s12721_s1 + $0x1148] ss:$16 sps:$4 sm:$0xff]  }
 0x1ef   :  { %5325 = vmatpush1.bf16.msra.mxu0 %v9167_v61  ;;  %5884 = vmatpush1.bf16.msra.mxu1 %v9170_v62  ;;  %v9268_v61 = vld [vmem:[%s12721_s1 + $0x1164] ss:$16 sps:$4 sm:$0xff]   ;;  %v9271_v62 = vld [vmem:[%s12721_s1 + $0x116c] ss:$16 sps:$4 sm:$0xff]  }
 0x1f0   :  { %5326 = vmatprep.subr.bf16.mxu0 %v9175_v63  ;;  %5885 = vmatprep.subr.bf16.mxu1 %v9178_v0  ;;  %v9266_v63 = vld [vmem:[%s12721_s1 + $0x1160] ss:$16 sps:$4 sm:$0xff]   ;;  %v9269_v0 = vld [vmem:[%s12721_s1 + $0x1168] ss:$16 sps:$4 sm:$0xff]  }
 0x1f3   :  { %5327 = vmatpush1.bf16.msra.mxu0 %v9173_v1  ;;  %5886 = vmatpush1.bf16.msra.mxu1 %v9176_v2  ;;  %v9274_v1 = vld [vmem:[%s12721_s1 + $0x1184] ss:$16 sps:$4 sm:$0xff]   ;;  %v9277_v2 = vld [vmem:[%s12721_s1 + $0x118c] ss:$16 sps:$4 sm:$0xff]  }
 0x1f4   :  { %5328 = vmatprep.subr.bf16.mxu0 %v9181_v3  ;;  %5887 = vmatprep.subr.bf16.mxu1 %v9184_v4  ;;  %v9272_v3 = vld [vmem:[%s12721_s1 + $0x1180] ss:$16 sps:$4 sm:$0xff]   ;;  %v9275_v4 = vld [vmem:[%s12721_s1 + $0x1188] ss:$16 sps:$4 sm:$0xff]  }
 0x1f7   :  { %5329 = vmatpush1.bf16.msra.mxu0 %v9179_v5  ;;  %5888 = vmatpush1.bf16.msra.mxu1 %v9182_v6  ;;  %v9280_v5 = vld [vmem:[%s12721_s1 + $0x11a4] ss:$16 sps:$4 sm:$0xff]   ;;  %v9283_v6 = vld [vmem:[%s12721_s1 + $0x11ac] ss:$16 sps:$4 sm:$0xff]  }
 0x1f8   :  { %5330 = vmatprep.subr.bf16.mxu0 %v9187_v7  ;;  %5889 = vmatprep.subr.bf16.mxu1 %v9190_v8  ;;  %v9278_v7 = vld [vmem:[%s12721_s1 + $0x11a0] ss:$16 sps:$4 sm:$0xff]   ;;  %v9281_v8 = vld [vmem:[%s12721_s1 + $0x11a8] ss:$16 sps:$4 sm:$0xff]  }
 0x1fb   :  { %5331 = vmatpush1.bf16.msra.mxu0 %v9185_v9  ;;  %5890 = vmatpush1.bf16.msra.mxu1 %v9188_v10  ;;  %v9286_v9 = vld [vmem:[%s12721_s1 + $0x11c4] ss:$16 sps:$4 sm:$0xff]   ;;  %v9289_v10 = vld [vmem:[%s12721_s1 + $0x11cc] ss:$16 sps:$4 sm:$0xff]  }
 0x1fc   :  { %5332 = vmatprep.subr.bf16.mxu0 %v9193_v11  ;;  %5891 = vmatprep.subr.bf16.mxu1 %v9196_v12  ;;  %v9284_v11 = vld [vmem:[%s12721_s1 + $0x11c0] ss:$16 sps:$4 sm:$0xff]   ;;  %v9287_v12 = vld [vmem:[%s12721_s1 + $0x11c8] ss:$16 sps:$4 sm:$0xff]  }
 0x1ff   :  { %5333 = vmatpush1.bf16.msra.mxu0 %v9191_v13  ;;  %5892 = vmatpush1.bf16.msra.mxu1 %v9194_v14  ;;  %v9292_v13 = vld [vmem:[%s12721_s1 + $0x11e4] ss:$16 sps:$4 sm:$0xff]   ;;  %v9295_v14 = vld [vmem:[%s12721_s1 + $0x11ec] ss:$16 sps:$4 sm:$0xff]  }
 0x200   :  { %5345 = vmatprep.subr.bf16.mxu0 %v9202_v15  ;;  %5904 = vmatprep.subr.bf16.mxu1 %v9205_v16  ;;  %v9290_v15 = vld [vmem:[%s12721_s1 + $0x11e0] ss:$16 sps:$4 sm:$0xff]   ;;  %v9293_v16 = vld [vmem:[%s12721_s1 + $0x11e8] ss:$16 sps:$4 sm:$0xff]  }
 0x202   :  { %5335 = vmatmul.mubr.bf16.vlgmr.msra.gmra.mrb[0].mxu0 %v9197_v17  ;;  %5894 = vmatmul.mubr.bf16.vlgmr.msra.gmra.mrb[0].mxu1 %v9197_v17  ;;  %v9301_v17 = vld [vmem:[%s12721_s1 + $0x1204] ss:$16 sps:$4 sm:$0xff]  }
 0x203   :  { %5346 = vmatpush1.bf16.msra.mxu0 %v9200_v18  ;;  %5905 = vmatpush1.bf16.msra.mxu1 %v9203_v19  ;;  %v9304_v18 = vld [vmem:[%s12721_s1 + $0x120c] ss:$16 sps:$4 sm:$0xff]   ;;  %v9296_v19 = vld [vmem:[%s12722_s0 + $0x40] ss:$100 sps:$4 sm:$0xff]  }
 0x204   :  { %5347 = vmatprep.subr.bf16.mxu0 %v9208_v20  ;;  %5906 = vmatprep.subr.bf16.mxu1 %v9211_v21  ;;  %v9299_v20 = vld [vmem:[%s12721_s1 + $0x1200] ss:$16 sps:$4 sm:$0xff]   ;;  %v9302_v21 = vld [vmem:[%s12721_s1 + $0x1208] ss:$16 sps:$4 sm:$0xff]  }
 0x205   :  { %5377 = vmatprep.mubr.bf16.mxu0 %v9298_v22  ;;  %5936 = vmatprep.mubr.bf16.mxu1 %v9298_v22  ;;  %v9307_v22 = vld [vmem:[%s12721_s1 + $0x1224] ss:$16 sps:$4 sm:$0xff]  }
 0x207   :  { %5348 = vmatpush1.bf16.msra.mxu0 %v9206_v23  ;;  %5907 = vmatpush1.bf16.msra.mxu1 %v9209_v24  ;;  %v9310_v23 = vld [vmem:[%s12721_s1 + $0x122c] ss:$16 sps:$4 sm:$0xff]  }
 0x208   :  { %5349 = vmatprep.subr.bf16.mxu0 %v9214_v25  ;;  %5908 = vmatprep.subr.bf16.mxu1 %v9217_v26  ;;  %v9397_v24 = vld [vmem:[%s12722_s0 + $0x4c] ss:$100 sps:$4 sm:$0xff]   ;;  %v9308_v26 = vld [vmem:[%s12721_s1 + $0x1228] ss:$16 sps:$4 sm:$0xff]  }
 0x209   :  { %v9305_v25 = vld [vmem:[%s12721_s1 + $0x1220] ss:$16 sps:$4 sm:$0xff]  }
 0x20b   :  { %5350 = vmatpush1.bf16.msra.mxu0 %v9212_v27  ;;  %5909 = vmatpush1.bf16.msra.mxu1 %v9215_v28  ;;  %v9313_v27 = vld [vmem:[%s12721_s1 + $0x1244] ss:$16 sps:$4 sm:$0xff]   ;;  %v9316_v28 = vld [vmem:[%s12721_s1 + $0x124c] ss:$16 sps:$4 sm:$0xff]  }
 0x20c   :  { %5351 = vmatprep.subr.bf16.mxu0 %v9220_v29  ;;  %5910 = vmatprep.subr.bf16.mxu1 %v9223_v30  ;;  %v9311_v29 = vld [vmem:[%s12721_s1 + $0x1240] ss:$16 sps:$4 sm:$0xff]   ;;  %v9314_v30 = vld [vmem:[%s12721_s1 + $0x1248] ss:$16 sps:$4 sm:$0xff]  }
 0x20f   :  { %5352 = vmatpush1.bf16.msra.mxu0 %v9218_v31  ;;  %5911 = vmatpush1.bf16.msra.mxu1 %v9221_v32  ;;  %v9319_v31 = vld [vmem:[%s12721_s1 + $0x1264] ss:$16 sps:$4 sm:$0xff]   ;;  %v9322_v32 = vld [vmem:[%s12721_s1 + $0x126c] ss:$16 sps:$4 sm:$0xff]  }
 0x210   :  { %5353 = vmatprep.subr.bf16.mxu0 %v9226_v33  ;;  %5912 = vmatprep.subr.bf16.mxu1 %v9229_v34  ;;  %v9317_v33 = vld [vmem:[%s12721_s1 + $0x1260] ss:$16 sps:$4 sm:$0xff]   ;;  %v9320_v34 = vld [vmem:[%s12721_s1 + $0x1268] ss:$16 sps:$4 sm:$0xff]  }
 0x213   :  { %5354 = vmatpush1.bf16.msra.mxu0 %v9224_v35  ;;  %5913 = vmatpush1.bf16.msra.mxu1 %v9227_v36  ;;  %v9325_v35 = vld [vmem:[%s12721_s1 + $0x1284] ss:$16 sps:$4 sm:$0xff]   ;;  %v9328_v36 = vld [vmem:[%s12721_s1 + $0x128c] ss:$16 sps:$4 sm:$0xff]  }
 0x214   :  { %5355 = vmatprep.subr.bf16.mxu0 %v9232_v37  ;;  %5914 = vmatprep.subr.bf16.mxu1 %v9235_v38  ;;  %v9323_v37 = vld [vmem:[%s12721_s1 + $0x1280] ss:$16 sps:$4 sm:$0xff]   ;;  %v9326_v38 = vld [vmem:[%s12721_s1 + $0x1288] ss:$16 sps:$4 sm:$0xff]  }
 0x217   :  { %5356 = vmatpush1.bf16.msra.mxu0 %v9230_v39  ;;  %5915 = vmatpush1.bf16.msra.mxu1 %v9233_v40  ;;  %v9331_v39 = vld [vmem:[%s12721_s1 + $0x12a4] ss:$16 sps:$4 sm:$0xff]   ;;  %v9334_v40 = vld [vmem:[%s12721_s1 + $0x12ac] ss:$16 sps:$4 sm:$0xff]  }
 0x218   :  { %5357 = vmatprep.subr.bf16.mxu0 %v9238_v41  ;;  %5916 = vmatprep.subr.bf16.mxu1 %v9241_v42  ;;  %v9329_v41 = vld [vmem:[%s12721_s1 + $0x12a0] ss:$16 sps:$4 sm:$0xff]   ;;  %v9332_v42 = vld [vmem:[%s12721_s1 + $0x12a8] ss:$16 sps:$4 sm:$0xff]  }
 0x21b   :  { %5358 = vmatpush1.bf16.msra.mxu0 %v9236_v43  ;;  %5917 = vmatpush1.bf16.msra.mxu1 %v9239_v44  ;;  %v9337_v43 = vld [vmem:[%s12721_s1 + $0x12c4] ss:$16 sps:$4 sm:$0xff]   ;;  %v9340_v44 = vld [vmem:[%s12721_s1 + $0x12cc] ss:$16 sps:$4 sm:$0xff]  }
 0x21c   :  { %5359 = vmatprep.subr.bf16.mxu0 %v9244_v45  ;;  %5918 = vmatprep.subr.bf16.mxu1 %v9247_v46  ;;  %v9335_v45 = vld [vmem:[%s12721_s1 + $0x12c0] ss:$16 sps:$4 sm:$0xff]   ;;  %v9338_v46 = vld [vmem:[%s12721_s1 + $0x12c8] ss:$16 sps:$4 sm:$0xff]  }
 0x21f   :  { %5360 = vmatpush1.bf16.msra.mxu0 %v9242_v47  ;;  %5919 = vmatpush1.bf16.msra.mxu1 %v9245_v48  ;;  %v9343_v47 = vld [vmem:[%s12721_s1 + $0x12e4] ss:$16 sps:$4 sm:$0xff]   ;;  %v9346_v48 = vld [vmem:[%s12721_s1 + $0x12ec] ss:$16 sps:$4 sm:$0xff]  }
 0x220   :  { %5361 = vmatprep.subr.bf16.mxu0 %v9250_v49  ;;  %5920 = vmatprep.subr.bf16.mxu1 %v9253_v50  ;;  %v9341_v49 = vld [vmem:[%s12721_s1 + $0x12e0] ss:$16 sps:$4 sm:$0xff]   ;;  %v9344_v50 = vld [vmem:[%s12721_s1 + $0x12e8] ss:$16 sps:$4 sm:$0xff]  }
 0x223   :  { %5362 = vmatpush1.bf16.msra.mxu0 %v9248_v51  ;;  %5921 = vmatpush1.bf16.msra.mxu1 %v9251_v52  ;;  %v9349_v51 = vld [vmem:[%s12721_s1 + $0x1304] ss:$16 sps:$4 sm:$0xff]   ;;  %v9352_v52 = vld [vmem:[%s12721_s1 + $0x130c] ss:$16 sps:$4 sm:$0xff]  }
 0x224   :  { %5363 = vmatprep.subr.bf16.mxu0 %v9256_v53  ;;  %5922 = vmatprep.subr.bf16.mxu1 %v9259_v54  ;;  %v9347_v53 = vld [vmem:[%s12721_s1 + $0x1300] ss:$16 sps:$4 sm:$0xff]   ;;  %v9350_v54 = vld [vmem:[%s12721_s1 + $0x1308] ss:$16 sps:$4 sm:$0xff]  }
 0x227   :  { %5364 = vmatpush1.bf16.msra.mxu0 %v9254_v55  ;;  %5923 = vmatpush1.bf16.msra.mxu1 %v9257_v56  ;;  %v9355_v55 = vld [vmem:[%s12721_s1 + $0x1324] ss:$16 sps:$4 sm:$0xff]   ;;  %v9358_v56 = vld [vmem:[%s12721_s1 + $0x132c] ss:$16 sps:$4 sm:$0xff]  }
 0x228   :  { %5365 = vmatprep.subr.bf16.mxu0 %v9262_v57  ;;  %5924 = vmatprep.subr.bf16.mxu1 %v9265_v58  ;;  %v9353_v57 = vld [vmem:[%s12721_s1 + $0x1320] ss:$16 sps:$4 sm:$0xff]   ;;  %v9356_v58 = vld [vmem:[%s12721_s1 + $0x1328] ss:$16 sps:$4 sm:$0xff]  }
 0x22b   :  { %5366 = vmatpush1.bf16.msra.mxu0 %v9260_v59  ;;  %5925 = vmatpush1.bf16.msra.mxu1 %v9263_v60  ;;  %v9361_v59 = vld [vmem:[%s12721_s1 + $0x1344] ss:$16 sps:$4 sm:$0xff]   ;;  %v9364_v60 = vld [vmem:[%s12721_s1 + $0x134c] ss:$16 sps:$4 sm:$0xff]  }
 0x22c   :  { %5367 = vmatprep.subr.bf16.mxu0 %v9268_v61  ;;  %5926 = vmatprep.subr.bf16.mxu1 %v9271_v62  ;;  %v9359_v61 = vld [vmem:[%s12721_s1 + $0x1340] ss:$16 sps:$4 sm:$0xff]   ;;  %v9362_v62 = vld [vmem:[%s12721_s1 + $0x1348] ss:$16 sps:$4 sm:$0xff]  }
 0x22f   :  { %5368 = vmatpush1.bf16.msra.mxu0 %v9266_v63  ;;  %5927 = vmatpush1.bf16.msra.mxu1 %v9269_v0  ;;  %v9367_v63 = vld [vmem:[%s12721_s1 + $0x1364] ss:$16 sps:$4 sm:$0xff]   ;;  %v9370_v0 = vld [vmem:[%s12721_s1 + $0x136c] ss:$16 sps:$4 sm:$0xff]  }
 0x230   :  { %5369 = vmatprep.subr.bf16.mxu0 %v9274_v1  ;;  %5928 = vmatprep.subr.bf16.mxu1 %v9277_v2  ;;  %v9365_v1 = vld [vmem:[%s12721_s1 + $0x1360] ss:$16 sps:$4 sm:$0xff]   ;;  %v9368_v2 = vld [vmem:[%s12721_s1 + $0x1368] ss:$16 sps:$4 sm:$0xff]  }
 0x233   :  { %5370 = vmatpush1.bf16.msra.mxu0 %v9272_v3  ;;  %5929 = vmatpush1.bf16.msra.mxu1 %v9275_v4  ;;  %v9373_v3 = vld [vmem:[%s12721_s1 + $0x1384] ss:$16 sps:$4 sm:$0xff]   ;;  %v9376_v4 = vld [vmem:[%s12721_s1 + $0x138c] ss:$16 sps:$4 sm:$0xff]  }
 0x234   :  { %5371 = vmatprep.subr.bf16.mxu0 %v9280_v5  ;;  %5930 = vmatprep.subr.bf16.mxu1 %v9283_v6  ;;  %v9371_v5 = vld [vmem:[%s12721_s1 + $0x1380] ss:$16 sps:$4 sm:$0xff]   ;;  %v9374_v6 = vld [vmem:[%s12721_s1 + $0x1388] ss:$16 sps:$4 sm:$0xff]  }
 0x237   :  { %5372 = vmatpush1.bf16.msra.mxu0 %v9278_v7  ;;  %5931 = vmatpush1.bf16.msra.mxu1 %v9281_v8  ;;  %v9379_v7 = vld [vmem:[%s12721_s1 + $0x13a4] ss:$16 sps:$4 sm:$0xff]   ;;  %v9382_v8 = vld [vmem:[%s12721_s1 + $0x13ac] ss:$16 sps:$4 sm:$0xff]  }
 0x238   :  { %5373 = vmatprep.subr.bf16.mxu0 %v9286_v9  ;;  %5932 = vmatprep.subr.bf16.mxu1 %v9289_v10  ;;  %v9377_v9 = vld [vmem:[%s12721_s1 + $0x13a0] ss:$16 sps:$4 sm:$0xff]   ;;  %v9380_v10 = vld [vmem:[%s12721_s1 + $0x13a8] ss:$16 sps:$4 sm:$0xff]  }
 0x23b   :  { %5374 = vmatpush1.bf16.msra.mxu0 %v9284_v11  ;;  %5933 = vmatpush1.bf16.msra.mxu1 %v9287_v12  ;;  %v9385_v11 = vld [vmem:[%s12721_s1 + $0x13c4] ss:$16 sps:$4 sm:$0xff]   ;;  %v9388_v12 = vld [vmem:[%s12721_s1 + $0x13cc] ss:$16 sps:$4 sm:$0xff]  }
 0x23c   :  { %5375 = vmatprep.subr.bf16.mxu0 %v9292_v13  ;;  %5934 = vmatprep.subr.bf16.mxu1 %v9295_v14  ;;  %v9383_v13 = vld [vmem:[%s12721_s1 + $0x13c0] ss:$16 sps:$4 sm:$0xff]   ;;  %v9386_v14 = vld [vmem:[%s12721_s1 + $0x13c8] ss:$16 sps:$4 sm:$0xff]  }
 0x23f   :  { %5376 = vmatpush1.bf16.msra.mxu0 %v9290_v15  ;;  %5935 = vmatpush1.bf16.msra.mxu1 %v9293_v16  ;;  %v9391_v15 = vld [vmem:[%s12721_s1 + $0x13e4] ss:$16 sps:$4 sm:$0xff]   ;;  %v9394_v16 = vld [vmem:[%s12721_s1 + $0x13ec] ss:$16 sps:$4 sm:$0xff]  }
 0x240   :  { %5388 = vmatprep.subr.bf16.mxu0 %v9301_v17  ;;  %5947 = vmatprep.subr.bf16.mxu1 %v9304_v18  ;;  %v9389_v17 = vld [vmem:[%s12721_s1 + $0x13e0] ss:$16 sps:$4 sm:$0xff]   ;;  %v9392_v18 = vld [vmem:[%s12721_s1 + $0x13e8] ss:$16 sps:$4 sm:$0xff]  }
 0x242   :  { %5378 = vmatmul.mubr.bf16.vlgmr.msra.gmra.mrb[0].mxu0 %v9296_v19  ;;  %5937 = vmatmul.mubr.bf16.vlgmr.msra.gmra.mrb[0].mxu1 %v9296_v19  ;;  %v9400_v19 = vld [vmem:[%s12721_s1 + $0x1404] ss:$16 sps:$4 sm:$0xff]  }
 0x243   :  { %5389 = vmatpush1.bf16.msra.mxu0 %v9299_v20  ;;  %5948 = vmatpush1.bf16.msra.mxu1 %v9302_v21  ;;  %v9403_v20 = vld [vmem:[%s12721_s1 + $0x140c] ss:$16 sps:$4 sm:$0xff]  }
 0x244   :  { %5390 = vmatprep.subr.bf16.mxu0 %v9307_v22  ;;  %5949 = vmatprep.subr.bf16.mxu1 %v9310_v23  ;;  %v9395_v21 = vld [vmem:[%s12722_s0 + $0x48] ss:$100 sps:$4 sm:$0xff]   ;;  %v9398_v22 = vld [vmem:[%s12721_s1 + $0x1400] ss:$16 sps:$4 sm:$0xff]  }
 0x245   :  { %5420 = vmatprep.mubr.bf16.mxu0 %v9397_v24  ;;  %5979 = vmatprep.mubr.bf16.mxu1 %v9397_v24  ;;  %v9401_v23 = vld [vmem:[%s12721_s1 + $0x1408] ss:$16 sps:$4 sm:$0xff]   ;;  %v9406_v24 = vld [vmem:[%s12721_s1 + $0x1424] ss:$16 sps:$4 sm:$0xff]  }
 0x247   :  { %5391 = vmatpush1.bf16.msra.mxu0 %v9305_v25  ;;  %5950 = vmatpush1.bf16.msra.mxu1 %v9308_v26  ;;  %v9409_v25 = vld [vmem:[%s12721_s1 + $0x142c] ss:$16 sps:$4 sm:$0xff]   ;;  %v9496_v26 = vld [vmem:[%s12722_s0 + $0x54] ss:$100 sps:$4 sm:$0xff]  }
 0x248   :  { %5392 = vmatprep.subr.bf16.mxu0 %v9313_v27  ;;  %5951 = vmatprep.subr.bf16.mxu1 %v9316_v28  ;;  %v9404_v27 = vld [vmem:[%s12721_s1 + $0x1420] ss:$16 sps:$4 sm:$0xff]   ;;  %v9407_v28 = vld [vmem:[%s12721_s1 + $0x1428] ss:$16 sps:$4 sm:$0xff]  }
 0x24b   :  { %5393 = vmatpush1.bf16.msra.mxu0 %v9311_v29  ;;  %5952 = vmatpush1.bf16.msra.mxu1 %v9314_v30  ;;  %v9412_v29 = vld [vmem:[%s12721_s1 + $0x1444] ss:$16 sps:$4 sm:$0xff]   ;;  %v9415_v30 = vld [vmem:[%s12721_s1 + $0x144c] ss:$16 sps:$4 sm:$0xff]  }
 0x24c   :  { %5394 = vmatprep.subr.bf16.mxu0 %v9319_v31  ;;  %5953 = vmatprep.subr.bf16.mxu1 %v9322_v32  ;;  %v9410_v31 = vld [vmem:[%s12721_s1 + $0x1440] ss:$16 sps:$4 sm:$0xff]   ;;  %v9413_v32 = vld [vmem:[%s12721_s1 + $0x1448] ss:$16 sps:$4 sm:$0xff]  }
 0x24f   :  { %5395 = vmatpush1.bf16.msra.mxu0 %v9317_v33  ;;  %5954 = vmatpush1.bf16.msra.mxu1 %v9320_v34  ;;  %v9418_v33 = vld [vmem:[%s12721_s1 + $0x1464] ss:$16 sps:$4 sm:$0xff]   ;;  %v9421_v34 = vld [vmem:[%s12721_s1 + $0x146c] ss:$16 sps:$4 sm:$0xff]  }
 0x250   :  { %5396 = vmatprep.subr.bf16.mxu0 %v9325_v35  ;;  %5955 = vmatprep.subr.bf16.mxu1 %v9328_v36  ;;  %v9416_v35 = vld [vmem:[%s12721_s1 + $0x1460] ss:$16 sps:$4 sm:$0xff]   ;;  %v9419_v36 = vld [vmem:[%s12721_s1 + $0x1468] ss:$16 sps:$4 sm:$0xff]  }
 0x253   :  { %5397 = vmatpush1.bf16.msra.mxu0 %v9323_v37  ;;  %5956 = vmatpush1.bf16.msra.mxu1 %v9326_v38  ;;  %v9424_v37 = vld [vmem:[%s12721_s1 + $0x1484] ss:$16 sps:$4 sm:$0xff]   ;;  %v9427_v38 = vld [vmem:[%s12721_s1 + $0x148c] ss:$16 sps:$4 sm:$0xff]  }
 0x254   :  { %5398 = vmatprep.subr.bf16.mxu0 %v9331_v39  ;;  %5957 = vmatprep.subr.bf16.mxu1 %v9334_v40  ;;  %v9422_v39 = vld [vmem:[%s12721_s1 + $0x1480] ss:$16 sps:$4 sm:$0xff]   ;;  %v9425_v40 = vld [vmem:[%s12721_s1 + $0x1488] ss:$16 sps:$4 sm:$0xff]  }
 0x257   :  { %5399 = vmatpush1.bf16.msra.mxu0 %v9329_v41  ;;  %5958 = vmatpush1.bf16.msra.mxu1 %v9332_v42  ;;  %v9430_v41 = vld [vmem:[%s12721_s1 + $0x14a4] ss:$16 sps:$4 sm:$0xff]   ;;  %v9433_v42 = vld [vmem:[%s12721_s1 + $0x14ac] ss:$16 sps:$4 sm:$0xff]  }
 0x258   :  { %5400 = vmatprep.subr.bf16.mxu0 %v9337_v43  ;;  %5959 = vmatprep.subr.bf16.mxu1 %v9340_v44  ;;  %v9428_v43 = vld [vmem:[%s12721_s1 + $0x14a0] ss:$16 sps:$4 sm:$0xff]   ;;  %v9431_v44 = vld [vmem:[%s12721_s1 + $0x14a8] ss:$16 sps:$4 sm:$0xff]  }
 0x25b   :  { %5401 = vmatpush1.bf16.msra.mxu0 %v9335_v45  ;;  %5960 = vmatpush1.bf16.msra.mxu1 %v9338_v46  ;;  %v9436_v45 = vld [vmem:[%s12721_s1 + $0x14c4] ss:$16 sps:$4 sm:$0xff]   ;;  %v9439_v46 = vld [vmem:[%s12721_s1 + $0x14cc] ss:$16 sps:$4 sm:$0xff]  }
 0x25c   :  { %5402 = vmatprep.subr.bf16.mxu0 %v9343_v47  ;;  %5961 = vmatprep.subr.bf16.mxu1 %v9346_v48  ;;  %v9434_v47 = vld [vmem:[%s12721_s1 + $0x14c0] ss:$16 sps:$4 sm:$0xff]   ;;  %v9437_v48 = vld [vmem:[%s12721_s1 + $0x14c8] ss:$16 sps:$4 sm:$0xff]  }
 0x25f   :  { %5403 = vmatpush1.bf16.msra.mxu0 %v9341_v49  ;;  %5962 = vmatpush1.bf16.msra.mxu1 %v9344_v50  ;;  %v9442_v49 = vld [vmem:[%s12721_s1 + $0x14e4] ss:$16 sps:$4 sm:$0xff]   ;;  %v9445_v50 = vld [vmem:[%s12721_s1 + $0x14ec] ss:$16 sps:$4 sm:$0xff]  }
 0x260   :  { %5404 = vmatprep.subr.bf16.mxu0 %v9349_v51  ;;  %5963 = vmatprep.subr.bf16.mxu1 %v9352_v52  ;;  %v9440_v51 = vld [vmem:[%s12721_s1 + $0x14e0] ss:$16 sps:$4 sm:$0xff]   ;;  %v9443_v52 = vld [vmem:[%s12721_s1 + $0x14e8] ss:$16 sps:$4 sm:$0xff]  }
 0x263   :  { %5405 = vmatpush1.bf16.msra.mxu0 %v9347_v53  ;;  %5964 = vmatpush1.bf16.msra.mxu1 %v9350_v54  ;;  %v9448_v53 = vld [vmem:[%s12721_s1 + $0x1504] ss:$16 sps:$4 sm:$0xff]   ;;  %v9451_v54 = vld [vmem:[%s12721_s1 + $0x150c] ss:$16 sps:$4 sm:$0xff]  }
 0x264   :  { %5406 = vmatprep.subr.bf16.mxu0 %v9355_v55  ;;  %5965 = vmatprep.subr.bf16.mxu1 %v9358_v56  ;;  %v9446_v55 = vld [vmem:[%s12721_s1 + $0x1500] ss:$16 sps:$4 sm:$0xff]   ;;  %v9449_v56 = vld [vmem:[%s12721_s1 + $0x1508] ss:$16 sps:$4 sm:$0xff]  }
 0x267   :  { %5407 = vmatpush1.bf16.msra.mxu0 %v9353_v57  ;;  %5966 = vmatpush1.bf16.msra.mxu1 %v9356_v58  ;;  %v9454_v57 = vld [vmem:[%s12721_s1 + $0x1524] ss:$16 sps:$4 sm:$0xff]   ;;  %v9457_v58 = vld [vmem:[%s12721_s1 + $0x152c] ss:$16 sps:$4 sm:$0xff]  }
 0x268   :  { %5408 = vmatprep.subr.bf16.mxu0 %v9361_v59  ;;  %5967 = vmatprep.subr.bf16.mxu1 %v9364_v60  ;;  %v9452_v59 = vld [vmem:[%s12721_s1 + $0x1520] ss:$16 sps:$4 sm:$0xff]   ;;  %v9455_v60 = vld [vmem:[%s12721_s1 + $0x1528] ss:$16 sps:$4 sm:$0xff]  }
 0x26b   :  { %5409 = vmatpush1.bf16.msra.mxu0 %v9359_v61  ;;  %5968 = vmatpush1.bf16.msra.mxu1 %v9362_v62  ;;  %v9460_v61 = vld [vmem:[%s12721_s1 + $0x1544] ss:$16 sps:$4 sm:$0xff]   ;;  %v9463_v62 = vld [vmem:[%s12721_s1 + $0x154c] ss:$16 sps:$4 sm:$0xff]  }
 0x26c   :  { %5410 = vmatprep.subr.bf16.mxu0 %v9367_v63  ;;  %5969 = vmatprep.subr.bf16.mxu1 %v9370_v0  ;;  %v9458_v63 = vld [vmem:[%s12721_s1 + $0x1540] ss:$16 sps:$4 sm:$0xff]   ;;  %v9461_v0 = vld [vmem:[%s12721_s1 + $0x1548] ss:$16 sps:$4 sm:$0xff]  }
 0x26f   :  { %5411 = vmatpush1.bf16.msra.mxu0 %v9365_v1  ;;  %5970 = vmatpush1.bf16.msra.mxu1 %v9368_v2  ;;  %v9466_v1 = vld [vmem:[%s12721_s1 + $0x1564] ss:$16 sps:$4 sm:$0xff]   ;;  %v9469_v2 = vld [vmem:[%s12721_s1 + $0x156c] ss:$16 sps:$4 sm:$0xff]  }
 0x270   :  { %5412 = vmatprep.subr.bf16.mxu0 %v9373_v3  ;;  %5971 = vmatprep.subr.bf16.mxu1 %v9376_v4  ;;  %v9464_v3 = vld [vmem:[%s12721_s1 + $0x1560] ss:$16 sps:$4 sm:$0xff]   ;;  %v9467_v4 = vld [vmem:[%s12721_s1 + $0x1568] ss:$16 sps:$4 sm:$0xff]  }
 0x273   :  { %5413 = vmatpush1.bf16.msra.mxu0 %v9371_v5  ;;  %5972 = vmatpush1.bf16.msra.mxu1 %v9374_v6  ;;  %v9472_v5 = vld [vmem:[%s12721_s1 + $0x1584] ss:$16 sps:$4 sm:$0xff]   ;;  %v9475_v6 = vld [vmem:[%s12721_s1 + $0x158c] ss:$16 sps:$4 sm:$0xff]  }
 0x274   :  { %5414 = vmatprep.subr.bf16.mxu0 %v9379_v7  ;;  %5973 = vmatprep.subr.bf16.mxu1 %v9382_v8  ;;  %v9470_v7 = vld [vmem:[%s12721_s1 + $0x1580] ss:$16 sps:$4 sm:$0xff]   ;;  %v9473_v8 = vld [vmem:[%s12721_s1 + $0x1588] ss:$16 sps:$4 sm:$0xff]  }
 0x277   :  { %5415 = vmatpush1.bf16.msra.mxu0 %v9377_v9  ;;  %5974 = vmatpush1.bf16.msra.mxu1 %v9380_v10  ;;  %v9478_v9 = vld [vmem:[%s12721_s1 + $0x15a4] ss:$16 sps:$4 sm:$0xff]   ;;  %v9481_v10 = vld [vmem:[%s12721_s1 + $0x15ac] ss:$16 sps:$4 sm:$0xff]  }
 0x278   :  { %5416 = vmatprep.subr.bf16.mxu0 %v9385_v11  ;;  %5975 = vmatprep.subr.bf16.mxu1 %v9388_v12  ;;  %v9476_v11 = vld [vmem:[%s12721_s1 + $0x15a0] ss:$16 sps:$4 sm:$0xff]   ;;  %v9479_v12 = vld [vmem:[%s12721_s1 + $0x15a8] ss:$16 sps:$4 sm:$0xff]  }
 0x27b   :  { %5417 = vmatpush1.bf16.msra.mxu0 %v9383_v13  ;;  %5976 = vmatpush1.bf16.msra.mxu1 %v9386_v14  ;;  %v9484_v13 = vld [vmem:[%s12721_s1 + $0x15c4] ss:$16 sps:$4 sm:$0xff]   ;;  %v9487_v14 = vld [vmem:[%s12721_s1 + $0x15cc] ss:$16 sps:$4 sm:$0xff]  }
 0x27c   :  { %5418 = vmatprep.subr.bf16.mxu0 %v9391_v15  ;;  %5977 = vmatprep.subr.bf16.mxu1 %v9394_v16  ;;  %v9482_v15 = vld [vmem:[%s12721_s1 + $0x15c0] ss:$16 sps:$4 sm:$0xff]   ;;  %v9485_v16 = vld [vmem:[%s12721_s1 + $0x15c8] ss:$16 sps:$4 sm:$0xff]  }
 0x27f   :  { %5419 = vmatpush1.bf16.msra.mxu0 %v9389_v17  ;;  %5978 = vmatpush1.bf16.msra.mxu1 %v9392_v18  ;;  %v9490_v17 = vld [vmem:[%s12721_s1 + $0x15e4] ss:$16 sps:$4 sm:$0xff]   ;;  %v9493_v18 = vld [vmem:[%s12721_s1 + $0x15ec] ss:$16 sps:$4 sm:$0xff]  }
 0x280   :  { %5431 = vmatprep.subr.bf16.mxu0 %v9400_v19  ;;  %5990 = vmatprep.subr.bf16.mxu1 %v9403_v20  ;;  %v9488_v19 = vld [vmem:[%s12721_s1 + $0x15e0] ss:$16 sps:$4 sm:$0xff]   ;;  %v9491_v20 = vld [vmem:[%s12721_s1 + $0x15e8] ss:$16 sps:$4 sm:$0xff]  }
 0x282   :  { %5421 = vmatmul.mubr.bf16.vlgmr.msra.gmra.mrb[0].mxu0 %v9395_v21  ;;  %5980 = vmatmul.mubr.bf16.vlgmr.msra.gmra.mrb[0].mxu1 %v9395_v21  ;;  %v9499_v21 = vld [vmem:[%s12721_s1 + $0x1604] ss:$16 sps:$4 sm:$0xff]  }
 0x283   :  { %5432 = vmatpush1.bf16.msra.mxu0 %v9398_v22  ;;  %5991 = vmatpush1.bf16.msra.mxu1 %v9401_v23  ;;  %v9502_v22 = vld [vmem:[%s12721_s1 + $0x160c] ss:$16 sps:$4 sm:$0xff]   ;;  %v9494_v23 = vld [vmem:[%s12722_s0 + $0x50] ss:$100 sps:$4 sm:$0xff]  }
 0x284   :  { %5433 = vmatprep.subr.bf16.mxu0 %v9406_v24  ;;  %5992 = vmatprep.subr.bf16.mxu1 %v9409_v25  ;;  %v9497_v24 = vld [vmem:[%s12721_s1 + $0x1600] ss:$16 sps:$4 sm:$0xff]   ;;  %v9500_v25 = vld [vmem:[%s12721_s1 + $0x1608] ss:$16 sps:$4 sm:$0xff]  }
 0x285   :  { %5463 = vmatprep.mubr.bf16.mxu0 %v9496_v26  ;;  %6022 = vmatprep.mubr.bf16.mxu1 %v9496_v26  ;;  %v9505_v26 = vld [vmem:[%s12721_s1 + $0x1624] ss:$16 sps:$4 sm:$0xff]  }
 0x287   :  { %5434 = vmatpush1.bf16.msra.mxu0 %v9404_v27  ;;  %5993 = vmatpush1.bf16.msra.mxu1 %v9407_v28  ;;  %v9508_v27 = vld [vmem:[%s12721_s1 + $0x162c] ss:$16 sps:$4 sm:$0xff]  }
 0x288   :  { %5435 = vmatprep.subr.bf16.mxu0 %v9412_v29  ;;  %5994 = vmatprep.subr.bf16.mxu1 %v9415_v30  ;;  %v9595_v28 = vld [vmem:[%s12722_s0 + $0x5c] ss:$100 sps:$4 sm:$0xff]   ;;  %v9506_v30 = vld [vmem:[%s12721_s1 + $0x1628] ss:$16 sps:$4 sm:$0xff]  }
 0x289   :  { %v9503_v29 = vld [vmem:[%s12721_s1 + $0x1620] ss:$16 sps:$4 sm:$0xff]  }
 0x28b   :  { %5436 = vmatpush1.bf16.msra.mxu0 %v9410_v31  ;;  %5995 = vmatpush1.bf16.msra.mxu1 %v9413_v32  ;;  %v9511_v31 = vld [vmem:[%s12721_s1 + $0x1644] ss:$16 sps:$4 sm:$0xff]   ;;  %v9514_v32 = vld [vmem:[%s12721_s1 + $0x164c] ss:$16 sps:$4 sm:$0xff]  }
 0x28c   :  { %5437 = vmatprep.subr.bf16.mxu0 %v9418_v33  ;;  %5996 = vmatprep.subr.bf16.mxu1 %v9421_v34  ;;  %v9509_v33 = vld [vmem:[%s12721_s1 + $0x1640] ss:$16 sps:$4 sm:$0xff]   ;;  %v9512_v34 = vld [vmem:[%s12721_s1 + $0x1648] ss:$16 sps:$4 sm:$0xff]  }
 0x28f   :  { %5438 = vmatpush1.bf16.msra.mxu0 %v9416_v35  ;;  %5997 = vmatpush1.bf16.msra.mxu1 %v9419_v36  ;;  %v9517_v35 = vld [vmem:[%s12721_s1 + $0x1664] ss:$16 sps:$4 sm:$0xff]   ;;  %v9520_v36 = vld [vmem:[%s12721_s1 + $0x166c] ss:$16 sps:$4 sm:$0xff]  }
 0x290   :  { %5439 = vmatprep.subr.bf16.mxu0 %v9424_v37  ;;  %5998 = vmatprep.subr.bf16.mxu1 %v9427_v38  ;;  %v9515_v37 = vld [vmem:[%s12721_s1 + $0x1660] ss:$16 sps:$4 sm:$0xff]   ;;  %v9518_v38 = vld [vmem:[%s12721_s1 + $0x1668] ss:$16 sps:$4 sm:$0xff]  }
 0x293   :  { %5440 = vmatpush1.bf16.msra.mxu0 %v9422_v39  ;;  %5999 = vmatpush1.bf16.msra.mxu1 %v9425_v40  ;;  %v9523_v39 = vld [vmem:[%s12721_s1 + $0x1684] ss:$16 sps:$4 sm:$0xff]   ;;  %v9526_v40 = vld [vmem:[%s12721_s1 + $0x168c] ss:$16 sps:$4 sm:$0xff]  }
 0x294   :  { %5441 = vmatprep.subr.bf16.mxu0 %v9430_v41  ;;  %6000 = vmatprep.subr.bf16.mxu1 %v9433_v42  ;;  %v9521_v41 = vld [vmem:[%s12721_s1 + $0x1680] ss:$16 sps:$4 sm:$0xff]   ;;  %v9524_v42 = vld [vmem:[%s12721_s1 + $0x1688] ss:$16 sps:$4 sm:$0xff]  }
 0x297   :  { %5442 = vmatpush1.bf16.msra.mxu0 %v9428_v43  ;;  %6001 = vmatpush1.bf16.msra.mxu1 %v9431_v44  ;;  %v9529_v43 = vld [vmem:[%s12721_s1 + $0x16a4] ss:$16 sps:$4 sm:$0xff]   ;;  %v9532_v44 = vld [vmem:[%s12721_s1 + $0x16ac] ss:$16 sps:$4 sm:$0xff]  }
 0x298   :  { %5443 = vmatprep.subr.bf16.mxu0 %v9436_v45  ;;  %6002 = vmatprep.subr.bf16.mxu1 %v9439_v46  ;;  %v9527_v45 = vld [vmem:[%s12721_s1 + $0x16a0] ss:$16 sps:$4 sm:$0xff]   ;;  %v9530_v46 = vld [vmem:[%s12721_s1 + $0x16a8] ss:$16 sps:$4 sm:$0xff]  }
 0x29b   :  { %5444 = vmatpush1.bf16.msra.mxu0 %v9434_v47  ;;  %6003 = vmatpush1.bf16.msra.mxu1 %v9437_v48  ;;  %v9535_v47 = vld [vmem:[%s12721_s1 + $0x16c4] ss:$16 sps:$4 sm:$0xff]   ;;  %v9538_v48 = vld [vmem:[%s12721_s1 + $0x16cc] ss:$16 sps:$4 sm:$0xff]  }
 0x29c   :  { %5445 = vmatprep.subr.bf16.mxu0 %v9442_v49  ;;  %6004 = vmatprep.subr.bf16.mxu1 %v9445_v50  ;;  %v9533_v49 = vld [vmem:[%s12721_s1 + $0x16c0] ss:$16 sps:$4 sm:$0xff]   ;;  %v9536_v50 = vld [vmem:[%s12721_s1 + $0x16c8] ss:$16 sps:$4 sm:$0xff]  }
 0x29f   :  { %5446 = vmatpush1.bf16.msra.mxu0 %v9440_v51  ;;  %6005 = vmatpush1.bf16.msra.mxu1 %v9443_v52  ;;  %v9541_v51 = vld [vmem:[%s12721_s1 + $0x16e4] ss:$16 sps:$4 sm:$0xff]   ;;  %v9544_v52 = vld [vmem:[%s12721_s1 + $0x16ec] ss:$16 sps:$4 sm:$0xff]  }
 0x2a0   :  { %5447 = vmatprep.subr.bf16.mxu0 %v9448_v53  ;;  %6006 = vmatprep.subr.bf16.mxu1 %v9451_v54  ;;  %v9539_v53 = vld [vmem:[%s12721_s1 + $0x16e0] ss:$16 sps:$4 sm:$0xff]   ;;  %v9542_v54 = vld [vmem:[%s12721_s1 + $0x16e8] ss:$16 sps:$4 sm:$0xff]  }
 0x2a3   :  { %5448 = vmatpush1.bf16.msra.mxu0 %v9446_v55  ;;  %6007 = vmatpush1.bf16.msra.mxu1 %v9449_v56  ;;  %v9547_v55 = vld [vmem:[%s12721_s1 + $0x1704] ss:$16 sps:$4 sm:$0xff]   ;;  %v9550_v56 = vld [vmem:[%s12721_s1 + $0x170c] ss:$16 sps:$4 sm:$0xff]  }
 0x2a4   :  { %5449 = vmatprep.subr.bf16.mxu0 %v9454_v57  ;;  %6008 = vmatprep.subr.bf16.mxu1 %v9457_v58  ;;  %v9545_v57 = vld [vmem:[%s12721_s1 + $0x1700] ss:$16 sps:$4 sm:$0xff]   ;;  %v9548_v58 = vld [vmem:[%s12721_s1 + $0x1708] ss:$16 sps:$4 sm:$0xff]  }
 0x2a7   :  { %5450 = vmatpush1.bf16.msra.mxu0 %v9452_v59  ;;  %6009 = vmatpush1.bf16.msra.mxu1 %v9455_v60  ;;  %v9553_v59 = vld [vmem:[%s12721_s1 + $0x1724] ss:$16 sps:$4 sm:$0xff]   ;;  %v9556_v60 = vld [vmem:[%s12721_s1 + $0x172c] ss:$16 sps:$4 sm:$0xff]  }
 0x2a8   :  { %5451 = vmatprep.subr.bf16.mxu0 %v9460_v61  ;;  %6010 = vmatprep.subr.bf16.mxu1 %v9463_v62  ;;  %v9551_v61 = vld [vmem:[%s12721_s1 + $0x1720] ss:$16 sps:$4 sm:$0xff]   ;;  %v9554_v62 = vld [vmem:[%s12721_s1 + $0x1728] ss:$16 sps:$4 sm:$0xff]  }
 0x2ab   :  { %5452 = vmatpush1.bf16.msra.mxu0 %v9458_v63  ;;  %6011 = vmatpush1.bf16.msra.mxu1 %v9461_v0  ;;  %v9559_v63 = vld [vmem:[%s12721_s1 + $0x1744] ss:$16 sps:$4 sm:$0xff]   ;;  %v9562_v0 = vld [vmem:[%s12721_s1 + $0x174c] ss:$16 sps:$4 sm:$0xff]  }
 0x2ac   :  { %5453 = vmatprep.subr.bf16.mxu0 %v9466_v1  ;;  %6012 = vmatprep.subr.bf16.mxu1 %v9469_v2  ;;  %v9557_v1 = vld [vmem:[%s12721_s1 + $0x1740] ss:$16 sps:$4 sm:$0xff]   ;;  %v9560_v2 = vld [vmem:[%s12721_s1 + $0x1748] ss:$16 sps:$4 sm:$0xff]  }
 0x2af   :  { %5454 = vmatpush1.bf16.msra.mxu0 %v9464_v3  ;;  %6013 = vmatpush1.bf16.msra.mxu1 %v9467_v4  ;;  %v9565_v3 = vld [vmem:[%s12721_s1 + $0x1764] ss:$16 sps:$4 sm:$0xff]   ;;  %v9568_v4 = vld [vmem:[%s12721_s1 + $0x176c] ss:$16 sps:$4 sm:$0xff]  }
 0x2b0   :  { %5455 = vmatprep.subr.bf16.mxu0 %v9472_v5  ;;  %6014 = vmatprep.subr.bf16.mxu1 %v9475_v6  ;;  %v9563_v5 = vld [vmem:[%s12721_s1 + $0x1760] ss:$16 sps:$4 sm:$0xff]   ;;  %v9566_v6 = vld [vmem:[%s12721_s1 + $0x1768] ss:$16 sps:$4 sm:$0xff]  }
 0x2b3   :  { %5456 = vmatpush1.bf16.msra.mxu0 %v9470_v7  ;;  %6015 = vmatpush1.bf16.msra.mxu1 %v9473_v8  ;;  %v9571_v7 = vld [vmem:[%s12721_s1 + $0x1784] ss:$16 sps:$4 sm:$0xff]   ;;  %v9574_v8 = vld [vmem:[%s12721_s1 + $0x178c] ss:$16 sps:$4 sm:$0xff]  }
 0x2b4   :  { %5457 = vmatprep.subr.bf16.mxu0 %v9478_v9  ;;  %6016 = vmatprep.subr.bf16.mxu1 %v9481_v10  ;;  %v9569_v9 = vld [vmem:[%s12721_s1 + $0x1780] ss:$16 sps:$4 sm:$0xff]   ;;  %v9572_v10 = vld [vmem:[%s12721_s1 + $0x1788] ss:$16 sps:$4 sm:$0xff]  }
 0x2b7   :  { %5458 = vmatpush1.bf16.msra.mxu0 %v9476_v11  ;;  %6017 = vmatpush1.bf16.msra.mxu1 %v9479_v12  ;;  %v9577_v11 = vld [vmem:[%s12721_s1 + $0x17a4] ss:$16 sps:$4 sm:$0xff]   ;;  %v9580_v12 = vld [vmem:[%s12721_s1 + $0x17ac] ss:$16 sps:$4 sm:$0xff]  }
 0x2b8   :  { %5459 = vmatprep.subr.bf16.mxu0 %v9484_v13  ;;  %6018 = vmatprep.subr.bf16.mxu1 %v9487_v14  ;;  %v9575_v13 = vld [vmem:[%s12721_s1 + $0x17a0] ss:$16 sps:$4 sm:$0xff]   ;;  %v9578_v14 = vld [vmem:[%s12721_s1 + $0x17a8] ss:$16 sps:$4 sm:$0xff]  }
 0x2bb   :  { %5460 = vmatpush1.bf16.msra.mxu0 %v9482_v15  ;;  %6019 = vmatpush1.bf16.msra.mxu1 %v9485_v16  ;;  %v9583_v15 = vld [vmem:[%s12721_s1 + $0x17c4] ss:$16 sps:$4 sm:$0xff]   ;;  %v9586_v16 = vld [vmem:[%s12721_s1 + $0x17cc] ss:$16 sps:$4 sm:$0xff]  }
 0x2bc   :  { %5461 = vmatprep.subr.bf16.mxu0 %v9490_v17  ;;  %6020 = vmatprep.subr.bf16.mxu1 %v9493_v18  ;;  %v9581_v17 = vld [vmem:[%s12721_s1 + $0x17c0] ss:$16 sps:$4 sm:$0xff]   ;;  %v9584_v18 = vld [vmem:[%s12721_s1 + $0x17c8] ss:$16 sps:$4 sm:$0xff]  }
 0x2bf   :  { %5462 = vmatpush1.bf16.msra.mxu0 %v9488_v19  ;;  %6021 = vmatpush1.bf16.msra.mxu1 %v9491_v20  ;;  %v9589_v19 = vld [vmem:[%s12721_s1 + $0x17e4] ss:$16 sps:$4 sm:$0xff]   ;;  %v9592_v20 = vld [vmem:[%s12721_s1 + $0x17ec] ss:$16 sps:$4 sm:$0xff]  }
 0x2c0   :  { %5474 = vmatprep.subr.bf16.mxu0 %v9499_v21  ;;  %6033 = vmatprep.subr.bf16.mxu1 %v9502_v22  ;;  %v9587_v21 = vld [vmem:[%s12721_s1 + $0x17e0] ss:$16 sps:$4 sm:$0xff]   ;;  %v9590_v22 = vld [vmem:[%s12721_s1 + $0x17e8] ss:$16 sps:$4 sm:$0xff]  }
 0x2c2   :  { %5464 = vmatmul.mubr.bf16.vlgmr.msra.gmra.mrb[0].mxu0 %v9494_v23  ;;  %6023 = vmatmul.mubr.bf16.vlgmr.msra.gmra.mrb[0].mxu1 %v9494_v23  ;;  %v9598_v23 = vld [vmem:[%s12721_s1 + $0x1804] ss:$16 sps:$4 sm:$0xff]  }
 0x2c3   :  { %5475 = vmatpush1.bf16.msra.mxu0 %v9497_v24  ;;  %6034 = vmatpush1.bf16.msra.mxu1 %v9500_v25  ;;  %v9601_v24 = vld [vmem:[%s12721_s1 + $0x180c] ss:$16 sps:$4 sm:$0xff]  }
 0x2c4   :  { %5476 = vmatprep.subr.bf16.mxu0 %v9505_v26  ;;  %6035 = vmatprep.subr.bf16.mxu1 %v9508_v27  ;;  %v9593_v25 = vld [vmem:[%s12722_s0 + $0x58] ss:$100 sps:$4 sm:$0xff]   ;;  %v9596_v26 = vld [vmem:[%s12721_s1 + $0x1800] ss:$16 sps:$4 sm:$0xff]  }
 0x2c5   :  { %5506 = vmatprep.mubr.bf16.mxu0 %v9595_v28  ;;  %6065 = vmatprep.mubr.bf16.mxu1 %v9595_v28  ;;  %v9599_v27 = vld [vmem:[%s12721_s1 + $0x1808] ss:$16 sps:$4 sm:$0xff]   ;;  %v9604_v28 = vld [vmem:[%s12721_s1 + $0x1824] ss:$16 sps:$4 sm:$0xff]  }
 0x2c7   :  { %5477 = vmatpush1.bf16.msra.mxu0 %v9503_v29  ;;  %6036 = vmatpush1.bf16.msra.mxu1 %v9506_v30  ;;  %v9607_v29 = vld [vmem:[%s12721_s1 + $0x182c] ss:$16 sps:$4 sm:$0xff]   ;;  %v9602_v30 = vld [vmem:[%s12721_s1 + $0x1820] ss:$16 sps:$4 sm:$0xff]  }
 0x2c8   :  { %5478 = vmatprep.subr.bf16.mxu0 %v9511_v31  ;;  %6037 = vmatprep.subr.bf16.mxu1 %v9514_v32  ;;  %v9605_v31 = vld [vmem:[%s12721_s1 + $0x1828] ss:$16 sps:$4 sm:$0xff]   ;;  %v9610_v32 = vld [vmem:[%s12721_s1 + $0x1844] ss:$16 sps:$4 sm:$0xff]  }
 0x2cb   :  { %5479 = vmatpush1.bf16.msra.mxu0 %v9509_v33  ;;  %6038 = vmatpush1.bf16.msra.mxu1 %v9512_v34  ;;  %v9613_v33 = vld [vmem:[%s12721_s1 + $0x184c] ss:$16 sps:$4 sm:$0xff]   ;;  %v9797_v34 = vmov 0  }
 0x2cc   :  { %5480 = vmatprep.subr.bf16.mxu0 %v9517_v35  ;;  %6039 = vmatprep.subr.bf16.mxu1 %v9520_v36  ;;  %v9608_v35 = vld [vmem:[%s12721_s1 + $0x1840] ss:$16 sps:$4 sm:$0xff]   ;;  %v9611_v36 = vld [vmem:[%s12721_s1 + $0x1848] ss:$16 sps:$4 sm:$0xff]  }
 0x2cf   :  { %5481 = vmatpush1.bf16.msra.mxu0 %v9515_v37  ;;  %6040 = vmatpush1.bf16.msra.mxu1 %v9518_v38  ;;  %v9616_v37 = vld [vmem:[%s12721_s1 + $0x1864] ss:$16 sps:$4 sm:$0xff]   ;;  %v9619_v38 = vld [vmem:[%s12721_s1 + $0x186c] ss:$16 sps:$4 sm:$0xff]  }
 0x2d0   :  { %5482 = vmatprep.subr.bf16.mxu0 %v9523_v39  ;;  %6041 = vmatprep.subr.bf16.mxu1 %v9526_v40  ;;  %v9614_v39 = vld [vmem:[%s12721_s1 + $0x1860] ss:$16 sps:$4 sm:$0xff]   ;;  %v9617_v40 = vld [vmem:[%s12721_s1 + $0x1868] ss:$16 sps:$4 sm:$0xff]  }
 0x2d3   :  { %5483 = vmatpush1.bf16.msra.mxu0 %v9521_v41  ;;  %6042 = vmatpush1.bf16.msra.mxu1 %v9524_v42  ;;  %v9622_v41 = vld [vmem:[%s12721_s1 + $0x1884] ss:$16 sps:$4 sm:$0xff]   ;;  %v9625_v42 = vld [vmem:[%s12721_s1 + $0x188c] ss:$16 sps:$4 sm:$0xff]  }
 0x2d4   :  { %5484 = vmatprep.subr.bf16.mxu0 %v9529_v43  ;;  %6043 = vmatprep.subr.bf16.mxu1 %v9532_v44  ;;  %v9620_v43 = vld [vmem:[%s12721_s1 + $0x1880] ss:$16 sps:$4 sm:$0xff]   ;;  %v9623_v44 = vld [vmem:[%s12721_s1 + $0x1888] ss:$16 sps:$4 sm:$0xff]  }
 0x2d7   :  { %5485 = vmatpush1.bf16.msra.mxu0 %v9527_v45  ;;  %6044 = vmatpush1.bf16.msra.mxu1 %v9530_v46  ;;  %v9628_v45 = vld [vmem:[%s12721_s1 + $0x18a4] ss:$16 sps:$4 sm:$0xff]   ;;  %v9631_v46 = vld [vmem:[%s12721_s1 + $0x18ac] ss:$16 sps:$4 sm:$0xff]  }
 0x2d8   :  { %5486 = vmatprep.subr.bf16.mxu0 %v9535_v47  ;;  %6045 = vmatprep.subr.bf16.mxu1 %v9538_v48  ;;  %v9626_v47 = vld [vmem:[%s12721_s1 + $0x18a0] ss:$16 sps:$4 sm:$0xff]   ;;  %v9629_v48 = vld [vmem:[%s12721_s1 + $0x18a8] ss:$16 sps:$4 sm:$0xff]  }
 0x2db   :  { %5487 = vmatpush1.bf16.msra.mxu0 %v9533_v49  ;;  %6046 = vmatpush1.bf16.msra.mxu1 %v9536_v50  ;;  %v9634_v49 = vld [vmem:[%s12721_s1 + $0x18c4] ss:$16 sps:$4 sm:$0xff]   ;;  %v9637_v50 = vld [vmem:[%s12721_s1 + $0x18cc] ss:$16 sps:$4 sm:$0xff]  }
 0x2dc   :  { %5488 = vmatprep.subr.bf16.mxu0 %v9541_v51  ;;  %6047 = vmatprep.subr.bf16.mxu1 %v9544_v52  ;;  %v9632_v51 = vld [vmem:[%s12721_s1 + $0x18c0] ss:$16 sps:$4 sm:$0xff]   ;;  %v9635_v52 = vld [vmem:[%s12721_s1 + $0x18c8] ss:$16 sps:$4 sm:$0xff]  }
 0x2df   :  { %5489 = vmatpush1.bf16.msra.mxu0 %v9539_v53  ;;  %6048 = vmatpush1.bf16.msra.mxu1 %v9542_v54  ;;  %v9640_v53 = vld [vmem:[%s12721_s1 + $0x18e4] ss:$16 sps:$4 sm:$0xff]   ;;  %v9643_v54 = vld [vmem:[%s12721_s1 + $0x18ec] ss:$16 sps:$4 sm:$0xff]  }
 0x2e0   :  { %5490 = vmatprep.subr.bf16.mxu0 %v9547_v55  ;;  %6049 = vmatprep.subr.bf16.mxu1 %v9550_v56  ;;  %v9638_v55 = vld [vmem:[%s12721_s1 + $0x18e0] ss:$16 sps:$4 sm:$0xff]   ;;  %v9641_v56 = vld [vmem:[%s12721_s1 + $0x18e8] ss:$16 sps:$4 sm:$0xff]  }
 0x2e3   :  { %5491 = vmatpush1.bf16.msra.mxu0 %v9545_v57  ;;  %6050 = vmatpush1.bf16.msra.mxu1 %v9548_v58  ;;  %v9647_v57 = vld [vmem:[%s12723_s3 + $0x4] ss:$12 sps:$4 sm:$0xff]   ;;  %v9672_v58 = vld [vmem:[%s12723_s3 + $0xc8] ss:$12 sps:$4 sm:$0xff]  }
 0x2e4   :  { %5492 = vmatprep.subr.bf16.mxu0 %v9553_v59  ;;  %6051 = vmatprep.subr.bf16.mxu1 %v9556_v60  ;;  %v9644_v59 = vld [vmem:[%s12722_s0 + $0x60] ss:$100 sps:$4 sm:$0xff]  }
 0x2e5   :  { %v9645_v60 = vld [vmem:[%s12723_s3] ss:$12 sps:$4 sm:$0xff]  }
 0x2e7   :  { %5493 = vmatpush1.bf16.msra.mxu0 %v9551_v61  ;;  %6052 = vmatpush1.bf16.msra.mxu1 %v9554_v62  ;;  %v9673_v61 = vld [vmem:[%s12723_s3 + $0x8] ss:$12 sps:$4 sm:$0xff]  }
 0x2e8   :  { %5494 = vmatprep.subr.bf16.mxu0 %v9559_v63  ;;  %6053 = vmatprep.subr.bf16.mxu1 %v9562_v0  ;;  %v9650_v62 = vld [vmem:[%s12723_s3 + $0x1c] ss:$12 sps:$4 sm:$0xff]   ;;  %v9677_v63 = vld [vmem:[%s12723_s3 + $0xe0] ss:$12 sps:$4 sm:$0xff]   ;;  %v9648_v0 = vld [vmem:[%s12723_s3 + $0x18] ss:$12 sps:$4 sm:$0xff]  }
 0x2eb   :  { %5495 = vmatpush1.bf16.msra.mxu0 %v9557_v1  ;;  %6054 = vmatpush1.bf16.msra.mxu1 %v9560_v2  ;;  %v9678_v1 = vld [vmem:[%s12723_s3 + $0x20] ss:$12 sps:$4 sm:$0xff]  }
 0x2ec   :  { %5496 = vmatprep.subr.bf16.mxu0 %v9565_v3  ;;  %6055 = vmatprep.subr.bf16.mxu1 %v9568_v4  ;;  %v9653_v2 = vld [vmem:[%s12723_s3 + $0x34] ss:$12 sps:$4 sm:$0xff]   ;;  %v9682_v3 = vld [vmem:[%s12723_s3 + $0xf8] ss:$12 sps:$4 sm:$0xff]   ;;  %v9651_v4 = vld [vmem:[%s12723_s3 + $0x30] ss:$12 sps:$4 sm:$0xff]  }
 0x2ef   :  { %5497 = vmatpush1.bf16.msra.mxu0 %v9563_v5  ;;  %6056 = vmatpush1.bf16.msra.mxu1 %v9566_v6  ;;  %v9683_v5 = vld [vmem:[%s12723_s3 + $0x38] ss:$12 sps:$4 sm:$0xff]  }
 0x2f0   :  { %5498 = vmatprep.subr.bf16.mxu0 %v9571_v7  ;;  %6057 = vmatprep.subr.bf16.mxu1 %v9574_v8  ;;  %v9656_v6 = vld [vmem:[%s12723_s3 + $0x4c] ss:$12 sps:$4 sm:$0xff]   ;;  %v9687_v7 = vld [vmem:[%s12723_s3 + $0x110] ss:$12 sps:$4 sm:$0xff]   ;;  %v9654_v8 = vld [vmem:[%s12723_s3 + $0x48] ss:$12 sps:$4 sm:$0xff]  }
 0x2f3   :  { %5499 = vmatpush1.bf16.msra.mxu0 %v9569_v9  ;;  %6058 = vmatpush1.bf16.msra.mxu1 %v9572_v10  ;;  %v9688_v9 = vld [vmem:[%s12723_s3 + $0x50] ss:$12 sps:$4 sm:$0xff]  }
 0x2f4   :  { %5500 = vmatprep.subr.bf16.mxu0 %v9577_v11  ;;  %6059 = vmatprep.subr.bf16.mxu1 %v9580_v12  ;;  %v9659_v10 = vld [vmem:[%s12723_s3 + $0x64] ss:$12 sps:$4 sm:$0xff]   ;;  %v9692_v11 = vld [vmem:[%s12723_s3 + $0x128] ss:$12 sps:$4 sm:$0xff]   ;;  %v9657_v12 = vld [vmem:[%s12723_s3 + $0x60] ss:$12 sps:$4 sm:$0xff]  }
 0x2f7   :  { %5501 = vmatpush1.bf16.msra.mxu0 %v9575_v13  ;;  %6060 = vmatpush1.bf16.msra.mxu1 %v9578_v14  ;;  %v9693_v13 = vld [vmem:[%s12723_s3 + $0x68] ss:$12 sps:$4 sm:$0xff]  }
 0x2f8   :  { %5502 = vmatprep.subr.bf16.mxu0 %v9583_v15  ;;  %6061 = vmatprep.subr.bf16.mxu1 %v9586_v16  ;;  %v9662_v14 = vld [vmem:[%s12723_s3 + $0x7c] ss:$12 sps:$4 sm:$0xff]   ;;  %v9697_v15 = vld [vmem:[%s12723_s3 + $0x140] ss:$12 sps:$4 sm:$0xff]   ;;  %v9660_v16 = vld [vmem:[%s12723_s3 + $0x78] ss:$12 sps:$4 sm:$0xff]  }
 0x2fb   :  { %5503 = vmatpush1.bf16.msra.mxu0 %v9581_v17  ;;  %6062 = vmatpush1.bf16.msra.mxu1 %v9584_v18  ;;  %v9698_v17 = vld [vmem:[%s12723_s3 + $0x80] ss:$12 sps:$4 sm:$0xff]  }
 0x2fc   :  { %5504 = vmatprep.subr.bf16.mxu0 %v9589_v19  ;;  %6063 = vmatprep.subr.bf16.mxu1 %v9592_v20  ;;  %v9665_v18 = vld [vmem:[%s12723_s3 + $0x94] ss:$12 sps:$4 sm:$0xff]   ;;  %v9663_v19 = vld [vmem:[%s12723_s3 + $0x90] ss:$12 sps:$4 sm:$0xff]   ;;  %v9668_v20 = vld [vmem:[%s12723_s3 + $0xac] ss:$12 sps:$4 sm:$0xff]  }
 0x2ff   :  { %5505 = vmatpush1.bf16.msra.mxu0 %v9587_v21  ;;  %6064 = vmatpush1.bf16.msra.mxu1 %v9590_v22  ;;  %v9666_v21 = vld [vmem:[%s12723_s3 + $0xa8] ss:$12 sps:$4 sm:$0xff]   ;;  %v9671_v22 = vld [vmem:[%s12723_s3 + $0xc4] ss:$12 sps:$4 sm:$0xff]  }
 0x300   :  { %5517 = vmatprep.subr.bf16.mxu0 %v9598_v23  ;;  %6076 = vmatprep.subr.bf16.mxu1 %v9601_v24  ;;  %v9669_v23 = vld [vmem:[%s12723_s3 + $0xc0] ss:$12 sps:$4 sm:$0xff]   ;;  %v9676_v24 = vld [vmem:[%s12723_s3 + $0xdc] ss:$12 sps:$4 sm:$0xff]  }
 0x302   :  { %5507 = vmatmul.mubr.bf16.vlgmr.msra.gmra.mrb[0].mxu0 %v9593_v25  ;;  %6066 = vmatmul.mubr.bf16.vlgmr.msra.gmra.mrb[0].mxu1 %v9593_v25  ;;  %v9674_v25 = vld [vmem:[%s12723_s3 + $0xd8] ss:$12 sps:$4 sm:$0xff]  }
 0x303   :  { %5518 = vmatpush1.bf16.msra.mxu0 %v9596_v26  ;;  %6077 = vmatpush1.bf16.msra.mxu1 %v9599_v27  ;;  %v9681_v26 = vld [vmem:[%s12723_s3 + $0xf4] ss:$12 sps:$4 sm:$0xff]   ;;  %v9679_v27 = vld [vmem:[%s12723_s3 + $0xf0] ss:$12 sps:$4 sm:$0xff]  }
 0x304   :  { %5519 = vmatprep.subr.bf16.mxu0 %v9604_v28  ;;  %6078 = vmatprep.subr.bf16.mxu1 %v9607_v29  ;;  %v9686_v28 = vld [vmem:[%s12723_s3 + $0x10c] ss:$12 sps:$4 sm:$0xff]   ;;  %v9684_v29 = vld [vmem:[%s12723_s3 + $0x108] ss:$12 sps:$4 sm:$0xff]  }
 0x305   :  { %5549 = vmatprep.mubr.bf16.mxu0 %v9797_v34  ;;  %6108 = vmatprep.mubr.bf16.mxu1 %v9797_v34  ;;  %v9701_v34 = vld [vmem:[%s12723_s3 + $0x154] ss:$12 sps:$4 sm:$0xff]  }
 0x307   :  { %5520 = vmatpush1.bf16.msra.mxu0 %v9602_v30  ;;  %6079 = vmatpush1.bf16.msra.mxu1 %v9605_v31  ;;  %v9691_v30 = vld [vmem:[%s12723_s3 + $0x124] ss:$12 sps:$4 sm:$0xff]   ;;  %v9689_v31 = vld [vmem:[%s12723_s3 + $0x120] ss:$12 sps:$4 sm:$0xff]  }
 0x308   :  { %5521 = vmatprep.subr.bf16.mxu0 %v9610_v32  ;;  %6080 = vmatprep.subr.bf16.mxu1 %v9613_v33  ;;  %v9696_v32 = vld [vmem:[%s12723_s3 + $0x13c] ss:$12 sps:$4 sm:$0xff]   ;;  %v9694_v33 = vld [vmem:[%s12723_s3 + $0x138] ss:$12 sps:$4 sm:$0xff]  }
 0x30b   :  { %5522 = vmatpush1.bf16.msra.mxu0 %v9608_v35  ;;  %6081 = vmatpush1.bf16.msra.mxu1 %v9611_v36  ;;  %v9702_v35 = vld [vmem:[%s12723_s3 + $0x158] ss:$12 sps:$4 sm:$0xff]   ;;  %v9699_v36 = vld [vmem:[%s12723_s3 + $0x150] ss:$12 sps:$4 sm:$0xff]  }
 0x30c   :  { %5523 = vmatprep.subr.bf16.mxu0 %v9616_v37  ;;  %6082 = vmatprep.subr.bf16.mxu1 %v9619_v38  ;;  %v9703_v37 = vld [vmem:[%s12723_s3 + $0x98] ss:$12 sps:$4 sm:$0xff]  }
 0x30d   :  { %v9706_v38 = vld [vmem:[%s12723_s3 + $0x16c] ss:$12 sps:$4 sm:$0xff]  }
 0x30f   :  { %5524 = vmatpush1.bf16.msra.mxu0 %v9614_v39  ;;  %6083 = vmatpush1.bf16.msra.mxu1 %v9617_v40  ;;  %v9707_v39 = vld [vmem:[%s12723_s3 + $0x170] ss:$12 sps:$4 sm:$0xff]   ;;  %v9704_v40 = vld [vmem:[%s12723_s3 + $0x168] ss:$12 sps:$4 sm:$0xff]  }
 0x310   :  { %5525 = vmatprep.subr.bf16.mxu0 %v9622_v41  ;;  %6084 = vmatprep.subr.bf16.mxu1 %v9625_v42  ;;  %v9708_v41 = vld [vmem:[%s12723_s3 + $0xb0] ss:$12 sps:$4 sm:$0xff]  }
 0x311   :  { %v9711_v42 = vld [vmem:[%s12723_s3 + $0x184] ss:$12 sps:$4 sm:$0xff]  }
 0x313   :  { %5526 = vmatpush1.bf16.msra.mxu0 %v9620_v43  ;;  %6085 = vmatpush1.bf16.msra.mxu1 %v9623_v44  ;;  %v9712_v43 = vld [vmem:[%s12723_s3 + $0x248] ss:$12 sps:$4 sm:$0xff]   ;;  %v855_v44 = vlaneseq }
 0x314   :  { %5527 = vmatprep.subr.bf16.mxu0 %v9628_v45  ;;  %6086 = vmatprep.subr.bf16.mxu1 %v9631_v46 }
 0x315   :  { %v12465_v45 = vshrl.u32 %v855_v44, 7  ;;  %v9743_v44 = vld [vmem:[%s12723_s3 + $0x218] ss:$12 sps:$4 sm:$0xff]  }
 0x317   :  { %5528 = vmatpush1.bf16.msra.mxu0 %v9626_v47  ;;  %6087 = vmatpush1.bf16.msra.mxu1 %v9629_v48  ;;  %v857_v46 = vsub.s32 0, %v12465_v45  ;;  %v865_v47 = vsub.s32 2, %v12465_v45  ;;  %v853_v48 = vld [vmem:[%s12724_s2] sm:$0xf] }
 0x318   :  { %5529 = vmatprep.subr.bf16.mxu0 %v9634_v49  ;;  %6088 = vmatprep.subr.bf16.mxu1 %v9637_v50  ;;  %v861_v49 = vsub.s32 1, %v12465_v45  ;;  %v869_v50 = vsub.s32 3, %v12465_v45  ;;  %v9790_v45 = vld [vmem:[%s12725_s5 + $0x88] sm:$0xff]  }
 0x31b   :  { %5530 = vmatpush1.bf16.msra.mxu0 %v9632_v51  ;;  %6089 = vmatpush1.bf16.msra.mxu1 %v9635_v52  ;;  %v858_v51 = vrot.slane %v853_v48, %v857_v46  ;;  %v866_v52 = vrot.slane %v853_v48, %v865_v47 }
 0x31c   :  { %5531 = vmatprep.subr.bf16.mxu0 %v9640_v53  ;;  %6090 = vmatprep.subr.bf16.mxu1 %v9643_v54  ;;  %v862_v53 = vrot.slane %v853_v48, %v861_v49  ;;  %v870_v54 = vrot.slane %v853_v48, %v869_v50  ;;  %v9746_v48 = vld [vmem:[%s12723_s3 + $0x22c] ss:$12 sps:$4 sm:$0xff]   ;;  %v9747_v50 = vld [vmem:[%s12723_s3 + $0x2f0] ss:$12 sps:$4 sm:$0xff]  }
 0x31f   :  { %5532 = vmatpush1.bf16.msra.mxu0 %v9638_v55  ;;  %6091 = vmatpush1.bf16.msra.mxu1 %v9641_v56 }
 0x320   :  { %6788 = vmatprep.subr.bf16.mxu0 %v9647_v57  ;;  %8198 = vmatprep.subr.bf16.mxu1 %v9672_v58 }
 0x322   :  { %5550 = vmatmul.mubr.bf16.vlgmr.msra.gmra.mrb[0].mxu0 %v9644_v59  ;;  %6109 = vmatmul.mubr.bf16.vlgmr.msra.gmra.mrb[0].mxu1 %v9644_v59 }
 0x323   :  { %6789 = vmatpush1.bf16.msra.mxu0 %v9645_v60  ;;  %8199 = vmatpush3.bf16.msra.mxu1 %v9673_v61 }
 0x324   :  { %6790 = vmatprep.subr.bf16.mxu0 %v9650_v62  ;;  %8200 = vmatprep.subr.bf16.mxu1 %v9677_v63 }
 0x327   :  { %6791 = vmatpush1.bf16.msra.mxu0 %v9648_v0  ;;  %8201 = vmatpush3.bf16.msra.mxu1 %v9678_v1 }
 0x328   :  { %6792 = vmatprep.subr.bf16.mxu0 %v9653_v2  ;;  %8202 = vmatprep.subr.bf16.mxu1 %v9682_v3 }
 0x32b   :  { %6793 = vmatpush1.bf16.msra.mxu0 %v9651_v4  ;;  %8203 = vmatpush3.bf16.msra.mxu1 %v9683_v5 }
 0x32c   :  { %6794 = vmatprep.subr.bf16.mxu0 %v9656_v6  ;;  %8204 = vmatprep.subr.bf16.mxu1 %v9687_v7 }
 0x32f   :  { %6795 = vmatpush1.bf16.msra.mxu0 %v9654_v8  ;;  %8205 = vmatpush3.bf16.msra.mxu1 %v9688_v9 }
 0x330   :  { %6796 = vmatprep.subr.bf16.mxu0 %v9659_v10  ;;  %8206 = vmatprep.subr.bf16.mxu1 %v9692_v11 }
 0x333   :  { %6797 = vmatpush1.bf16.msra.mxu0 %v9657_v12  ;;  %8207 = vmatpush3.bf16.msra.mxu1 %v9693_v13 }
 0x334   :  { %6798 = vmatprep.subr.bf16.mxu0 %v9662_v14  ;;  %8208 = vmatprep.subr.bf16.mxu1 %v9697_v15 }
 0x337   :  { %6799 = vmatpush1.bf16.msra.mxu0 %v9660_v16  ;;  %8209 = vmatpush3.bf16.msra.mxu1 %v9698_v17 }
 0x338   :  { %6800 = vmatprep.subr.bf16.mxu0 %v9665_v18  ;;  %8210 = vmatprep.subr.bf16.mxu1 %v9702_v35  ;;  %v9729_v35 = vld [vmem:[%s12723_s3 + $0x1e0] ss:$12 sps:$4 sm:$0xff]  }
 0x33b   :  { %6801 = vmatpush1.bf16.msra.mxu0 %v9663_v19  ;;  %8211 = vmatpush3.bf16.msra.mxu1 %v9703_v37  ;;  %v9709_v19 = vld [vmem:[%s12723_s3 + $0x180] ss:$12 sps:$4 sm:$0xff]   ;;  %v9736_v37 = vld [vmem:[%s12723_s3 + $0x1fc] ss:$12 sps:$4 sm:$0xff]  }
 0x33c   :  { %6802 = vmatprep.subr.bf16.mxu0 %v9668_v20  ;;  %8212 = vmatprep.subr.bf16.mxu1 %v9707_v39  ;;  %v9713_v20 = vld [vmem:[%s12723_s3 + $0x188] ss:$12 sps:$4 sm:$0xff]   ;;  %v9734_v39 = vld [vmem:[%s12723_s3 + $0x1f8] ss:$12 sps:$4 sm:$0xff]  }
 0x33f   :  { %6803 = vmatpush1.bf16.msra.mxu0 %v9666_v21  ;;  %8213 = vmatpush3.bf16.msra.mxu1 %v9708_v41  ;;  %v9716_v21 = vld [vmem:[%s12723_s3 + $0x19c] ss:$12 sps:$4 sm:$0xff]   ;;  %v9741_v41 = vld [vmem:[%s12723_s3 + $0x214] ss:$12 sps:$4 sm:$0xff]  }
 0x340   :  { %6804 = vmatprep.subr.bf16.mxu0 %v9671_v22  ;;  %8220 = vmatprep.subr.bf16.mxu1 %v9712_v43  ;;  %v9717_v22 = vld [vmem:[%s12723_s3 + $0x260] ss:$12 sps:$4 sm:$0xff]   ;;  %v9739_v43 = vld [vmem:[%s12723_s3 + $0x210] ss:$12 sps:$4 sm:$0xff]  }
 0x343   :  { %6805 = vmatpush1.bf16.msra.mxu0 %v9669_v23  ;;  %v9714_v23 = vld [vmem:[%s12723_s3 + $0x198] ss:$12 sps:$4 sm:$0xff]  }
 0x344   :  { %6806 = vmatprep.subr.bf16.mxu0 %v9676_v24  ;;  %v9718_v24 = vld [vmem:[%s12723_s3 + $0x1a0] ss:$12 sps:$4 sm:$0xff]  }
 0x347   :  { %6807 = vmatpush1.bf16.msra.mxu0 %v9674_v25  ;;  %v9721_v25 = vld [vmem:[%s12723_s3 + $0x1b4] ss:$12 sps:$4 sm:$0xff]  }
 0x348   :  { %6808 = vmatprep.subr.bf16.mxu0 %v9681_v26  ;;  %v9722_v26 = vld [vmem:[%s12723_s3 + $0x278] ss:$12 sps:$4 sm:$0xff]  }
 0x34b   :  { %6809 = vmatpush1.bf16.msra.mxu0 %v9679_v27  ;;  %v9719_v27 = vld [vmem:[%s12723_s3 + $0x1b0] ss:$12 sps:$4 sm:$0xff]  }
 0x34c   :  { %6810 = vmatprep.subr.bf16.mxu0 %v9686_v28  ;;  %v9723_v28 = vld [vmem:[%s12723_s3 + $0x1b8] ss:$12 sps:$4 sm:$0xff]  }
 0x34f   :  { %6811 = vmatpush1.bf16.msra.mxu0 %v9684_v29  ;;  %v9726_v29 = vld [vmem:[%s12723_s3 + $0x1cc] ss:$12 sps:$4 sm:$0xff]  }
 0x350   :  { %6812 = vmatprep.subr.bf16.mxu0 %v9691_v30  ;;  %v9727_v30 = vld [vmem:[%s12723_s3 + $0x290] ss:$12 sps:$4 sm:$0xff]  }
 0x353   :  { %6813 = vmatpush1.bf16.msra.mxu0 %v9689_v31  ;;  %v9724_v31 = vld [vmem:[%s12723_s3 + $0x1c8] ss:$12 sps:$4 sm:$0xff]  }
 0x354   :  { %6814 = vmatprep.subr.bf16.mxu0 %v9696_v32  ;;  %v9728_v32 = vld [vmem:[%s12723_s3 + $0x1d0] ss:$12 sps:$4 sm:$0xff]  }
 0x357   :  { %6815 = vmatpush1.bf16.msra.mxu0 %v9694_v33  ;;  %v9731_v33 = vld [vmem:[%s12723_s3 + $0x1e4] ss:$12 sps:$4 sm:$0xff]  }
 0x358   :  { %6816 = vmatprep.subr.bf16.mxu0 %v9701_v34  ;;  %v9732_v34 = vld [vmem:[%s12723_s3 + $0x2a8] ss:$12 sps:$4 sm:$0xff]  }
 0x35b   :  { %6817 = vmatpush1.bf16.msra.mxu0 %v9699_v36  ;;  %v9733_v36 = vld [vmem:[%s12723_s3 + $0x1e8] ss:$12 sps:$4 sm:$0xff]  }
 0x35c   :  { %6818 = vmatprep.subr.bf16.mxu0 %v9706_v38  ;;  %v9737_v38 = vld [vmem:[%s12723_s3 + $0x2c0] ss:$12 sps:$4 sm:$0xff]  }
 0x35f   :  { %6819 = vmatpush1.bf16.msra.mxu0 %v9704_v40  ;;  %v9738_v40 = vld [vmem:[%s12723_s3 + $0x200] ss:$12 sps:$4 sm:$0xff]  }
 0x360   :  { %6831 = vmatprep.subr.bf16.mxu0 %v9711_v42  ;;  %v9742_v42 = vld [vmem:[%s12723_s3 + $0x2d8] ss:$12 sps:$4 sm:$0xff]  }
 0x3f5   :  { %v5551_v55 = vpop.f32.mrb[0].mxu0  ;;  %v6110_v56 = vpop.f32.mrb[0].mxu1 }
 0x3f6   :  { %v8293_v57 = vadd.f32 %v5551_v55, %v858_v51  ;;  %v8297_v58 = vadd.f32 %v6110_v56, %v866_v52  ;;  %v5553_v59 = vpop.f32.mrb[1].mxu0  ;;  %v6112_v60 = vpop.f32.mrb[1].mxu1  ;;  %v9754_v55 = vld [vmem:[%s12723_s3 + $0x25c] ss:$12 sps:$4 sm:$0xff]   ;;  %v9752_v56 = vld [vmem:[%s12723_s3 + $0x258] ss:$12 sps:$4 sm:$0xff]  }
 0x3f7   :  { %v8294_v61 = vadd.f32 %v5553_v59, %v862_v53  ;;  %v8298_v62 = vadd.f32 %v6112_v60, %v870_v54  ;;  %v5555_v63 = vpop.f32.mrb[2].mxu0  ;;  %v6114_v0 = vpop.f32.mrb[2].mxu1  ;;  %v9760_v59 = vld [vmem:[%s12723_s3 + $0x28c] ss:$12 sps:$4 sm:$0xff]   ;;  %v9758_v60 = vld [vmem:[%s12723_s3 + $0x288] ss:$12 sps:$4 sm:$0xff]  }
 0x3f8   :  { %v8295_v1 = vadd.f32 %v5555_v63, %v858_v51  ;;  %v8299_v2 = vadd.f32 %v6114_v0, %v866_v52  ;;  %v5557_v3 = vpop.f32.mrb[3].mxu0  ;;  %v6116_v4 = vpop.f32.mrb[3].mxu1  ;;  %v6119_v7 = vmax.f32 %v8293_v57, 0.0  ;;  %v6121_v8 = vmax.f32 %v8297_v58, 0.0  ;;  %v9744_v51 = vld [vmem:[%s12723_s3 + $0x228] ss:$12 sps:$4 sm:$0xff]  }
 0x3f9   :  { %v8296_v5 = vadd.f32 %v5557_v3, %v862_v53  ;;  %v8300_v6 = vadd.f32 %v6116_v4, %v870_v54  ;;  %v6120_v11 = vmax.f32 %v8294_v61, 0.0  ;;  %v6122_v12 = vmax.f32 %v8298_v62, 0.0  ;;  %v9748_v52 = vld [vmem:[%s12723_s3 + $0x230] ss:$12 sps:$4 sm:$0xff]   ;;  %v9749_v54 = vld [vmem:[%s12723_s3 + $0x240] ss:$12 sps:$4 sm:$0xff]  }
 0x3fa   :  { %v6123_v9 = vmax.f32 %v8295_v1, 0.0  ;;  %v6125_v10 = vmax.f32 %v8299_v2, 0.0  ;;  %v9751_v53 = vld [vmem:[%s12723_s3 + $0x244] ss:$12 sps:$4 sm:$0xff]   ;;  %v9757_v57 = vld [vmem:[%s12723_s3 + $0x274] ss:$12 sps:$4 sm:$0xff]  }
 0x3fb   :  { %v6124_v13 = vmax.f32 %v8296_v5, 0.0  ;;  %v6126_v14 = vmax.f32 %v8300_v6, 0.0  ;;  %v9755_v58 = vld [vmem:[%s12723_s3 + $0x270] ss:$12 sps:$4 sm:$0xff]   ;;  %v9761_v62 = vld [vmem:[%s12723_s3 + $0x2a0] ss:$12 sps:$4 sm:$0xff]  }
 0x3fc   :  { %v6127_v15 = vpack.c.bf16 %v6123_v9, %v6119_v7  ;;  %v12480_v16 = vpack.c.bf16 %v6125_v10, %v6121_v8  ;;  %v9763_v61 = vld [vmem:[%s12723_s3 + $0x2a4] ss:$12 sps:$4 sm:$0xff]   ;;  %v9766_v63 = vld [vmem:[%s12723_s3 + $0x2bc] ss:$12 sps:$4 sm:$0xff]   ;;  %v9769_v1 = vld [vmem:[%s12723_s3 + $0x2d4] ss:$12 sps:$4 sm:$0xff]  }
 0x3fd   :  { %v6128_v17 = vpack.c.bf16 %v6124_v13, %v6120_v11  ;;  %v6130_v18 = vpack.c.bf16 %v6126_v14, %v6122_v12  ;;  %v9764_v0 = vld [vmem:[%s12723_s3 + $0x2b8] ss:$12 sps:$4 sm:$0xff]   ;;  %v9767_v2 = vld [vmem:[%s12723_s3 + $0x2d0] ss:$12 sps:$4 sm:$0xff]   ;;  %v9770_v4 = vld [vmem:[%s12723_s3 + $0x2e8] ss:$12 sps:$4 sm:$0xff]  }
 0x3fe   :  { %v9772_v3 = vld [vmem:[%s12723_s3 + $0x2ec] ss:$12 sps:$4 sm:$0xff]   ;;  %v9773_v5 = vld [vmem:[%s12725_s5 + $0x40] sm:$0xff]   ;;  %v9777_v9 = vld [vmem:[%s12725_s5 + $0x50] sm:$0xff]  }
 0x3ff   :  { %6820 = vmatprep.mubr.bf16.mxu0 %v6128_v17  ;;  %6906 = vmatprep.mubr.bf16.mxu1 %v6128_v17  ;;  %v9774_v6 = vld [vmem:[%s12725_s5] sm:$0xff]   ;;  %v9775_v7 = vld [vmem:[%s12725_s5 + $0x48] sm:$0xff]   ;;  %v9778_v10 = vld [vmem:[%s12725_s5 + $0x10] sm:$0xff]  }
 0x400   :  { %6821 = vmatmul.mubr.bf16.vlgmr.msra.gmra.mrb[4].mxu0 %v6127_v15  ;;  %6907 = vmatmul.mubr.bf16.vlgmr.msra.gmra.mrb[4].mxu1 %v6127_v15  ;;  %v9776_v8 = vld [vmem:[%s12725_s5 + $0x8] sm:$0xff]   ;;  %v9779_v11 = vld [vmem:[%s12725_s5 + $0x58] sm:$0xff]   ;;  %v9781_v13 = vld [vmem:[%s12725_s5 + $0x60] sm:$0xff]  }
 0x401   :  { %6832 = vmatpush1.bf16.msra.mxu0 %v9709_v19  ;;  %8221 = vmatpush3.bf16.msra.mxu1 %v9713_v20  ;;  %v9780_v12 = vld [vmem:[%s12725_s5 + $0x18] sm:$0xff]   ;;  %v9782_v14 = vld [vmem:[%s12725_s5 + $0x20] sm:$0xff]   ;;  %v9783_v15 = vld [vmem:[%s12725_s5 + $0x68] sm:$0xff]  }
 0x402   :  { %6863 = vmatprep.mubr.bf16.mxu0 %v6130_v18  ;;  %6947 = vmatprep.mubr.bf16.mxu1 %v6130_v18  ;;  %v9785_v17 = vld [vmem:[%s12725_s5 + $0x70] sm:$0xff]   ;;  %v9787_v19 = vld [vmem:[%s12725_s5 + $0x78] sm:$0xff]  }
 0x403   :  { %6833 = vmatprep.subr.bf16.mxu0 %v9716_v21  ;;  %8222 = vmatprep.subr.bf16.mxu1 %v9717_v22  ;;  %v9786_v18 = vld [vmem:[%s12725_s5 + $0x30] sm:$0xff]   ;;  %v9788_v20 = vld [vmem:[%s12725_s5 + $0x38] sm:$0xff]   ;;  %v9798_v21 = vmov 0.0  }
 0x405   :  { %6834 = vmatpush1.bf16.msra.mxu0 %v9714_v23  ;;  %8223 = vmatpush3.bf16.msra.mxu1 %v9718_v24 }
 0x406   :  { %6835 = vmatprep.subr.bf16.mxu0 %v9721_v25  ;;  %8224 = vmatprep.subr.bf16.mxu1 %v9722_v26 }
 0x409   :  { %6836 = vmatpush1.bf16.msra.mxu0 %v9719_v27  ;;  %8225 = vmatpush3.bf16.msra.mxu1 %v9723_v28  ;;  %v6259_v28 = vld [vmem:[%s12726_s4] sm:$0x7] }
 0x40a   :  { %6837 = vmatprep.subr.bf16.mxu0 %v9726_v29  ;;  %8226 = vmatprep.subr.bf16.mxu1 %v9727_v30  ;;  %v6272_v29 = vrot.slane %v6259_v28, %v865_v47 }
 0x40d   :  { %6838 = vmatpush1.bf16.msra.mxu0 %v9724_v31  ;;  %8227 = vmatpush3.bf16.msra.mxu1 %v9728_v32 }
 0x40e   :  { %6839 = vmatprep.subr.bf16.mxu0 %v9731_v33  ;;  %8228 = vmatprep.subr.bf16.mxu1 %v9732_v34 }
 0x411   :  { %6840 = vmatpush1.bf16.msra.mxu0 %v9729_v35  ;;  %8229 = vmatpush3.bf16.msra.mxu1 %v9733_v36 }
 0x412   :  { %6841 = vmatprep.subr.bf16.mxu0 %v9736_v37  ;;  %8230 = vmatprep.subr.bf16.mxu1 %v9737_v38 }
 0x415   :  { %6842 = vmatpush1.bf16.msra.mxu0 %v9734_v39  ;;  %8231 = vmatpush3.bf16.msra.mxu1 %v9738_v40 }
 0x416   :  { %6843 = vmatprep.subr.bf16.mxu0 %v9741_v41  ;;  %8232 = vmatprep.subr.bf16.mxu1 %v9742_v42 }
 0x419   :  { %6844 = vmatpush1.bf16.msra.mxu0 %v9739_v43  ;;  %8233 = vmatpush3.bf16.msra.mxu1 %v9743_v44  ;;  %v6264_v43 = vrot.slane %v6259_v28, %v857_v46  ;;  %v6268_v44 = vrot.slane %v6259_v28, %v861_v49  ;;  %v9789_v46 = vld [vmem:[%s12725_s5 + $0x80] sm:$0xff]   ;;  %v9791_v49 = vld [vmem:[%s12725_s5 + $0x90] sm:$0xff]  }
 0x41a   :  { %6845 = vmatprep.subr.bf16.mxu0 %v9746_v48  ;;  %8234 = vmatprep.subr.bf16.mxu1 %v9747_v50 }
 0x41d   :  { %6846 = vmatpush1.bf16.msra.mxu0 %v9744_v51  ;;  %8235 = vmatpush3.bf16.msra.mxu1 %v9748_v52 }
 0x41e   :  { %6847 = vmatprep.subr.bf16.mxu0 %v9751_v53  ;;  %8242 = vmatprep.subr.bf16.mxu1 %v9773_v5 }
 0x420   :  { %6948 = vmatmul.mubr.bf16.vlgmr.msra.gmra.mrb[8].mxu1 %v12480_v16 }
 0x421   :  { %6848 = vmatpush1.bf16.msra.mxu0 %v9749_v54  ;;  %8243 = vmatpush3.bf16.msra.mxu1 %v9774_v6 }
 0x422   :  { %6849 = vmatprep.subr.bf16.mxu0 %v9754_v55  ;;  %8244 = vmatprep.subr.bf16.mxu1 %v9775_v7 }
 0x425   :  { %6850 = vmatpush1.bf16.msra.mxu0 %v9752_v56  ;;  %8245 = vmatpush3.bf16.msra.mxu1 %v9776_v8 }
 0x426   :  { %6851 = vmatprep.subr.bf16.mxu0 %v9757_v57  ;;  %8246 = vmatprep.subr.bf16.mxu1 %v9777_v9  ;;  %v8173_v9 = vld [vmem:[%s12727_s6] ss:$0 sm:$0xff] }
 0x429   :  { %6852 = vmatpush1.bf16.msra.mxu0 %v9755_v58  ;;  %8247 = vmatpush3.bf16.msra.mxu1 %v9778_v10 }
 0x42a   :  { %6853 = vmatprep.subr.bf16.mxu0 %v9760_v59  ;;  %8248 = vmatprep.subr.bf16.mxu1 %v9779_v11 }
 0x42d   :  { %6854 = vmatpush1.bf16.msra.mxu0 %v9758_v60  ;;  %8249 = vmatpush3.bf16.msra.mxu1 %v9780_v12 }
 0x42e   :  { %6855 = vmatprep.subr.bf16.mxu0 %v9763_v61  ;;  %8250 = vmatprep.subr.bf16.mxu1 %v9781_v13 }
 0x431   :  { %6856 = vmatpush1.bf16.msra.mxu0 %v9761_v62  ;;  %8251 = vmatpush3.bf16.msra.mxu1 %v9782_v14  ;;  %v9792_v62 = vld [vmem:[%s12725_s5 + $0x98] sm:$0xff]  }
 0x432   :  { %6857 = vmatprep.subr.bf16.mxu0 %v9766_v63  ;;  %8252 = vmatprep.subr.bf16.mxu1 %v9783_v15  ;;  %v9793_v63 = vld [vmem:[%s12725_s5 + $0xa0] sm:$0xff]  }
 0x435   :  { %6858 = vmatpush1.bf16.msra.mxu0 %v9764_v0  ;;  %v9794_v0 = vld [vmem:[%s12725_s5 + $0xa8] sm:$0xff]  }
 0x436   :  { %6859 = vmatprep.subr.bf16.mxu0 %v9769_v1  ;;  %v9795_v1 = vld [vmem:[%s12725_s5 + $0xb0] sm:$0xff]  }
 0x439   :  { %6860 = vmatpush1.bf16.msra.mxu0 %v9767_v2  ;;  %v9796_v2 = vld [vmem:[%s12725_s5 + $0xb8] sm:$0xff]  }
 0x43a   :  { %6861 = vmatprep.subr.bf16.mxu0 %v9772_v3 }
 0x43d   :  { %6862 = vmatpush1.bf16.msra.mxu0 %v9770_v4 }
 0x440   :  { %6864 = vmatmul.mubr.bf16.vlgmr.msra.gmra.mrb[4].mxu0 %v12480_v16  ;;  %v9784_v16 = vld [vmem:[%s12725_s5 + $0x28] sm:$0xff]  }
 0x441   :  { %8253 = vmatpush3.bf16.msra.mxu1 %v9784_v16 }
 0x442   :  { %8254 = vmatprep.subr.bf16.mxu1 %v9785_v17 }
 0x445   :  { %8255 = vmatpush3.bf16.msra.mxu1 %v9786_v18 }
 0x446   :  { %8256 = vmatprep.subr.bf16.mxu1 %v9787_v19 }
 0x449   :  { %8257 = vmatpush3.bf16.msra.mxu1 %v9788_v20 }
 0x44a   :  { %8273 = vmatprep.subr.bf16.mxu1 %v9798_v21 }
 0x4d3   :  { %v8214_v22 = vpop.f32.mrb[4].mxu1 }
 0x4d4   :  { %v8215_v23 = vpop.f32.mrb[5].mxu1 }
 0x4d5   :  { %v8216_v24 = vadd.f32 %v8215_v23, %v8214_v22  ;;  %v8217_v25 = vpop.f32.mrb[6].mxu1 }
 0x4d6   :  { %v8218_v26 = vpop.f32.mrb[7].mxu1 }
 0x4d7   :  { %v8219_v27 = vadd.f32 %v8218_v26, %v8217_v25  ;;  %v6909_v32 = vadd.f32 %v8216_v24, %v6272_v29 }
 0x4d9   :  { %v6912_v36 = vadd.f32 %v8219_v27, %v6272_v29 }
 0x4f3   :  { %v8236_v30 = vpop.f32.mrb[8].mxu1 }
 0x4f4   :  { %v8237_v31 = vpop.f32.mrb[9].mxu1 }
 0x4f5   :  { %v8238_v33 = vadd.f32 %v8237_v31, %v8236_v30  ;;  %v8239_v34 = vpop.f32.mrb[10].mxu1 }
 0x4f6   :  { %v8240_v35 = vpop.f32.mrb[11].mxu1 }
 0x4f7   :  { %v6950_v37 = vadd.f32 %v8238_v33, %v6909_v32  ;;  %v8241_v38 = vadd.f32 %v8240_v35, %v8239_v34 }
 0x4f9   :  { %v6953_v39 = vadd.f32 %v8241_v38, %v6912_v36  ;;  %v6958_v40 = vmax.f32 %v6950_v37, 0.0 }
 0x4fb   :  { %v6961_v41 = vmax.f32 %v6953_v39, 0.0 }
 0x4fd   :  { %v6964_v42 = vpack.c.bf16 %v6961_v41, %v6958_v40 }
 0x513   :  { %v6865_v47 = vpop.f32.mrb[4].mxu0 }
 0x514   :  { %v8301_v48 = vadd.f32 %v6865_v47, %v6264_v43  ;;  %v6867_v50 = vpop.f32.mrb[5].mxu0 }
 0x515   :  { %v8302_v51 = vadd.f32 %v6867_v50, %v6268_v44  ;;  %v6869_v52 = vpop.f32.mrb[6].mxu0 }
 0x516   :  { %v8303_v53 = vadd.f32 %v6869_v52, %v6264_v43  ;;  %v6871_v54 = vpop.f32.mrb[7].mxu0  ;;  %v6956_v56 = vmax.f32 %v8301_v48, 0.0 }
 0x517   :  { %v8304_v55 = vadd.f32 %v6871_v54, %v6268_v44  ;;  %v6957_v58 = vmax.f32 %v8302_v51, 0.0 }
 0x518   :  { %v6959_v57 = vmax.f32 %v8303_v53, 0.0 }
 0x519   :  { %v6960_v59 = vmax.f32 %v8304_v55, 0.0 }
 0x51a   :  { %v6962_v60 = vpack.c.bf16 %v6959_v57, %v6956_v56 }
 0x51b   :  { %v6963_v61 = vpack.c.bf16 %v6960_v59, %v6957_v58 }
 0x51d   :  { %7196 = vmatprep.mubr.bf16.mxu1 %v6963_v61 }
 0x51e   :  { %7197 = vmatmul.mubr.bf16.vlgmr.msra.gmra.mrb[12].mxu1 %v6962_v60 }
 0x51f   :  { %8274 = vmatpush3.bf16.msra.mxu1 %v9789_v46  ;;  %8289 = vmatprep.mubr.msk.bf16.mxu1 %vm9799_vm0, %v9798_v21 }
 0x520   :  { %8275 = vmatprep.subr.bf16.mxu1 %v9798_v21 }
 0x523   :  { %8276 = vmatpush3.bf16.msra.mxu1 %v9790_v45 }
 0x524   :  { %8277 = vmatprep.subr.bf16.mxu1 %v9798_v21 }
 0x527   :  { %8278 = vmatpush3.bf16.msra.mxu1 %v9791_v49 }
 0x528   :  { %8279 = vmatprep.subr.bf16.mxu1 %v9798_v21 }
 0x52b   :  { %8280 = vmatpush3.bf16.msra.mxu1 %v9792_v62 }
 0x52c   :  { %8281 = vmatprep.subr.bf16.mxu1 %v9798_v21 }
 0x52f   :  { %8282 = vmatpush3.bf16.msra.mxu1 %v9793_v63 }
 0x530   :  { %8283 = vmatprep.subr.bf16.mxu1 %v9798_v21 }
 0x533   :  { %8284 = vmatpush3.bf16.msra.mxu1 %v9794_v0 }
 0x534   :  { %8285 = vmatprep.subr.bf16.mxu1 %v9798_v21 }
 0x537   :  { %8286 = vmatpush3.bf16.msra.mxu1 %v9795_v1 }
 0x538   :  { %8287 = vmatprep.subr.bf16.mxu1 %v9798_v21 }
 0x53b   :  { %8288 = vmatpush3.bf16.msra.mxu1 %v9796_v2 }
 0x53e   :  { %8290 = vmatmul.mubr.bf16.vlgmr.msra.gmra.mrb[16].mxu1 %v6964_v42 }
 0x5f1   :  { %v8258_v3 = vpop.f32.mrb[12].mxu1 }
 0x5f2   :  { %v8259_v4 = vpop.f32.mrb[13].mxu1 }
 0x5f3   :  { %v8260_v5 = vadd.f32 %v8259_v4, %v8258_v3  ;;  %v8261_v6 = vpop.f32.mrb[14].mxu1 }
 0x5f4   :  { %v8262_v7 = vpop.f32.mrb[15].mxu1 }
 0x5f5   :  { %v8263_v8 = vadd.f32 %v8262_v7, %v8261_v6  ;;  %v7199_v10 = vadd.f32 %v8260_v5, %v8173_v9 }
 0x5f7   :  { %v7202_v14 = vadd.f32 %v8263_v8, %v8173_v9 }
 0x611   :  { %v7239_v11 = vpop.f32.mrb[16].mxu1 }
 0x612   :  { %v7240_v12 = vadd.f32 %v7239_v11, %v7199_v10  ;;  %v8291_v13 = vpop.f32.mrb[17].mxu1 }
 0x613   :  { %v7242_v15 = vpop.f32.mrb[18].mxu1 }
 0x614   :  { %7246 = vst [vmem:[%s12728_s7] sm:$0xff] %v7240_v12  ;;  %v7243_v16 = vadd.f32 %v7242_v15, %v7202_v14  ;;  %v8292_v17 = vpop.f32.mrb[19].mxu1 }
 0x616   :  { %7247 = vst [vmem:[%s12728_s7 + $0x8] sm:$0xff] %v7243_v16 }

</bundles_post_ra>
